<compile_context>
chip_gen: v7x
topology: tpu7x:2x2x1
jax: 0.10.0
libtpu: 0.0.40
codegen_flags: <defaults>
</compile_context>

<pallas_src>
import jax
import jax.numpy as jnp
import numpy as np
from jax.experimental import pallas as pl
from jax.experimental.pallas import tpu as pltpu


# ----------------------------- Fused CBAM kernel -----------------------------
def _cbam_kernel(x_ref, w1_ref, b1_ref, w2_ref, b2_ref, cw_ref, out_ref, pad_ref):
    # Per grid step (one batch element):
    #   x_ref   : (1, C, H*W)  lane-dense view of the NCHW input
    #   w1_ref  : (hid, C)     Linear(C, hid).weight   (native PyTorch layout)
    #   b1_ref  : (hid, 1)     Linear(C, hid).bias  as a column
    #   w2_ref  : (C, hid)     Linear(hid, C).weight
    #   b2_ref  : (C, 1)       Linear(hid, C).bias  as a column
    #   cw_ref  : (98,) SMEM   Conv2d(2, 1, 7, 7).weight flattened (OIHW order)
    #   out_ref : (1, 1, H, W) spatial attention map
    #   pad_ref : (2, H+6, W+6) VMEM scratch: zero-padded conv input
    H = out_ref.shape[2]
    W = out_ref.shape[3]
    P = 3                                   # padding for the 7x7 conv
    C = x_ref.shape[1]

    x = x_ref[0]                            # (C, H*W), lane-dense

    # ---- channel attention --------------------------------------------------
    avg_c = jnp.mean(x, axis=1, keepdims=True)          # (C, 1) avg_pool2d
    max_c = jnp.max(x, axis=1, keepdims=True)           # (C, 1) max_pool2d
    # pooled[:, 0] = avg, pooled[:, 1] = max  (built without concatenate)
    col = jax.lax.broadcasted_iota(jnp.int32, (C, 2), 1)
    pooled = jnp.where(col == 0, avg_c, max_c)           # (C, 2)

    # Shared MLP (Linear -> ReLU -> Linear) on both pooled vectors at once,
    # column form: y = W @ v + b, so the PyTorch weights are used as-is.
    h = jnp.dot(w1_ref[...], pooled, preferred_element_type=jnp.float32)   # (hid, 2)
    h = jnp.maximum(h + b1_ref[...], 0.0)
    o = jnp.dot(w2_ref[...], h, preferred_element_type=jnp.float32)        # (C, 2)
    # mlp(avg) + mlp(max): each branch gets the second bias once.
    att = jnp.sum(o, axis=1, keepdims=True) + 2.0 * b2_ref[...]            # (C, 1)
    scale = jax.nn.sigmoid(att)                                            # (C, 1)

    # ---- channel-scaled input & spatial pooling (lane-dense) ----------------
    y = x * scale                                        # (C, H*W)
    avg_s = jnp.mean(y, axis=0, keepdims=True)           # (1, H*W) mean over C
    max_s = jnp.max(y, axis=0, keepdims=True)            # (1, H*W) max over C

    # ---- build zero-padded (2, H+6, W+6) conv input in VMEM scratch ---------
    # (scratch stores do the lane->sublane relayout of the two tiny maps)
    pad_ref[...] = jnp.zeros_like(pad_ref)
    for hh in range(H):
        sl = slice(hh * W, (hh + 1) * W)
        pad_ref[0, P + hh:P + hh + 1, P:P + W] = avg_s[:, sl]
        pad_ref[1, P + hh:P + hh + 1, P:P + W] = max_s[:, sl]
    pad = pad_ref[...]                                   # load once, slice as a value

    # ---- 7x7 cross-correlation, 2 in-ch, 1 out-ch, no bias ------------------
    # Fully unrolled; hoisted (c, dh) row bands so inner taps are lane slices
    # only; 4 independent accumulators for ILP; weight reads hoisted from SMEM.
    ks = [cw_ref[i] for i in range(2 * 7 * 7)]
    accs = [jnp.zeros((H, W), jnp.float32) for _ in range(4)]
    t = 0
    for c in range(2):
        for dh in range(7):
            band = pad[c, dh:dh + H, :]                  # (H, W+6) value slice
            for dw in range(7):
                accs[t % 4] = accs[t % 4] + ks[c * 49 + dh * 7 + dw] * band[:, dw:dw + W]
                t += 1
    conv = (accs[0] + accs[1]) + (accs[2] + accs[3])

    out_ref[...] = jax.nn.sigmoid(conv)[None, None, :, :]   # (1, 1, H, W)


# ----------------------------- Wrapper ---------------------------------------
def cbam_forward(x, params):
    """x: (B, C, H, W) f32. Returns CBAM output (B, 1, H, W) f32."""
    w1, b1, w2, b2, conv_w = params       # (hid,C), (hid,), (C,hid), (C,), (98,)
    B, C, H, W = x.shape
    hid = w1.shape[0]
    HW = H * W

    x3 = x.reshape(B, C, HW)              # free: HW is contiguous in NCHW
    b1c = b1.reshape(hid, 1)
    b2c = b2.reshape(C, 1)

    cost = pl.CostEstimate(
        flops=int(B * (2 * 2 * 49 * H * W + 5 * C * H * W + 4 * C * hid)),
        transcendentals=int(B * (C + H * W)),
        bytes_accessed=int(4 * (B * C * HW + B * HW
                                + w1.size + b1.size + w2.size + b2.size + conv_w.size)),
    )

    return pl.pallas_call(
        _cbam_kernel,
        out_shape=jax.ShapeDtypeStruct((B, 1, H, W), jnp.float32),
        grid_spec=pltpu.PrefetchScalarGridSpec(
            num_scalar_prefetch=0,
            grid=(B,),
            in_specs=[
                pl.BlockSpec((1, C, HW), lambda b: (b, 0, 0)),      # x (lane-dense)
                pl.BlockSpec((hid, C), lambda b: (0, 0)),           # w1
                pl.BlockSpec((hid, 1), lambda b: (0, 0)),           # b1 (column)
                pl.BlockSpec((C, hid), lambda b: (0, 0)),           # w2
                pl.BlockSpec((C, 1), lambda b: (0, 0)),             # b2 (column)
                pl.BlockSpec(memory_space=pltpu.MemorySpace.SMEM),  # conv weights (98,)
            ],
            out_specs=pl.BlockSpec((1, 1, H, W), lambda b: (b, 0, 0, 0)),
            scratch_shapes=[pltpu.VMEM((2, H + 6, W + 6), jnp.float32)],
        ),
        compiler_params=pltpu.CompilerParams(dimension_semantics=("parallel",)),
        cost_estimate=cost,
    )(x3, w1, b1c, w2, b2c, conv_w)


# ----------------------------- Pure-JAX reference ----------------------------
def cbam_reference(x, params):
    w1, b1, w2, b2, conv_w = params
    avg = jnp.mean(x, axis=(2, 3))
    mx = jnp.max(x, axis=(2, 3))

    def mlp(v):
        return jnp.maximum(v @ w1.T + b1, 0.0) @ w2.T + b2

    scale = jax.nn.sigmoid(mlp(avg) + mlp(mx))[:, :, None, None]
    y = x * scale
    stacked = jnp.concatenate(
        [jnp.mean(y, axis=1, keepdims=True), jnp.max(y, axis=1, keepdims=True)], axis=1)
    cw = conv_w.reshape(1, 2, 7, 7)
    conv = jax.lax.conv_general_dilated(
        stacked, cw, window_strides=(1, 1), padding=((3, 3), (3, 3)),
        dimension_numbers=("NCHW", "OIHW", "NCHW"))
    return jax.nn.sigmoid(conv)


# ----------------------------- Main -------------------------------------------
if __name__ == "__main__":
    B, C, H, W = 2, 32, 16, 16
    reduction_ratio = 16
    hid = C // reduction_ratio   # 2

    key = jax.random.PRNGKey(0)
    k1, k2, k3, k4, k5, kx = jax.random.split(key, 6)
    # Deterministic synthetic parameters (shapes match the nn.Module __init__,
    # in native PyTorch (out_features, in_features) layout).
    w1 = jax.random.normal(k1, (hid, C), jnp.float32) * 0.1    # Linear(C, C//r).weight
    b1 = jax.random.normal(k2, (hid,), jnp.float32) * 0.1      # Linear(C, C//r).bias
    w2 = jax.random.normal(k3, (C, hid), jnp.float32) * 0.1    # Linear(C//r, C).weight
    b2 = jax.random.normal(k4, (C,), jnp.float32) * 0.1        # Linear(C//r, C).bias
    conv_w = jax.random.normal(k5, (98,), jnp.float32) * 0.05  # Conv2d(2,1,7,7).weight flat
    params = (w1, b1, w2, b2, conv_w)

    x = jax.random.normal(kx, (B, C, H, W), jnp.float32)

    out = jax.block_until_ready(cbam_forward(x, params))
    ref = jax.block_until_ready(cbam_reference(x, params))

    assert out.shape == (B, 1, H, W)
    np.testing.assert_allclose(np.asarray(out), np.asarray(ref), rtol=1e-4, atol=1e-4)

    print("KERNEL_OK")
</pallas_src>

<mosaic_0001>
module attributes {stable_mosaic.version = 11 : i64} {
  func.func @_cbam_kernel(%arg0: i32, %arg1: memref<1x32x256xf32, #tpu.memory_space<vmem>>, %arg2: memref<2x32xf32, #tpu.memory_space<vmem>>, %arg3: memref<2x1xf32, #tpu.memory_space<vmem>>, %arg4: memref<32x2xf32, #tpu.memory_space<vmem>>, %arg5: memref<32x1xf32, #tpu.memory_space<vmem>>, %arg6: memref<98xf32, #tpu.memory_space<smem>>, %arg7: memref<1x1x16x16xf32, #tpu.memory_space<vmem>>, %arg8: memref<2x22x22xf32, #tpu.memory_space<vmem>>) attributes {dimension_semantics = [#tpu.dimension_semantics<parallel>], iteration_bounds = array<i64: 2>, scalar_prefetch = 0 : i64, scratch_operands = 1 : i64, tpu.core_type = #tpu.core_type<tc>, window_params = [{transform_indices = @transform_0, window_bounds = array<i64: 1, 32, 256>}, {pipeline_mode = #tpu.pipeline_mode<synchronous>, transform_indices = @transform_1, window_bounds = array<i64: 2, 32>}, {pipeline_mode = #tpu.pipeline_mode<synchronous>, transform_indices = @transform_2, window_bounds = array<i64: 2, 1>}, {pipeline_mode = #tpu.pipeline_mode<synchronous>, transform_indices = @transform_3, window_bounds = array<i64: 32, 2>}, {pipeline_mode = #tpu.pipeline_mode<synchronous>, transform_indices = @transform_4, window_bounds = array<i64: 32, 1>}, {transform_indices = @transform_5, window_bounds = array<i64: 98>}, {transform_indices = @transform_6, window_bounds = array<i64: 1, 1, 16, 16>}]} {
    %c0 = arith.constant 0 : index
    %c0_0 = arith.constant 0 : index
    %c0_1 = arith.constant 0 : index
    %0 = vector.load %arg1[%c0, %c0_0, %c0_1] : memref<1x32x256xf32, #tpu.memory_space<vmem>>, vector<1x32x256xf32>
    %1 = vector.shape_cast %0 : vector<1x32x256xf32> to vector<32x256xf32>
    %cst = arith.constant dense<0.000000e+00> : vector<32xf32>
    %2 = vector.multi_reduction <add>, %1, %cst [1] : vector<32x256xf32> to vector<32xf32>
    %3 = vector.shape_cast %2 : vector<32xf32> to vector<32x1xf32>
    %cst_2 = arith.constant 2.560000e+02 : f32
    %4 = vector.broadcast %cst_2 : f32 to vector<32x1xf32>
    %5 = arith.divf %3, %4 : vector<32x1xf32>
    %cst_3 = arith.constant dense<0xFF800000> : vector<32xf32>
    %6 = vector.multi_reduction <maximumf>, %1, %cst_3 [1] : vector<32x256xf32> to vector<32xf32>
    %7 = vector.shape_cast %6 : vector<32xf32> to vector<32x1xf32>
    %8 = tpu.iota {dimensions = array<i32: 1>} : vector<32x2xi32>
    %c0_i32 = arith.constant 0 : i32
    %9 = vector.broadcast %c0_i32 : i32 to vector<32x2xi32>
    %10 = arith.cmpi eq, %8, %9 : vector<32x2xi32>
    %11 = vector.shape_cast %5 : vector<32x1xf32> to vector<32x1xf32>
    %12 = vector.broadcast %11 : vector<32x1xf32> to vector<32x2xf32>
    %13 = vector.shape_cast %7 : vector<32x1xf32> to vector<32x1xf32>
    %14 = vector.broadcast %13 : vector<32x1xf32> to vector<32x2xf32>
    %15 = arith.select %10, %12, %14 : vector<32x2xi1>, vector<32x2xf32>
    %c0_4 = arith.constant 0 : index
    %c0_5 = arith.constant 0 : index
    %16 = vector.load %arg2[%c0_4, %c0_5] : memref<2x32xf32, #tpu.memory_space<vmem>>, vector<2x32xf32>
    %cst_6 = arith.constant dense<0.000000e+00> : vector<2x2xf32>
    %17 = tpu.matmul %16, %15, %cst_6 {dimension_numbers = #tpu.dot_dimension_numbers<[1], [0], [0], [1], [0, 0, 1, 1], [], []>} : vector<2x32xf32>, vector<32x2xf32>, vector<2x2xf32> -> vector<2x2xf32>
    %c0_7 = arith.constant 0 : index
    %c0_8 = arith.constant 0 : index
    %18 = vector.load %arg3[%c0_7, %c0_8] : memref<2x1xf32, #tpu.memory_space<vmem>>, vector<2x1xf32>
    %19 = vector.broadcast %18 : vector<2x1xf32> to vector<2x2xf32>
    %20 = arith.addf %17, %19 : vector<2x2xf32>
    %cst_9 = arith.constant 0.000000e+00 : f32
    %21 = vector.broadcast %cst_9 : f32 to vector<2x2xf32>
    %22 = arith.maximumf %20, %21 : vector<2x2xf32>
    %c0_10 = arith.constant 0 : index
    %c0_11 = arith.constant 0 : index
    %23 = vector.load %arg4[%c0_10, %c0_11] : memref<32x2xf32, #tpu.memory_space<vmem>>, vector<32x2xf32>
    %cst_12 = arith.constant dense<0.000000e+00> : vector<32x2xf32>
    %24 = tpu.matmul %23, %22, %cst_12 {dimension_numbers = #tpu.dot_dimension_numbers<[1], [0], [0], [1], [0, 0, 1, 1], [], []>} : vector<32x2xf32>, vector<2x2xf32>, vector<32x2xf32> -> vector<32x2xf32>
    %cst_13 = arith.constant dense<0.000000e+00> : vector<32xf32>
    %25 = vector.multi_reduction <add>, %24, %cst_13 [1] : vector<32x2xf32> to vector<32xf32>
    %26 = vector.shape_cast %25 : vector<32xf32> to vector<32x1xf32>
    %c0_14 = arith.constant 0 : index
    %c0_15 = arith.constant 0 : index
    %27 = vector.load %arg5[%c0_14, %c0_15] : memref<32x1xf32, #tpu.memory_space<vmem>>, vector<32x1xf32>
    %cst_16 = arith.constant 2.000000e+00 : f32
    %28 = vector.broadcast %cst_16 : f32 to vector<32x1xf32>
    %29 = arith.mulf %28, %27 : vector<32x1xf32>
    %30 = arith.addf %26, %29 : vector<32x1xf32>
    %31 = arith.negf %30 : vector<32x1xf32>
    %32 = math.exp %31 : vector<32x1xf32>
    %cst_17 = arith.constant 1.000000e+00 : f32
    %33 = vector.broadcast %cst_17 : f32 to vector<32x1xf32>
    %34 = arith.addf %33, %32 : vector<32x1xf32>
    %35 = arith.divf %33, %34 : vector<32x1xf32>
    %36 = vector.broadcast %35 : vector<32x1xf32> to vector<32x256xf32>
    %37 = arith.mulf %1, %36 : vector<32x256xf32>
    %cst_18 = arith.constant dense<0.000000e+00> : vector<256xf32>
    %38 = vector.multi_reduction <add>, %37, %cst_18 [0] : vector<32x256xf32> to vector<256xf32>
    %39 = vector.shape_cast %38 : vector<256xf32> to vector<1x256xf32>
    %cst_19 = arith.constant 3.200000e+01 : f32
    %40 = vector.broadcast %cst_19 : f32 to vector<1x256xf32>
    %41 = arith.divf %39, %40 : vector<1x256xf32>
    %cst_20 = arith.constant dense<0xFF800000> : vector<256xf32>
    %42 = vector.multi_reduction <maximumf>, %37, %cst_20 [0] : vector<32x256xf32> to vector<256xf32>
    %43 = vector.shape_cast %42 : vector<256xf32> to vector<1x256xf32>
    %cst_21 = arith.constant 0.000000e+00 : f32
    %44 = vector.broadcast %cst_21 : f32 to vector<2x22x22xf32>
    %c0_22 = arith.constant 0 : index
    %c0_23 = arith.constant 0 : index
    %c0_24 = arith.constant 0 : index
    %45 = vector.load %arg8[%c0_22, %c0_23, %c0_24] : memref<2x22x22xf32, #tpu.memory_space<vmem>>, vector<2x22x22xf32>
    tpu.vector_store %arg8[%c0_22, %c0_23, %c0_24], %44 {strides = array<i32>} : memref<2x22x22xf32, #tpu.memory_space<vmem>>, vector<2x22x22xf32>,
    %46 = vector.extract_strided_slice %41 {offsets = [0, 0], sizes = [1, 16], strides = [1, 1]} : vector<1x256xf32> to vector<1x16xf32>
    %c0_25 = arith.constant 0 : index
    %c3 = arith.constant 3 : index
    %c3_26 = arith.constant 3 : index
    %47 = vector.load %arg8[%c0_25, %c3, %c3_26] : memref<2x22x22xf32, #tpu.memory_space<vmem>>, vector<1x1x16xf32>
    %48 = vector.shape_cast %47 : vector<1x1x16xf32> to vector<1x16xf32>
    %49 = vector.shape_cast %46 : vector<1x16xf32> to vector<1x1x16xf32>
    tpu.vector_store %arg8[%c0_25, %c3, %c3_26], %49 {strides = array<i32>} : memref<2x22x22xf32, #tpu.memory_space<vmem>>, vector<1x1x16xf32>,
    %50 = vector.extract_strided_slice %43 {offsets = [0, 0], sizes = [1, 16], strides = [1, 1]} : vector<1x256xf32> to vector<1x16xf32>
    %c1 = arith.constant 1 : index
    %c3_27 = arith.constant 3 : index
    %c3_28 = arith.constant 3 : index
    %51 = vector.load %arg8[%c1, %c3_27, %c3_28] : memref<2x22x22xf32, #tpu.memory_space<vmem>>, vector<1x1x16xf32>
    %52 = vector.shape_cast %51 : vector<1x1x16xf32> to vector<1x16xf32>
    %53 = vector.shape_cast %50 : vector<1x16xf32> to vector<1x1x16xf32>
    tpu.vector_store %arg8[%c1, %c3_27, %c3_28], %53 {strides = array<i32>} : memref<2x22x22xf32, #tpu.memory_space<vmem>>, vector<1x1x16xf32>,
    %54 = vector.extract_strided_slice %41 {offsets = [0, 16], sizes = [1, 16], strides = [1, 1]} : vector<1x256xf32> to vector<1x16xf32>
    %c0_29 = arith.constant 0 : index
    %c4 = arith.constant 4 : index
    %c3_30 = arith.constant 3 : index
    %55 = vector.load %arg8[%c0_29, %c4, %c3_30] : memref<2x22x22xf32, #tpu.memory_space<vmem>>, vector<1x1x16xf32>
    %56 = vector.shape_cast %55 : vector<1x1x16xf32> to vector<1x16xf32>
    %57 = vector.shape_cast %54 : vector<1x16xf32> to vector<1x1x16xf32>
    tpu.vector_store %arg8[%c0_29, %c4, %c3_30], %57 {strides = array<i32>} : memref<2x22x22xf32, #tpu.memory_space<vmem>>, vector<1x1x16xf32>,
    %58 = vector.extract_strided_slice %43 {offsets = [0, 16], sizes = [1, 16], strides = [1, 1]} : vector<1x256xf32> to vector<1x16xf32>
    %c1_31 = arith.constant 1 : index
    %c4_32 = arith.constant 4 : index
    %c3_33 = arith.constant 3 : index
    %59 = vector.load %arg8[%c1_31, %c4_32, %c3_33] : memref<2x22x22xf32, #tpu.memory_space<vmem>>, vector<1x1x16xf32>
    %60 = vector.shape_cast %59 : vector<1x1x16xf32> to vector<1x16xf32>
    %61 = vector.shape_cast %58 : vector<1x16xf32> to vector<1x1x16xf32>
    tpu.vector_store %arg8[%c1_31, %c4_32, %c3_33], %61 {strides = array<i32>} : memref<2x22x22xf32, #tpu.memory_space<vmem>>, vector<1x1x16xf32>,
    %62 = vector.extract_strided_slice %41 {offsets = [0, 32], sizes = [1, 16], strides = [1, 1]} : vector<1x256xf32> to vector<1x16xf32>
    %c0_34 = arith.constant 0 : index
    %c5 = arith.constant 5 : index
    %c3_35 = arith.constant 3 : index
    %63 = vector.load %arg8[%c0_34, %c5, %c3_35] : memref<2x22x22xf32, #tpu.memory_space<vmem>>, vector<1x1x16xf32>
    %64 = vector.shape_cast %63 : vector<1x1x16xf32> to vector<1x16xf32>
    %65 = vector.shape_cast %62 : vector<1x16xf32> to vector<1x1x16xf32>
    tpu.vector_store %arg8[%c0_34, %c5, %c3_35], %65 {strides = array<i32>} : memref<2x22x22xf32, #tpu.memory_space<vmem>>, vector<1x1x16xf32>,
    %66 = vector.extract_strided_slice %43 {offsets = [0, 32], sizes = [1, 16], strides = [1, 1]} : vector<1x256xf32> to vector<1x16xf32>
    %c1_36 = arith.constant 1 : index
    %c5_37 = arith.constant 5 : index
    %c3_38 = arith.constant 3 : index
    %67 = vector.load %arg8[%c1_36, %c5_37, %c3_38] : memref<2x22x22xf32, #tpu.memory_space<vmem>>, vector<1x1x16xf32>
    %68 = vector.shape_cast %67 : vector<1x1x16xf32> to vector<1x16xf32>
    %69 = vector.shape_cast %66 : vector<1x16xf32> to vector<1x1x16xf32>
    tpu.vector_store %arg8[%c1_36, %c5_37, %c3_38], %69 {strides = array<i32>} : memref<2x22x22xf32, #tpu.memory_space<vmem>>, vector<1x1x16xf32>,
    %70 = vector.extract_strided_slice %41 {offsets = [0, 48], sizes = [1, 16], strides = [1, 1]} : vector<1x256xf32> to vector<1x16xf32>
    %c0_39 = arith.constant 0 : index
    %c6 = arith.constant 6 : index
    %c3_40 = arith.constant 3 : index
    %71 = vector.load %arg8[%c0_39, %c6, %c3_40] : memref<2x22x22xf32, #tpu.memory_space<vmem>>, vector<1x1x16xf32>
    %72 = vector.shape_cast %71 : vector<1x1x16xf32> to vector<1x16xf32>
    %73 = vector.shape_cast %70 : vector<1x16xf32> to vector<1x1x16xf32>
    tpu.vector_store %arg8[%c0_39, %c6, %c3_40], %73 {strides = array<i32>} : memref<2x22x22xf32, #tpu.memory_space<vmem>>, vector<1x1x16xf32>,
    %74 = vector.extract_strided_slice %43 {offsets = [0, 48], sizes = [1, 16], strides = [1, 1]} : vector<1x256xf32> to vector<1x16xf32>
    %c1_41 = arith.constant 1 : index
    %c6_42 = arith.constant 6 : index
    %c3_43 = arith.constant 3 : index
    %75 = vector.load %arg8[%c1_41, %c6_42, %c3_43] : memref<2x22x22xf32, #tpu.memory_space<vmem>>, vector<1x1x16xf32>
    %76 = vector.shape_cast %75 : vector<1x1x16xf32> to vector<1x16xf32>
    %77 = vector.shape_cast %74 : vector<1x16xf32> to vector<1x1x16xf32>
    tpu.vector_store %arg8[%c1_41, %c6_42, %c3_43], %77 {strides = array<i32>} : memref<2x22x22xf32, #tpu.memory_space<vmem>>, vector<1x1x16xf32>,
    %78 = vector.extract_strided_slice %41 {offsets = [0, 64], sizes = [1, 16], strides = [1, 1]} : vector<1x256xf32> to vector<1x16xf32>
    %c0_44 = arith.constant 0 : index
    %c7 = arith.constant 7 : index
    %c3_45 = arith.constant 3 : index
    %79 = vector.load %arg8[%c0_44, %c7, %c3_45] : memref<2x22x22xf32, #tpu.memory_space<vmem>>, vector<1x1x16xf32>
    %80 = vector.shape_cast %79 : vector<1x1x16xf32> to vector<1x16xf32>
    %81 = vector.shape_cast %78 : vector<1x16xf32> to vector<1x1x16xf32>
    tpu.vector_store %arg8[%c0_44, %c7, %c3_45], %81 {strides = array<i32>} : memref<2x22x22xf32, #tpu.memory_space<vmem>>, vector<1x1x16xf32>,
    %82 = vector.extract_strided_slice %43 {offsets = [0, 64], sizes = [1, 16], strides = [1, 1]} : vector<1x256xf32> to vector<1x16xf32>
    %c1_46 = arith.constant 1 : index
    %c7_47 = arith.constant 7 : index
    %c3_48 = arith.constant 3 : index
    %83 = vector.load %arg8[%c1_46, %c7_47, %c3_48] : memref<2x22x22xf32, #tpu.memory_space<vmem>>, vector<1x1x16xf32>
    %84 = vector.shape_cast %83 : vector<1x1x16xf32> to vector<1x16xf32>
    %85 = vector.shape_cast %82 : vector<1x16xf32> to vector<1x1x16xf32>
    tpu.vector_store %arg8[%c1_46, %c7_47, %c3_48], %85 {strides = array<i32>} : memref<2x22x22xf32, #tpu.memory_space<vmem>>, vector<1x1x16xf32>,
    %86 = vector.extract_strided_slice %41 {offsets = [0, 80], sizes = [1, 16], strides = [1, 1]} : vector<1x256xf32> to vector<1x16xf32>
    %c0_49 = arith.constant 0 : index
    %c8 = arith.constant 8 : index
    %c3_50 = arith.constant 3 : index
    %87 = vector.load %arg8[%c0_49, %c8, %c3_50] : memref<2x22x22xf32, #tpu.memory_space<vmem>>, vector<1x1x16xf32>
    %88 = vector.shape_cast %87 : vector<1x1x16xf32> to vector<1x16xf32>
    %89 = vector.shape_cast %86 : vector<1x16xf32> to vector<1x1x16xf32>
    tpu.vector_store %arg8[%c0_49, %c8, %c3_50], %89 {strides = array<i32>} : memref<2x22x22xf32, #tpu.memory_space<vmem>>, vector<1x1x16xf32>,
    %90 = vector.extract_strided_slice %43 {offsets = [0, 80], sizes = [1, 16], strides = [1, 1]} : vector<1x256xf32> to vector<1x16xf32>
    %c1_51 = arith.constant 1 : index
    %c8_52 = arith.constant 8 : index
    %c3_53 = arith.constant 3 : index
    %91 = vector.load %arg8[%c1_51, %c8_52, %c3_53] : memref<2x22x22xf32, #tpu.memory_space<vmem>>, vector<1x1x16xf32>
    %92 = vector.shape_cast %91 : vector<1x1x16xf32> to vector<1x16xf32>
    %93 = vector.shape_cast %90 : vector<1x16xf32> to vector<1x1x16xf32>
    tpu.vector_store %arg8[%c1_51, %c8_52, %c3_53], %93 {strides = array<i32>} : memref<2x22x22xf32, #tpu.memory_space<vmem>>, vector<1x1x16xf32>,
    %94 = vector.extract_strided_slice %41 {offsets = [0, 96], sizes = [1, 16], strides = [1, 1]} : vector<1x256xf32> to vector<1x16xf32>
    %c0_54 = arith.constant 0 : index
    %c9 = arith.constant 9 : index
    %c3_55 = arith.constant 3 : index
    %95 = vector.load %arg8[%c0_54, %c9, %c3_55] : memref<2x22x22xf32, #tpu.memory_space<vmem>>, vector<1x1x16xf32>
    %96 = vector.shape_cast %95 : vector<1x1x16xf32> to vector<1x16xf32>
    %97 = vector.shape_cast %94 : vector<1x16xf32> to vector<1x1x16xf32>
    tpu.vector_store %arg8[%c0_54, %c9, %c3_55], %97 {strides = array<i32>} : memref<2x22x22xf32, #tpu.memory_space<vmem>>, vector<1x1x16xf32>,
    %98 = vector.extract_strided_slice %43 {offsets = [0, 96], sizes = [1, 16], strides = [1, 1]} : vector<1x256xf32> to vector<1x16xf32>
    %c1_56 = arith.constant 1 : index
    %c9_57 = arith.constant 9 : index
    %c3_58 = arith.constant 3 : index
    %99 = vector.load %arg8[%c1_56, %c9_57, %c3_58] : memref<2x22x22xf32, #tpu.memory_space<vmem>>, vector<1x1x16xf32>
    %100 = vector.shape_cast %99 : vector<1x1x16xf32> to vector<1x16xf32>
    %101 = vector.shape_cast %98 : vector<1x16xf32> to vector<1x1x16xf32>
    tpu.vector_store %arg8[%c1_56, %c9_57, %c3_58], %101 {strides = array<i32>} : memref<2x22x22xf32, #tpu.memory_space<vmem>>, vector<1x1x16xf32>,
    %102 = vector.extract_strided_slice %41 {offsets = [0, 112], sizes = [1, 16], strides = [1, 1]} : vector<1x256xf32> to vector<1x16xf32>
    %c0_59 = arith.constant 0 : index
    %c10 = arith.constant 10 : index
    %c3_60 = arith.constant 3 : index
    %103 = vector.load %arg8[%c0_59, %c10, %c3_60] : memref<2x22x22xf32, #tpu.memory_space<vmem>>, vector<1x1x16xf32>
    %104 = vector.shape_cast %103 : vector<1x1x16xf32> to vector<1x16xf32>
    %105 = vector.shape_cast %102 : vector<1x16xf32> to vector<1x1x16xf32>
    tpu.vector_store %arg8[%c0_59, %c10, %c3_60], %105 {strides = array<i32>} : memref<2x22x22xf32, #tpu.memory_space<vmem>>, vector<1x1x16xf32>,
    %106 = vector.extract_strided_slice %43 {offsets = [0, 112], sizes = [1, 16], strides = [1, 1]} : vector<1x256xf32> to vector<1x16xf32>
    %c1_61 = arith.constant 1 : index
    %c10_62 = arith.constant 10 : index
    %c3_63 = arith.constant 3 : index
    %107 = vector.load %arg8[%c1_61, %c10_62, %c3_63] : memref<2x22x22xf32, #tpu.memory_space<vmem>>, vector<1x1x16xf32>
    %108 = vector.shape_cast %107 : vector<1x1x16xf32> to vector<1x16xf32>
    %109 = vector.shape_cast %106 : vector<1x16xf32> to vector<1x1x16xf32>
    tpu.vector_store %arg8[%c1_61, %c10_62, %c3_63], %109 {strides = array<i32>} : memref<2x22x22xf32, #tpu.memory_space<vmem>>, vector<1x1x16xf32>,
    %110 = vector.extract_strided_slice %41 {offsets = [0, 128], sizes = [1, 16], strides = [1, 1]} : vector<1x256xf32> to vector<1x16xf32>
    %c0_64 = arith.constant 0 : index
    %c11 = arith.constant 11 : index
    %c3_65 = arith.constant 3 : index
    %111 = vector.load %arg8[%c0_64, %c11, %c3_65] : memref<2x22x22xf32, #tpu.memory_space<vmem>>, vector<1x1x16xf32>
    %112 = vector.shape_cast %111 : vector<1x1x16xf32> to vector<1x16xf32>
    %113 = vector.shape_cast %110 : vector<1x16xf32> to vector<1x1x16xf32>
    tpu.vector_store %arg8[%c0_64, %c11, %c3_65], %113 {strides = array<i32>} : memref<2x22x22xf32, #tpu.memory_space<vmem>>, vector<1x1x16xf32>,
    %114 = vector.extract_strided_slice %43 {offsets = [0, 128], sizes = [1, 16], strides = [1, 1]} : vector<1x256xf32> to vector<1x16xf32>
    %c1_66 = arith.constant 1 : index
    %c11_67 = arith.constant 11 : index
    %c3_68 = arith.constant 3 : index
    %115 = vector.load %arg8[%c1_66, %c11_67, %c3_68] : memref<2x22x22xf32, #tpu.memory_space<vmem>>, vector<1x1x16xf32>
    %116 = vector.shape_cast %115 : vector<1x1x16xf32> to vector<1x16xf32>
    %117 = vector.shape_cast %114 : vector<1x16xf32> to vector<1x1x16xf32>
    tpu.vector_store %arg8[%c1_66, %c11_67, %c3_68], %117 {strides = array<i32>} : memref<2x22x22xf32, #tpu.memory_space<vmem>>, vector<1x1x16xf32>,
    %118 = vector.extract_strided_slice %41 {offsets = [0, 144], sizes = [1, 16], strides = [1, 1]} : vector<1x256xf32> to vector<1x16xf32>
    %c0_69 = arith.constant 0 : index
    %c12 = arith.constant 12 : index
    %c3_70 = arith.constant 3 : index
    %119 = vector.load %arg8[%c0_69, %c12, %c3_70] : memref<2x22x22xf32, #tpu.memory_space<vmem>>, vector<1x1x16xf32>
    %120 = vector.shape_cast %119 : vector<1x1x16xf32> to vector<1x16xf32>
    %121 = vector.shape_cast %118 : vector<1x16xf32> to vector<1x1x16xf32>
    tpu.vector_store %arg8[%c0_69, %c12, %c3_70], %121 {strides = array<i32>} : memref<2x22x22xf32, #tpu.memory_space<vmem>>, vector<1x1x16xf32>,
    %122 = vector.extract_strided_slice %43 {offsets = [0, 144], sizes = [1, 16], strides = [1, 1]} : vector<1x256xf32> to vector<1x16xf32>
    %c1_71 = arith.constant 1 : index
    %c12_72 = arith.constant 12 : index
    %c3_73 = arith.constant 3 : index
    %123 = vector.load %arg8[%c1_71, %c12_72, %c3_73] : memref<2x22x22xf32, #tpu.memory_space<vmem>>, vector<1x1x16xf32>
    %124 = vector.shape_cast %123 : vector<1x1x16xf32> to vector<1x16xf32>
    %125 = vector.shape_cast %122 : vector<1x16xf32> to vector<1x1x16xf32>
    tpu.vector_store %arg8[%c1_71, %c12_72, %c3_73], %125 {strides = array<i32>} : memref<2x22x22xf32, #tpu.memory_space<vmem>>, vector<1x1x16xf32>,
    %126 = vector.extract_strided_slice %41 {offsets = [0, 160], sizes = [1, 16], strides = [1, 1]} : vector<1x256xf32> to vector<1x16xf32>
    %c0_74 = arith.constant 0 : index
    %c13 = arith.constant 13 : index
    %c3_75 = arith.constant 3 : index
    %127 = vector.load %arg8[%c0_74, %c13, %c3_75] : memref<2x22x22xf32, #tpu.memory_space<vmem>>, vector<1x1x16xf32>
    %128 = vector.shape_cast %127 : vector<1x1x16xf32> to vector<1x16xf32>
    %129 = vector.shape_cast %126 : vector<1x16xf32> to vector<1x1x16xf32>
    tpu.vector_store %arg8[%c0_74, %c13, %c3_75], %129 {strides = array<i32>} : memref<2x22x22xf32, #tpu.memory_space<vmem>>, vector<1x1x16xf32>,
    %130 = vector.extract_strided_slice %43 {offsets = [0, 160], sizes = [1, 16], strides = [1, 1]} : vector<1x256xf32> to vector<1x16xf32>
    %c1_76 = arith.constant 1 : index
    %c13_77 = arith.constant 13 : index
    %c3_78 = arith.constant 3 : index
    %131 = vector.load %arg8[%c1_76, %c13_77, %c3_78] : memref<2x22x22xf32, #tpu.memory_space<vmem>>, vector<1x1x16xf32>
    %132 = vector.shape_cast %131 : vector<1x1x16xf32> to vector<1x16xf32>
    %133 = vector.shape_cast %130 : vector<1x16xf32> to vector<1x1x16xf32>
    tpu.vector_store %arg8[%c1_76, %c13_77, %c3_78], %133 {strides = array<i32>} : memref<2x22x22xf32, #tpu.memory_space<vmem>>, vector<1x1x16xf32>,
    %134 = vector.extract_strided_slice %41 {offsets = [0, 176], sizes = [1, 16], strides = [1, 1]} : vector<1x256xf32> to vector<1x16xf32>
    %c0_79 = arith.constant 0 : index
    %c14 = arith.constant 14 : index
    %c3_80 = arith.constant 3 : index
    %135 = vector.load %arg8[%c0_79, %c14, %c3_80] : memref<2x22x22xf32, #tpu.memory_space<vmem>>, vector<1x1x16xf32>
    %136 = vector.shape_cast %135 : vector<1x1x16xf32> to vector<1x16xf32>
    %137 = vector.shape_cast %134 : vector<1x16xf32> to vector<1x1x16xf32>
    tpu.vector_store %arg8[%c0_79, %c14, %c3_80], %137 {strides = array<i32>} : memref<2x22x22xf32, #tpu.memory_space<vmem>>, vector<1x1x16xf32>,
    %138 = vector.extract_strided_slice %43 {offsets = [0, 176], sizes = [1, 16], strides = [1, 1]} : vector<1x256xf32> to vector<1x16xf32>
    %c1_81 = arith.constant 1 : index
    %c14_82 = arith.constant 14 : index
    %c3_83 = arith.constant 3 : index
    %139 = vector.load %arg8[%c1_81, %c14_82, %c3_83] : memref<2x22x22xf32, #tpu.memory_space<vmem>>, vector<1x1x16xf32>
    %140 = vector.shape_cast %139 : vector<1x1x16xf32> to vector<1x16xf32>
    %141 = vector.shape_cast %138 : vector<1x16xf32> to vector<1x1x16xf32>
    tpu.vector_store %arg8[%c1_81, %c14_82, %c3_83], %141 {strides = array<i32>} : memref<2x22x22xf32, #tpu.memory_space<vmem>>, vector<1x1x16xf32>,
    %142 = vector.extract_strided_slice %41 {offsets = [0, 192], sizes = [1, 16], strides = [1, 1]} : vector<1x256xf32> to vector<1x16xf32>
    %c0_84 = arith.constant 0 : index
    %c15 = arith.constant 15 : index
    %c3_85 = arith.constant 3 : index
    %143 = vector.load %arg8[%c0_84, %c15, %c3_85] : memref<2x22x22xf32, #tpu.memory_space<vmem>>, vector<1x1x16xf32>
    %144 = vector.shape_cast %143 : vector<1x1x16xf32> to vector<1x16xf32>
    %145 = vector.shape_cast %142 : vector<1x16xf32> to vector<1x1x16xf32>
    tpu.vector_store %arg8[%c0_84, %c15, %c3_85], %145 {strides = array<i32>} : memref<2x22x22xf32, #tpu.memory_space<vmem>>, vector<1x1x16xf32>,
    %146 = vector.extract_strided_slice %43 {offsets = [0, 192], sizes = [1, 16], strides = [1, 1]} : vector<1x256xf32> to vector<1x16xf32>
    %c1_86 = arith.constant 1 : index
    %c15_87 = arith.constant 15 : index
    %c3_88 = arith.constant 3 : index
    %147 = vector.load %arg8[%c1_86, %c15_87, %c3_88] : memref<2x22x22xf32, #tpu.memory_space<vmem>>, vector<1x1x16xf32>
    %148 = vector.shape_cast %147 : vector<1x1x16xf32> to vector<1x16xf32>
    %149 = vector.shape_cast %146 : vector<1x16xf32> to vector<1x1x16xf32>
    tpu.vector_store %arg8[%c1_86, %c15_87, %c3_88], %149 {strides = array<i32>} : memref<2x22x22xf32, #tpu.memory_space<vmem>>, vector<1x1x16xf32>,
    %150 = vector.extract_strided_slice %41 {offsets = [0, 208], sizes = [1, 16], strides = [1, 1]} : vector<1x256xf32> to vector<1x16xf32>
    %c0_89 = arith.constant 0 : index
    %c16 = arith.constant 16 : index
    %c3_90 = arith.constant 3 : index
    %151 = vector.load %arg8[%c0_89, %c16, %c3_90] : memref<2x22x22xf32, #tpu.memory_space<vmem>>, vector<1x1x16xf32>
    %152 = vector.shape_cast %151 : vector<1x1x16xf32> to vector<1x16xf32>
    %153 = vector.shape_cast %150 : vector<1x16xf32> to vector<1x1x16xf32>
    tpu.vector_store %arg8[%c0_89, %c16, %c3_90], %153 {strides = array<i32>} : memref<2x22x22xf32, #tpu.memory_space<vmem>>, vector<1x1x16xf32>,
    %154 = vector.extract_strided_slice %43 {offsets = [0, 208], sizes = [1, 16], strides = [1, 1]} : vector<1x256xf32> to vector<1x16xf32>
    %c1_91 = arith.constant 1 : index
    %c16_92 = arith.constant 16 : index
    %c3_93 = arith.constant 3 : index
    %155 = vector.load %arg8[%c1_91, %c16_92, %c3_93] : memref<2x22x22xf32, #tpu.memory_space<vmem>>, vector<1x1x16xf32>
    %156 = vector.shape_cast %155 : vector<1x1x16xf32> to vector<1x16xf32>
    %157 = vector.shape_cast %154 : vector<1x16xf32> to vector<1x1x16xf32>
    tpu.vector_store %arg8[%c1_91, %c16_92, %c3_93], %157 {strides = array<i32>} : memref<2x22x22xf32, #tpu.memory_space<vmem>>, vector<1x1x16xf32>,
    %158 = vector.extract_strided_slice %41 {offsets = [0, 224], sizes = [1, 16], strides = [1, 1]} : vector<1x256xf32> to vector<1x16xf32>
    %c0_94 = arith.constant 0 : index
    %c17 = arith.constant 17 : index
    %c3_95 = arith.constant 3 : index
    %159 = vector.load %arg8[%c0_94, %c17, %c3_95] : memref<2x22x22xf32, #tpu.memory_space<vmem>>, vector<1x1x16xf32>
    %160 = vector.shape_cast %159 : vector<1x1x16xf32> to vector<1x16xf32>
    %161 = vector.shape_cast %158 : vector<1x16xf32> to vector<1x1x16xf32>
    tpu.vector_store %arg8[%c0_94, %c17, %c3_95], %161 {strides = array<i32>} : memref<2x22x22xf32, #tpu.memory_space<vmem>>, vector<1x1x16xf32>,
    %162 = vector.extract_strided_slice %43 {offsets = [0, 224], sizes = [1, 16], strides = [1, 1]} : vector<1x256xf32> to vector<1x16xf32>
    %c1_96 = arith.constant 1 : index
    %c17_97 = arith.constant 17 : index
    %c3_98 = arith.constant 3 : index
    %163 = vector.load %arg8[%c1_96, %c17_97, %c3_98] : memref<2x22x22xf32, #tpu.memory_space<vmem>>, vector<1x1x16xf32>
    %164 = vector.shape_cast %163 : vector<1x1x16xf32> to vector<1x16xf32>
    %165 = vector.shape_cast %162 : vector<1x16xf32> to vector<1x1x16xf32>
    tpu.vector_store %arg8[%c1_96, %c17_97, %c3_98], %165 {strides = array<i32>} : memref<2x22x22xf32, #tpu.memory_space<vmem>>, vector<1x1x16xf32>,
    %166 = vector.extract_strided_slice %41 {offsets = [0, 240], sizes = [1, 16], strides = [1, 1]} : vector<1x256xf32> to vector<1x16xf32>
    %c0_99 = arith.constant 0 : index
    %c18 = arith.constant 18 : index
    %c3_100 = arith.constant 3 : index
    %167 = vector.load %arg8[%c0_99, %c18, %c3_100] : memref<2x22x22xf32, #tpu.memory_space<vmem>>, vector<1x1x16xf32>
    %168 = vector.shape_cast %167 : vector<1x1x16xf32> to vector<1x16xf32>
    %169 = vector.shape_cast %166 : vector<1x16xf32> to vector<1x1x16xf32>
    tpu.vector_store %arg8[%c0_99, %c18, %c3_100], %169 {strides = array<i32>} : memref<2x22x22xf32, #tpu.memory_space<vmem>>, vector<1x1x16xf32>,
    %170 = vector.extract_strided_slice %43 {offsets = [0, 240], sizes = [1, 16], strides = [1, 1]} : vector<1x256xf32> to vector<1x16xf32>
    %c1_101 = arith.constant 1 : index
    %c18_102 = arith.constant 18 : index
    %c3_103 = arith.constant 3 : index
    %171 = vector.load %arg8[%c1_101, %c18_102, %c3_103] : memref<2x22x22xf32, #tpu.memory_space<vmem>>, vector<1x1x16xf32>
    %172 = vector.shape_cast %171 : vector<1x1x16xf32> to vector<1x16xf32>
    %173 = vector.shape_cast %170 : vector<1x16xf32> to vector<1x1x16xf32>
    tpu.vector_store %arg8[%c1_101, %c18_102, %c3_103], %173 {strides = array<i32>} : memref<2x22x22xf32, #tpu.memory_space<vmem>>, vector<1x1x16xf32>,
    %c0_104 = arith.constant 0 : index
    %c0_105 = arith.constant 0 : index
    %c0_106 = arith.constant 0 : index
    %174 = vector.load %arg8[%c0_104, %c0_105, %c0_106] : memref<2x22x22xf32, #tpu.memory_space<vmem>>, vector<2x22x22xf32>
    %c0_107 = arith.constant 0 : index
    %175 = memref.load %arg6[%c0_107] : memref<98xf32, #tpu.memory_space<smem>>
    %c1_108 = arith.constant 1 : index
    %176 = memref.load %arg6[%c1_108] : memref<98xf32, #tpu.memory_space<smem>>
    %c2 = arith.constant 2 : index
    %177 = memref.load %arg6[%c2] : memref<98xf32, #tpu.memory_space<smem>>
    %c3_109 = arith.constant 3 : index
    %178 = memref.load %arg6[%c3_109] : memref<98xf32, #tpu.memory_space<smem>>
    %c4_110 = arith.constant 4 : index
    %179 = memref.load %arg6[%c4_110] : memref<98xf32, #tpu.memory_space<smem>>
    %c5_111 = arith.constant 5 : index
    %180 = memref.load %arg6[%c5_111] : memref<98xf32, #tpu.memory_space<smem>>
    %c6_112 = arith.constant 6 : index
    %181 = memref.load %arg6[%c6_112] : memref<98xf32, #tpu.memory_space<smem>>
    %c7_113 = arith.constant 7 : index
    %182 = memref.load %arg6[%c7_113] : memref<98xf32, #tpu.memory_space<smem>>
    %c8_114 = arith.constant 8 : index
    %183 = memref.load %arg6[%c8_114] : memref<98xf32, #tpu.memory_space<smem>>
    %c9_115 = arith.constant 9 : index
    %184 = memref.load %arg6[%c9_115] : memref<98xf32, #tpu.memory_space<smem>>
    %c10_116 = arith.constant 10 : index
    %185 = memref.load %arg6[%c10_116] : memref<98xf32, #tpu.memory_space<smem>>
    %c11_117 = arith.constant 11 : index
    %186 = memref.load %arg6[%c11_117] : memref<98xf32, #tpu.memory_space<smem>>
    %c12_118 = arith.constant 12 : index
    %187 = memref.load %arg6[%c12_118] : memref<98xf32, #tpu.memory_space<smem>>
    %c13_119 = arith.constant 13 : index
    %188 = memref.load %arg6[%c13_119] : memref<98xf32, #tpu.memory_space<smem>>
    %c14_120 = arith.constant 14 : index
    %189 = memref.load %arg6[%c14_120] : memref<98xf32, #tpu.memory_space<smem>>
    %c15_121 = arith.constant 15 : index
    %190 = memref.load %arg6[%c15_121] : memref<98xf32, #tpu.memory_space<smem>>
    %c16_122 = arith.constant 16 : index
    %191 = memref.load %arg6[%c16_122] : memref<98xf32, #tpu.memory_space<smem>>
    %c17_123 = arith.constant 17 : index
    %192 = memref.load %arg6[%c17_123] : memref<98xf32, #tpu.memory_space<smem>>
    %c18_124 = arith.constant 18 : index
    %193 = memref.load %arg6[%c18_124] : memref<98xf32, #tpu.memory_space<smem>>
    %c19 = arith.constant 19 : index
    %194 = memref.load %arg6[%c19] : memref<98xf32, #tpu.memory_space<smem>>
    %c20 = arith.constant 20 : index
    %195 = memref.load %arg6[%c20] : memref<98xf32, #tpu.memory_space<smem>>
    %c21 = arith.constant 21 : index
    %196 = memref.load %arg6[%c21] : memref<98xf32, #tpu.memory_space<smem>>
    %c22 = arith.constant 22 : index
    %197 = memref.load %arg6[%c22] : memref<98xf32, #tpu.memory_space<smem>>
    %c23 = arith.constant 23 : index
    %198 = memref.load %arg6[%c23] : memref<98xf32, #tpu.memory_space<smem>>
    %c24 = arith.constant 24 : index
    %199 = memref.load %arg6[%c24] : memref<98xf32, #tpu.memory_space<smem>>
    %c25 = arith.constant 25 : index
    %200 = memref.load %arg6[%c25] : memref<98xf32, #tpu.memory_space<smem>>
    %c26 = arith.constant 26 : index
    %201 = memref.load %arg6[%c26] : memref<98xf32, #tpu.memory_space<smem>>
    %c27 = arith.constant 27 : index
    %202 = memref.load %arg6[%c27] : memref<98xf32, #tpu.memory_space<smem>>
    %c28 = arith.constant 28 : index
    %203 = memref.load %arg6[%c28] : memref<98xf32, #tpu.memory_space<smem>>
    %c29 = arith.constant 29 : index
    %204 = memref.load %arg6[%c29] : memref<98xf32, #tpu.memory_space<smem>>
    %c30 = arith.constant 30 : index
    %205 = memref.load %arg6[%c30] : memref<98xf32, #tpu.memory_space<smem>>
    %c31 = arith.constant 31 : index
    %206 = memref.load %arg6[%c31] : memref<98xf32, #tpu.memory_space<smem>>
    %c32 = arith.constant 32 : index
    %207 = memref.load %arg6[%c32] : memref<98xf32, #tpu.memory_space<smem>>
    %c33 = arith.constant 33 : index
    %208 = memref.load %arg6[%c33] : memref<98xf32, #tpu.memory_space<smem>>
    %c34 = arith.constant 34 : index
    %209 = memref.load %arg6[%c34] : memref<98xf32, #tpu.memory_space<smem>>
    %c35 = arith.constant 35 : index
    %210 = memref.load %arg6[%c35] : memref<98xf32, #tpu.memory_space<smem>>
    %c36 = arith.constant 36 : index
    %211 = memref.load %arg6[%c36] : memref<98xf32, #tpu.memory_space<smem>>
    %c37 = arith.constant 37 : index
    %212 = memref.load %arg6[%c37] : memref<98xf32, #tpu.memory_space<smem>>
    %c38 = arith.constant 38 : index
    %213 = memref.load %arg6[%c38] : memref<98xf32, #tpu.memory_space<smem>>
    %c39 = arith.constant 39 : index
    %214 = memref.load %arg6[%c39] : memref<98xf32, #tpu.memory_space<smem>>
    %c40 = arith.constant 40 : index
    %215 = memref.load %arg6[%c40] : memref<98xf32, #tpu.memory_space<smem>>
    %c41 = arith.constant 41 : index
    %216 = memref.load %arg6[%c41] : memref<98xf32, #tpu.memory_space<smem>>
    %c42 = arith.constant 42 : index
    %217 = memref.load %arg6[%c42] : memref<98xf32, #tpu.memory_space<smem>>
    %c43 = arith.constant 43 : index
    %218 = memref.load %arg6[%c43] : memref<98xf32, #tpu.memory_space<smem>>
    %c44 = arith.constant 44 : index
    %219 = memref.load %arg6[%c44] : memref<98xf32, #tpu.memory_space<smem>>
    %c45 = arith.constant 45 : index
    %220 = memref.load %arg6[%c45] : memref<98xf32, #tpu.memory_space<smem>>
    %c46 = arith.constant 46 : index
    %221 = memref.load %arg6[%c46] : memref<98xf32, #tpu.memory_space<smem>>
    %c47 = arith.constant 47 : index
    %222 = memref.load %arg6[%c47] : memref<98xf32, #tpu.memory_space<smem>>
    %c48 = arith.constant 48 : index
    %223 = memref.load %arg6[%c48] : memref<98xf32, #tpu.memory_space<smem>>
    %c49 = arith.constant 49 : index
    %224 = memref.load %arg6[%c49] : memref<98xf32, #tpu.memory_space<smem>>
    %c50 = arith.constant 50 : index
    %225 = memref.load %arg6[%c50] : memref<98xf32, #tpu.memory_space<smem>>
    %c51 = arith.constant 51 : index
    %226 = memref.load %arg6[%c51] : memref<98xf32, #tpu.memory_space<smem>>
    %c52 = arith.constant 52 : index
    %227 = memref.load %arg6[%c52] : memref<98xf32, #tpu.memory_space<smem>>
    %c53 = arith.constant 53 : index
    %228 = memref.load %arg6[%c53] : memref<98xf32, #tpu.memory_space<smem>>
    %c54 = arith.constant 54 : index
    %229 = memref.load %arg6[%c54] : memref<98xf32, #tpu.memory_space<smem>>
    %c55 = arith.constant 55 : index
    %230 = memref.load %arg6[%c55] : memref<98xf32, #tpu.memory_space<smem>>
    %c56 = arith.constant 56 : index
    %231 = memref.load %arg6[%c56] : memref<98xf32, #tpu.memory_space<smem>>
    %c57 = arith.constant 57 : index
    %232 = memref.load %arg6[%c57] : memref<98xf32, #tpu.memory_space<smem>>
    %c58 = arith.constant 58 : index
    %233 = memref.load %arg6[%c58] : memref<98xf32, #tpu.memory_space<smem>>
    %c59 = arith.constant 59 : index
    %234 = memref.load %arg6[%c59] : memref<98xf32, #tpu.memory_space<smem>>
    %c60 = arith.constant 60 : index
    %235 = memref.load %arg6[%c60] : memref<98xf32, #tpu.memory_space<smem>>
    %c61 = arith.constant 61 : index
    %236 = memref.load %arg6[%c61] : memref<98xf32, #tpu.memory_space<smem>>
    %c62 = arith.constant 62 : index
    %237 = memref.load %arg6[%c62] : memref<98xf32, #tpu.memory_space<smem>>
    %c63 = arith.constant 63 : index
    %238 = memref.load %arg6[%c63] : memref<98xf32, #tpu.memory_space<smem>>
    %c64 = arith.constant 64 : index
    %239 = memref.load %arg6[%c64] : memref<98xf32, #tpu.memory_space<smem>>
    %c65 = arith.constant 65 : index
    %240 = memref.load %arg6[%c65] : memref<98xf32, #tpu.memory_space<smem>>
    %c66 = arith.constant 66 : index
    %241 = memref.load %arg6[%c66] : memref<98xf32, #tpu.memory_space<smem>>
    %c67 = arith.constant 67 : index
    %242 = memref.load %arg6[%c67] : memref<98xf32, #tpu.memory_space<smem>>
    %c68 = arith.constant 68 : index
    %243 = memref.load %arg6[%c68] : memref<98xf32, #tpu.memory_space<smem>>
    %c69 = arith.constant 69 : index
    %244 = memref.load %arg6[%c69] : memref<98xf32, #tpu.memory_space<smem>>
    %c70 = arith.constant 70 : index
    %245 = memref.load %arg6[%c70] : memref<98xf32, #tpu.memory_space<smem>>
    %c71 = arith.constant 71 : index
    %246 = memref.load %arg6[%c71] : memref<98xf32, #tpu.memory_space<smem>>
    %c72 = arith.constant 72 : index
    %247 = memref.load %arg6[%c72] : memref<98xf32, #tpu.memory_space<smem>>
    %c73 = arith.constant 73 : index
    %248 = memref.load %arg6[%c73] : memref<98xf32, #tpu.memory_space<smem>>
    %c74 = arith.constant 74 : index
    %249 = memref.load %arg6[%c74] : memref<98xf32, #tpu.memory_space<smem>>
    %c75 = arith.constant 75 : index
    %250 = memref.load %arg6[%c75] : memref<98xf32, #tpu.memory_space<smem>>
    %c76 = arith.constant 76 : index
    %251 = memref.load %arg6[%c76] : memref<98xf32, #tpu.memory_space<smem>>
    %c77 = arith.constant 77 : index
    %252 = memref.load %arg6[%c77] : memref<98xf32, #tpu.memory_space<smem>>
    %c78 = arith.constant 78 : index
    %253 = memref.load %arg6[%c78] : memref<98xf32, #tpu.memory_space<smem>>
    %c79 = arith.constant 79 : index
    %254 = memref.load %arg6[%c79] : memref<98xf32, #tpu.memory_space<smem>>
    %c80 = arith.constant 80 : index
    %255 = memref.load %arg6[%c80] : memref<98xf32, #tpu.memory_space<smem>>
    %c81 = arith.constant 81 : index
    %256 = memref.load %arg6[%c81] : memref<98xf32, #tpu.memory_space<smem>>
    %c82 = arith.constant 82 : index
    %257 = memref.load %arg6[%c82] : memref<98xf32, #tpu.memory_space<smem>>
    %c83 = arith.constant 83 : index
    %258 = memref.load %arg6[%c83] : memref<98xf32, #tpu.memory_space<smem>>
    %c84 = arith.constant 84 : index
    %259 = memref.load %arg6[%c84] : memref<98xf32, #tpu.memory_space<smem>>
    %c85 = arith.constant 85 : index
    %260 = memref.load %arg6[%c85] : memref<98xf32, #tpu.memory_space<smem>>
    %c86 = arith.constant 86 : index
    %261 = memref.load %arg6[%c86] : memref<98xf32, #tpu.memory_space<smem>>
    %c87 = arith.constant 87 : index
    %262 = memref.load %arg6[%c87] : memref<98xf32, #tpu.memory_space<smem>>
    %c88 = arith.constant 88 : index
    %263 = memref.load %arg6[%c88] : memref<98xf32, #tpu.memory_space<smem>>
    %c89 = arith.constant 89 : index
    %264 = memref.load %arg6[%c89] : memref<98xf32, #tpu.memory_space<smem>>
    %c90 = arith.constant 90 : index
    %265 = memref.load %arg6[%c90] : memref<98xf32, #tpu.memory_space<smem>>
    %c91 = arith.constant 91 : index
    %266 = memref.load %arg6[%c91] : memref<98xf32, #tpu.memory_space<smem>>
    %c92 = arith.constant 92 : index
    %267 = memref.load %arg6[%c92] : memref<98xf32, #tpu.memory_space<smem>>
    %c93 = arith.constant 93 : index
    %268 = memref.load %arg6[%c93] : memref<98xf32, #tpu.memory_space<smem>>
    %c94 = arith.constant 94 : index
    %269 = memref.load %arg6[%c94] : memref<98xf32, #tpu.memory_space<smem>>
    %c95 = arith.constant 95 : index
    %270 = memref.load %arg6[%c95] : memref<98xf32, #tpu.memory_space<smem>>
    %c96 = arith.constant 96 : index
    %271 = memref.load %arg6[%c96] : memref<98xf32, #tpu.memory_space<smem>>
    %c97 = arith.constant 97 : index
    %272 = memref.load %arg6[%c97] : memref<98xf32, #tpu.memory_space<smem>>
    %cst_125 = arith.constant 0.000000e+00 : f32
    %273 = vector.broadcast %cst_125 : f32 to vector<16x16xf32>
    %cst_126 = arith.constant 0.000000e+00 : f32
    %274 = vector.broadcast %cst_126 : f32 to vector<16x16xf32>
    %cst_127 = arith.constant 0.000000e+00 : f32
    %275 = vector.broadcast %cst_127 : f32 to vector<16x16xf32>
    %cst_128 = arith.constant 0.000000e+00 : f32
    %276 = vector.broadcast %cst_128 : f32 to vector<16x16xf32>
    %277 = vector.extract_strided_slice %174 {offsets = [0, 0, 0], sizes = [1, 16, 22], strides = [1, 1, 1]} : vector<2x22x22xf32> to vector<1x16x22xf32>
    %278 = vector.shape_cast %277 : vector<1x16x22xf32> to vector<16x22xf32>
    %279 = vector.extract_strided_slice %278 {offsets = [0, 0], sizes = [16, 16], strides = [1, 1]} : vector<16x22xf32> to vector<16x16xf32>
    %280 = vector.broadcast %175 : f32 to vector<16x16xf32>
    %281 = arith.mulf %280, %279 : vector<16x16xf32>
    %282 = arith.addf %273, %281 : vector<16x16xf32>
    %283 = vector.extract_strided_slice %278 {offsets = [0, 1], sizes = [16, 16], strides = [1, 1]} : vector<16x22xf32> to vector<16x16xf32>
    %284 = vector.broadcast %176 : f32 to vector<16x16xf32>
    %285 = arith.mulf %284, %283 : vector<16x16xf32>
    %286 = arith.addf %274, %285 : vector<16x16xf32>
    %287 = vector.extract_strided_slice %278 {offsets = [0, 2], sizes = [16, 16], strides = [1, 1]} : vector<16x22xf32> to vector<16x16xf32>
    %288 = vector.broadcast %177 : f32 to vector<16x16xf32>
    %289 = arith.mulf %288, %287 : vector<16x16xf32>
    %290 = arith.addf %275, %289 : vector<16x16xf32>
    %291 = vector.extract_strided_slice %278 {offsets = [0, 3], sizes = [16, 16], strides = [1, 1]} : vector<16x22xf32> to vector<16x16xf32>
    %292 = vector.broadcast %178 : f32 to vector<16x16xf32>
    %293 = arith.mulf %292, %291 : vector<16x16xf32>
    %294 = arith.addf %276, %293 : vector<16x16xf32>
    %295 = vector.extract_strided_slice %278 {offsets = [0, 4], sizes = [16, 16], strides = [1, 1]} : vector<16x22xf32> to vector<16x16xf32>
    %296 = vector.broadcast %179 : f32 to vector<16x16xf32>
    %297 = arith.mulf %296, %295 : vector<16x16xf32>
    %298 = arith.addf %282, %297 : vector<16x16xf32>
    %299 = vector.extract_strided_slice %278 {offsets = [0, 5], sizes = [16, 16], strides = [1, 1]} : vector<16x22xf32> to vector<16x16xf32>
    %300 = vector.broadcast %180 : f32 to vector<16x16xf32>
    %301 = arith.mulf %300, %299 : vector<16x16xf32>
    %302 = arith.addf %286, %301 : vector<16x16xf32>
    %303 = vector.extract_strided_slice %278 {offsets = [0, 6], sizes = [16, 16], strides = [1, 1]} : vector<16x22xf32> to vector<16x16xf32>
    %304 = vector.broadcast %181 : f32 to vector<16x16xf32>
    %305 = arith.mulf %304, %303 : vector<16x16xf32>
    %306 = arith.addf %290, %305 : vector<16x16xf32>
    %307 = vector.extract_strided_slice %174 {offsets = [0, 1, 0], sizes = [1, 16, 22], strides = [1, 1, 1]} : vector<2x22x22xf32> to vector<1x16x22xf32>
    %308 = vector.shape_cast %307 : vector<1x16x22xf32> to vector<16x22xf32>
    %309 = vector.extract_strided_slice %308 {offsets = [0, 0], sizes = [16, 16], strides = [1, 1]} : vector<16x22xf32> to vector<16x16xf32>
    %310 = vector.broadcast %182 : f32 to vector<16x16xf32>
    %311 = arith.mulf %310, %309 : vector<16x16xf32>
    %312 = arith.addf %294, %311 : vector<16x16xf32>
    %313 = vector.extract_strided_slice %308 {offsets = [0, 1], sizes = [16, 16], strides = [1, 1]} : vector<16x22xf32> to vector<16x16xf32>
    %314 = vector.broadcast %183 : f32 to vector<16x16xf32>
    %315 = arith.mulf %314, %313 : vector<16x16xf32>
    %316 = arith.addf %298, %315 : vector<16x16xf32>
    %317 = vector.extract_strided_slice %308 {offsets = [0, 2], sizes = [16, 16], strides = [1, 1]} : vector<16x22xf32> to vector<16x16xf32>
    %318 = vector.broadcast %184 : f32 to vector<16x16xf32>
    %319 = arith.mulf %318, %317 : vector<16x16xf32>
    %320 = arith.addf %302, %319 : vector<16x16xf32>
    %321 = vector.extract_strided_slice %308 {offsets = [0, 3], sizes = [16, 16], strides = [1, 1]} : vector<16x22xf32> to vector<16x16xf32>
    %322 = vector.broadcast %185 : f32 to vector<16x16xf32>
    %323 = arith.mulf %322, %321 : vector<16x16xf32>
    %324 = arith.addf %306, %323 : vector<16x16xf32>
    %325 = vector.extract_strided_slice %308 {offsets = [0, 4], sizes = [16, 16], strides = [1, 1]} : vector<16x22xf32> to vector<16x16xf32>
    %326 = vector.broadcast %186 : f32 to vector<16x16xf32>
    %327 = arith.mulf %326, %325 : vector<16x16xf32>
    %328 = arith.addf %312, %327 : vector<16x16xf32>
    %329 = vector.extract_strided_slice %308 {offsets = [0, 5], sizes = [16, 16], strides = [1, 1]} : vector<16x22xf32> to vector<16x16xf32>
    %330 = vector.broadcast %187 : f32 to vector<16x16xf32>
    %331 = arith.mulf %330, %329 : vector<16x16xf32>
    %332 = arith.addf %316, %331 : vector<16x16xf32>
    %333 = vector.extract_strided_slice %308 {offsets = [0, 6], sizes = [16, 16], strides = [1, 1]} : vector<16x22xf32> to vector<16x16xf32>
    %334 = vector.broadcast %188 : f32 to vector<16x16xf32>
    %335 = arith.mulf %334, %333 : vector<16x16xf32>
    %336 = arith.addf %320, %335 : vector<16x16xf32>
    %337 = vector.extract_strided_slice %174 {offsets = [0, 2, 0], sizes = [1, 16, 22], strides = [1, 1, 1]} : vector<2x22x22xf32> to vector<1x16x22xf32>
    %338 = vector.shape_cast %337 : vector<1x16x22xf32> to vector<16x22xf32>
    %339 = vector.extract_strided_slice %338 {offsets = [0, 0], sizes = [16, 16], strides = [1, 1]} : vector<16x22xf32> to vector<16x16xf32>
    %340 = vector.broadcast %189 : f32 to vector<16x16xf32>
    %341 = arith.mulf %340, %339 : vector<16x16xf32>
    %342 = arith.addf %324, %341 : vector<16x16xf32>
    %343 = vector.extract_strided_slice %338 {offsets = [0, 1], sizes = [16, 16], strides = [1, 1]} : vector<16x22xf32> to vector<16x16xf32>
    %344 = vector.broadcast %190 : f32 to vector<16x16xf32>
    %345 = arith.mulf %344, %343 : vector<16x16xf32>
    %346 = arith.addf %328, %345 : vector<16x16xf32>
    %347 = vector.extract_strided_slice %338 {offsets = [0, 2], sizes = [16, 16], strides = [1, 1]} : vector<16x22xf32> to vector<16x16xf32>
    %348 = vector.broadcast %191 : f32 to vector<16x16xf32>
    %349 = arith.mulf %348, %347 : vector<16x16xf32>
    %350 = arith.addf %332, %349 : vector<16x16xf32>
    %351 = vector.extract_strided_slice %338 {offsets = [0, 3], sizes = [16, 16], strides = [1, 1]} : vector<16x22xf32> to vector<16x16xf32>
    %352 = vector.broadcast %192 : f32 to vector<16x16xf32>
    %353 = arith.mulf %352, %351 : vector<16x16xf32>
    %354 = arith.addf %336, %353 : vector<16x16xf32>
    %355 = vector.extract_strided_slice %338 {offsets = [0, 4], sizes = [16, 16], strides = [1, 1]} : vector<16x22xf32> to vector<16x16xf32>
    %356 = vector.broadcast %193 : f32 to vector<16x16xf32>
    %357 = arith.mulf %356, %355 : vector<16x16xf32>
    %358 = arith.addf %342, %357 : vector<16x16xf32>
    %359 = vector.extract_strided_slice %338 {offsets = [0, 5], sizes = [16, 16], strides = [1, 1]} : vector<16x22xf32> to vector<16x16xf32>
    %360 = vector.broadcast %194 : f32 to vector<16x16xf32>
    %361 = arith.mulf %360, %359 : vector<16x16xf32>
    %362 = arith.addf %346, %361 : vector<16x16xf32>
    %363 = vector.extract_strided_slice %338 {offsets = [0, 6], sizes = [16, 16], strides = [1, 1]} : vector<16x22xf32> to vector<16x16xf32>
    %364 = vector.broadcast %195 : f32 to vector<16x16xf32>
    %365 = arith.mulf %364, %363 : vector<16x16xf32>
    %366 = arith.addf %350, %365 : vector<16x16xf32>
    %367 = vector.extract_strided_slice %174 {offsets = [0, 3, 0], sizes = [1, 16, 22], strides = [1, 1, 1]} : vector<2x22x22xf32> to vector<1x16x22xf32>
    %368 = vector.shape_cast %367 : vector<1x16x22xf32> to vector<16x22xf32>
    %369 = vector.extract_strided_slice %368 {offsets = [0, 0], sizes = [16, 16], strides = [1, 1]} : vector<16x22xf32> to vector<16x16xf32>
    %370 = vector.broadcast %196 : f32 to vector<16x16xf32>
    %371 = arith.mulf %370, %369 : vector<16x16xf32>
    %372 = arith.addf %354, %371 : vector<16x16xf32>
    %373 = vector.extract_strided_slice %368 {offsets = [0, 1], sizes = [16, 16], strides = [1, 1]} : vector<16x22xf32> to vector<16x16xf32>
    %374 = vector.broadcast %197 : f32 to vector<16x16xf32>
    %375 = arith.mulf %374, %373 : vector<16x16xf32>
    %376 = arith.addf %358, %375 : vector<16x16xf32>
    %377 = vector.extract_strided_slice %368 {offsets = [0, 2], sizes = [16, 16], strides = [1, 1]} : vector<16x22xf32> to vector<16x16xf32>
    %378 = vector.broadcast %198 : f32 to vector<16x16xf32>
    %379 = arith.mulf %378, %377 : vector<16x16xf32>
    %380 = arith.addf %362, %379 : vector<16x16xf32>
    %381 = vector.extract_strided_slice %368 {offsets = [0, 3], sizes = [16, 16], strides = [1, 1]} : vector<16x22xf32> to vector<16x16xf32>
    %382 = vector.broadcast %199 : f32 to vector<16x16xf32>
    %383 = arith.mulf %382, %381 : vector<16x16xf32>
    %384 = arith.addf %366, %383 : vector<16x16xf32>
    %385 = vector.extract_strided_slice %368 {offsets = [0, 4], sizes = [16, 16], strides = [1, 1]} : vector<16x22xf32> to vector<16x16xf32>
    %386 = vector.broadcast %200 : f32 to vector<16x16xf32>
    %387 = arith.mulf %386, %385 : vector<16x16xf32>
    %388 = arith.addf %372, %387 : vector<16x16xf32>
    %389 = vector.extract_strided_slice %368 {offsets = [0, 5], sizes = [16, 16], strides = [1, 1]} : vector<16x22xf32> to vector<16x16xf32>
    %390 = vector.broadcast %201 : f32 to vector<16x16xf32>
    %391 = arith.mulf %390, %389 : vector<16x16xf32>
    %392 = arith.addf %376, %391 : vector<16x16xf32>
    %393 = vector.extract_strided_slice %368 {offsets = [0, 6], sizes = [16, 16], strides = [1, 1]} : vector<16x22xf32> to vector<16x16xf32>
    %394 = vector.broadcast %202 : f32 to vector<16x16xf32>
    %395 = arith.mulf %394, %393 : vector<16x16xf32>
    %396 = arith.addf %380, %395 : vector<16x16xf32>
    %397 = vector.extract_strided_slice %174 {offsets = [0, 4, 0], sizes = [1, 16, 22], strides = [1, 1, 1]} : vector<2x22x22xf32> to vector<1x16x22xf32>
    %398 = vector.shape_cast %397 : vector<1x16x22xf32> to vector<16x22xf32>
    %399 = vector.extract_strided_slice %398 {offsets = [0, 0], sizes = [16, 16], strides = [1, 1]} : vector<16x22xf32> to vector<16x16xf32>
    %400 = vector.broadcast %203 : f32 to vector<16x16xf32>
    %401 = arith.mulf %400, %399 : vector<16x16xf32>
    %402 = arith.addf %384, %401 : vector<16x16xf32>
    %403 = vector.extract_strided_slice %398 {offsets = [0, 1], sizes = [16, 16], strides = [1, 1]} : vector<16x22xf32> to vector<16x16xf32>
    %404 = vector.broadcast %204 : f32 to vector<16x16xf32>
    %405 = arith.mulf %404, %403 : vector<16x16xf32>
    %406 = arith.addf %388, %405 : vector<16x16xf32>
    %407 = vector.extract_strided_slice %398 {offsets = [0, 2], sizes = [16, 16], strides = [1, 1]} : vector<16x22xf32> to vector<16x16xf32>
    %408 = vector.broadcast %205 : f32 to vector<16x16xf32>
    %409 = arith.mulf %408, %407 : vector<16x16xf32>
    %410 = arith.addf %392, %409 : vector<16x16xf32>
    %411 = vector.extract_strided_slice %398 {offsets = [0, 3], sizes = [16, 16], strides = [1, 1]} : vector<16x22xf32> to vector<16x16xf32>
    %412 = vector.broadcast %206 : f32 to vector<16x16xf32>
    %413 = arith.mulf %412, %411 : vector<16x16xf32>
    %414 = arith.addf %396, %413 : vector<16x16xf32>
    %415 = vector.extract_strided_slice %398 {offsets = [0, 4], sizes = [16, 16], strides = [1, 1]} : vector<16x22xf32> to vector<16x16xf32>
    %416 = vector.broadcast %207 : f32 to vector<16x16xf32>
    %417 = arith.mulf %416, %415 : vector<16x16xf32>
    %418 = arith.addf %402, %417 : vector<16x16xf32>
    %419 = vector.extract_strided_slice %398 {offsets = [0, 5], sizes = [16, 16], strides = [1, 1]} : vector<16x22xf32> to vector<16x16xf32>
    %420 = vector.broadcast %208 : f32 to vector<16x16xf32>
    %421 = arith.mulf %420, %419 : vector<16x16xf32>
    %422 = arith.addf %406, %421 : vector<16x16xf32>
    %423 = vector.extract_strided_slice %398 {offsets = [0, 6], sizes = [16, 16], strides = [1, 1]} : vector<16x22xf32> to vector<16x16xf32>
    %424 = vector.broadcast %209 : f32 to vector<16x16xf32>
    %425 = arith.mulf %424, %423 : vector<16x16xf32>
    %426 = arith.addf %410, %425 : vector<16x16xf32>
    %427 = vector.extract_strided_slice %174 {offsets = [0, 5, 0], sizes = [1, 16, 22], strides = [1, 1, 1]} : vector<2x22x22xf32> to vector<1x16x22xf32>
    %428 = vector.shape_cast %427 : vector<1x16x22xf32> to vector<16x22xf32>
    %429 = vector.extract_strided_slice %428 {offsets = [0, 0], sizes = [16, 16], strides = [1, 1]} : vector<16x22xf32> to vector<16x16xf32>
    %430 = vector.broadcast %210 : f32 to vector<16x16xf32>
    %431 = arith.mulf %430, %429 : vector<16x16xf32>
    %432 = arith.addf %414, %431 : vector<16x16xf32>
    %433 = vector.extract_strided_slice %428 {offsets = [0, 1], sizes = [16, 16], strides = [1, 1]} : vector<16x22xf32> to vector<16x16xf32>
    %434 = vector.broadcast %211 : f32 to vector<16x16xf32>
    %435 = arith.mulf %434, %433 : vector<16x16xf32>
    %436 = arith.addf %418, %435 : vector<16x16xf32>
    %437 = vector.extract_strided_slice %428 {offsets = [0, 2], sizes = [16, 16], strides = [1, 1]} : vector<16x22xf32> to vector<16x16xf32>
    %438 = vector.broadcast %212 : f32 to vector<16x16xf32>
    %439 = arith.mulf %438, %437 : vector<16x16xf32>
    %440 = arith.addf %422, %439 : vector<16x16xf32>
    %441 = vector.extract_strided_slice %428 {offsets = [0, 3], sizes = [16, 16], strides = [1, 1]} : vector<16x22xf32> to vector<16x16xf32>
    %442 = vector.broadcast %213 : f32 to vector<16x16xf32>
    %443 = arith.mulf %442, %441 : vector<16x16xf32>
    %444 = arith.addf %426, %443 : vector<16x16xf32>
    %445 = vector.extract_strided_slice %428 {offsets = [0, 4], sizes = [16, 16], strides = [1, 1]} : vector<16x22xf32> to vector<16x16xf32>
    %446 = vector.broadcast %214 : f32 to vector<16x16xf32>
    %447 = arith.mulf %446, %445 : vector<16x16xf32>
    %448 = arith.addf %432, %447 : vector<16x16xf32>
    %449 = vector.extract_strided_slice %428 {offsets = [0, 5], sizes = [16, 16], strides = [1, 1]} : vector<16x22xf32> to vector<16x16xf32>
    %450 = vector.broadcast %215 : f32 to vector<16x16xf32>
    %451 = arith.mulf %450, %449 : vector<16x16xf32>
    %452 = arith.addf %436, %451 : vector<16x16xf32>
    %453 = vector.extract_strided_slice %428 {offsets = [0, 6], sizes = [16, 16], strides = [1, 1]} : vector<16x22xf32> to vector<16x16xf32>
    %454 = vector.broadcast %216 : f32 to vector<16x16xf32>
    %455 = arith.mulf %454, %453 : vector<16x16xf32>
    %456 = arith.addf %440, %455 : vector<16x16xf32>
    %457 = vector.extract_strided_slice %174 {offsets = [0, 6, 0], sizes = [1, 16, 22], strides = [1, 1, 1]} : vector<2x22x22xf32> to vector<1x16x22xf32>
    %458 = vector.shape_cast %457 : vector<1x16x22xf32> to vector<16x22xf32>
    %459 = vector.extract_strided_slice %458 {offsets = [0, 0], sizes = [16, 16], strides = [1, 1]} : vector<16x22xf32> to vector<16x16xf32>
    %460 = vector.broadcast %217 : f32 to vector<16x16xf32>
    %461 = arith.mulf %460, %459 : vector<16x16xf32>
    %462 = arith.addf %444, %461 : vector<16x16xf32>
    %463 = vector.extract_strided_slice %458 {offsets = [0, 1], sizes = [16, 16], strides = [1, 1]} : vector<16x22xf32> to vector<16x16xf32>
    %464 = vector.broadcast %218 : f32 to vector<16x16xf32>
    %465 = arith.mulf %464, %463 : vector<16x16xf32>
    %466 = arith.addf %448, %465 : vector<16x16xf32>
    %467 = vector.extract_strided_slice %458 {offsets = [0, 2], sizes = [16, 16], strides = [1, 1]} : vector<16x22xf32> to vector<16x16xf32>
    %468 = vector.broadcast %219 : f32 to vector<16x16xf32>
    %469 = arith.mulf %468, %467 : vector<16x16xf32>
    %470 = arith.addf %452, %469 : vector<16x16xf32>
    %471 = vector.extract_strided_slice %458 {offsets = [0, 3], sizes = [16, 16], strides = [1, 1]} : vector<16x22xf32> to vector<16x16xf32>
    %472 = vector.broadcast %220 : f32 to vector<16x16xf32>
    %473 = arith.mulf %472, %471 : vector<16x16xf32>
    %474 = arith.addf %456, %473 : vector<16x16xf32>
    %475 = vector.extract_strided_slice %458 {offsets = [0, 4], sizes = [16, 16], strides = [1, 1]} : vector<16x22xf32> to vector<16x16xf32>
    %476 = vector.broadcast %221 : f32 to vector<16x16xf32>
    %477 = arith.mulf %476, %475 : vector<16x16xf32>
    %478 = arith.addf %462, %477 : vector<16x16xf32>
    %479 = vector.extract_strided_slice %458 {offsets = [0, 5], sizes = [16, 16], strides = [1, 1]} : vector<16x22xf32> to vector<16x16xf32>
    %480 = vector.broadcast %222 : f32 to vector<16x16xf32>
    %481 = arith.mulf %480, %479 : vector<16x16xf32>
    %482 = arith.addf %466, %481 : vector<16x16xf32>
    %483 = vector.extract_strided_slice %458 {offsets = [0, 6], sizes = [16, 16], strides = [1, 1]} : vector<16x22xf32> to vector<16x16xf32>
    %484 = vector.broadcast %223 : f32 to vector<16x16xf32>
    %485 = arith.mulf %484, %483 : vector<16x16xf32>
    %486 = arith.addf %470, %485 : vector<16x16xf32>
    %487 = vector.extract_strided_slice %174 {offsets = [1, 0, 0], sizes = [1, 16, 22], strides = [1, 1, 1]} : vector<2x22x22xf32> to vector<1x16x22xf32>
    %488 = vector.shape_cast %487 : vector<1x16x22xf32> to vector<16x22xf32>
    %489 = vector.extract_strided_slice %488 {offsets = [0, 0], sizes = [16, 16], strides = [1, 1]} : vector<16x22xf32> to vector<16x16xf32>
    %490 = vector.broadcast %224 : f32 to vector<16x16xf32>
    %491 = arith.mulf %490, %489 : vector<16x16xf32>
    %492 = arith.addf %474, %491 : vector<16x16xf32>
    %493 = vector.extract_strided_slice %488 {offsets = [0, 1], sizes = [16, 16], strides = [1, 1]} : vector<16x22xf32> to vector<16x16xf32>
    %494 = vector.broadcast %225 : f32 to vector<16x16xf32>
    %495 = arith.mulf %494, %493 : vector<16x16xf32>
    %496 = arith.addf %478, %495 : vector<16x16xf32>
    %497 = vector.extract_strided_slice %488 {offsets = [0, 2], sizes = [16, 16], strides = [1, 1]} : vector<16x22xf32> to vector<16x16xf32>
    %498 = vector.broadcast %226 : f32 to vector<16x16xf32>
    %499 = arith.mulf %498, %497 : vector<16x16xf32>
    %500 = arith.addf %482, %499 : vector<16x16xf32>
    %501 = vector.extract_strided_slice %488 {offsets = [0, 3], sizes = [16, 16], strides = [1, 1]} : vector<16x22xf32> to vector<16x16xf32>
    %502 = vector.broadcast %227 : f32 to vector<16x16xf32>
    %503 = arith.mulf %502, %501 : vector<16x16xf32>
    %504 = arith.addf %486, %503 : vector<16x16xf32>
    %505 = vector.extract_strided_slice %488 {offsets = [0, 4], sizes = [16, 16], strides = [1, 1]} : vector<16x22xf32> to vector<16x16xf32>
    %506 = vector.broadcast %228 : f32 to vector<16x16xf32>
    %507 = arith.mulf %506, %505 : vector<16x16xf32>
    %508 = arith.addf %492, %507 : vector<16x16xf32>
    %509 = vector.extract_strided_slice %488 {offsets = [0, 5], sizes = [16, 16], strides = [1, 1]} : vector<16x22xf32> to vector<16x16xf32>
    %510 = vector.broadcast %229 : f32 to vector<16x16xf32>
    %511 = arith.mulf %510, %509 : vector<16x16xf32>
    %512 = arith.addf %496, %511 : vector<16x16xf32>
    %513 = vector.extract_strided_slice %488 {offsets = [0, 6], sizes = [16, 16], strides = [1, 1]} : vector<16x22xf32> to vector<16x16xf32>
    %514 = vector.broadcast %230 : f32 to vector<16x16xf32>
    %515 = arith.mulf %514, %513 : vector<16x16xf32>
    %516 = arith.addf %500, %515 : vector<16x16xf32>
    %517 = vector.extract_strided_slice %174 {offsets = [1, 1, 0], sizes = [1, 16, 22], strides = [1, 1, 1]} : vector<2x22x22xf32> to vector<1x16x22xf32>
    %518 = vector.shape_cast %517 : vector<1x16x22xf32> to vector<16x22xf32>
    %519 = vector.extract_strided_slice %518 {offsets = [0, 0], sizes = [16, 16], strides = [1, 1]} : vector<16x22xf32> to vector<16x16xf32>
    %520 = vector.broadcast %231 : f32 to vector<16x16xf32>
    %521 = arith.mulf %520, %519 : vector<16x16xf32>
    %522 = arith.addf %504, %521 : vector<16x16xf32>
    %523 = vector.extract_strided_slice %518 {offsets = [0, 1], sizes = [16, 16], strides = [1, 1]} : vector<16x22xf32> to vector<16x16xf32>
    %524 = vector.broadcast %232 : f32 to vector<16x16xf32>
    %525 = arith.mulf %524, %523 : vector<16x16xf32>
    %526 = arith.addf %508, %525 : vector<16x16xf32>
    %527 = vector.extract_strided_slice %518 {offsets = [0, 2], sizes = [16, 16], strides = [1, 1]} : vector<16x22xf32> to vector<16x16xf32>
    %528 = vector.broadcast %233 : f32 to vector<16x16xf32>
    %529 = arith.mulf %528, %527 : vector<16x16xf32>
    %530 = arith.addf %512, %529 : vector<16x16xf32>
    %531 = vector.extract_strided_slice %518 {offsets = [0, 3], sizes = [16, 16], strides = [1, 1]} : vector<16x22xf32> to vector<16x16xf32>
    %532 = vector.broadcast %234 : f32 to vector<16x16xf32>
    %533 = arith.mulf %532, %531 : vector<16x16xf32>
    %534 = arith.addf %516, %533 : vector<16x16xf32>
    %535 = vector.extract_strided_slice %518 {offsets = [0, 4], sizes = [16, 16], strides = [1, 1]} : vector<16x22xf32> to vector<16x16xf32>
    %536 = vector.broadcast %235 : f32 to vector<16x16xf32>
    %537 = arith.mulf %536, %535 : vector<16x16xf32>
    %538 = arith.addf %522, %537 : vector<16x16xf32>
    %539 = vector.extract_strided_slice %518 {offsets = [0, 5], sizes = [16, 16], strides = [1, 1]} : vector<16x22xf32> to vector<16x16xf32>
    %540 = vector.broadcast %236 : f32 to vector<16x16xf32>
    %541 = arith.mulf %540, %539 : vector<16x16xf32>
    %542 = arith.addf %526, %541 : vector<16x16xf32>
    %543 = vector.extract_strided_slice %518 {offsets = [0, 6], sizes = [16, 16], strides = [1, 1]} : vector<16x22xf32> to vector<16x16xf32>
    %544 = vector.broadcast %237 : f32 to vector<16x16xf32>
    %545 = arith.mulf %544, %543 : vector<16x16xf32>
    %546 = arith.addf %530, %545 : vector<16x16xf32>
    %547 = vector.extract_strided_slice %174 {offsets = [1, 2, 0], sizes = [1, 16, 22], strides = [1, 1, 1]} : vector<2x22x22xf32> to vector<1x16x22xf32>
    %548 = vector.shape_cast %547 : vector<1x16x22xf32> to vector<16x22xf32>
    %549 = vector.extract_strided_slice %548 {offsets = [0, 0], sizes = [16, 16], strides = [1, 1]} : vector<16x22xf32> to vector<16x16xf32>
    %550 = vector.broadcast %238 : f32 to vector<16x16xf32>
    %551 = arith.mulf %550, %549 : vector<16x16xf32>
    %552 = arith.addf %534, %551 : vector<16x16xf32>
    %553 = vector.extract_strided_slice %548 {offsets = [0, 1], sizes = [16, 16], strides = [1, 1]} : vector<16x22xf32> to vector<16x16xf32>
    %554 = vector.broadcast %239 : f32 to vector<16x16xf32>
    %555 = arith.mulf %554, %553 : vector<16x16xf32>
    %556 = arith.addf %538, %555 : vector<16x16xf32>
    %557 = vector.extract_strided_slice %548 {offsets = [0, 2], sizes = [16, 16], strides = [1, 1]} : vector<16x22xf32> to vector<16x16xf32>
    %558 = vector.broadcast %240 : f32 to vector<16x16xf32>
    %559 = arith.mulf %558, %557 : vector<16x16xf32>
    %560 = arith.addf %542, %559 : vector<16x16xf32>
    %561 = vector.extract_strided_slice %548 {offsets = [0, 3], sizes = [16, 16], strides = [1, 1]} : vector<16x22xf32> to vector<16x16xf32>
    %562 = vector.broadcast %241 : f32 to vector<16x16xf32>
    %563 = arith.mulf %562, %561 : vector<16x16xf32>
    %564 = arith.addf %546, %563 : vector<16x16xf32>
    %565 = vector.extract_strided_slice %548 {offsets = [0, 4], sizes = [16, 16], strides = [1, 1]} : vector<16x22xf32> to vector<16x16xf32>
    %566 = vector.broadcast %242 : f32 to vector<16x16xf32>
    %567 = arith.mulf %566, %565 : vector<16x16xf32>
    %568 = arith.addf %552, %567 : vector<16x16xf32>
    %569 = vector.extract_strided_slice %548 {offsets = [0, 5], sizes = [16, 16], strides = [1, 1]} : vector<16x22xf32> to vector<16x16xf32>
    %570 = vector.broadcast %243 : f32 to vector<16x16xf32>
    %571 = arith.mulf %570, %569 : vector<16x16xf32>
    %572 = arith.addf %556, %571 : vector<16x16xf32>
    %573 = vector.extract_strided_slice %548 {offsets = [0, 6], sizes = [16, 16], strides = [1, 1]} : vector<16x22xf32> to vector<16x16xf32>
    %574 = vector.broadcast %244 : f32 to vector<16x16xf32>
    %575 = arith.mulf %574, %573 : vector<16x16xf32>
    %576 = arith.addf %560, %575 : vector<16x16xf32>
    %577 = vector.extract_strided_slice %174 {offsets = [1, 3, 0], sizes = [1, 16, 22], strides = [1, 1, 1]} : vector<2x22x22xf32> to vector<1x16x22xf32>
    %578 = vector.shape_cast %577 : vector<1x16x22xf32> to vector<16x22xf32>
    %579 = vector.extract_strided_slice %578 {offsets = [0, 0], sizes = [16, 16], strides = [1, 1]} : vector<16x22xf32> to vector<16x16xf32>
    %580 = vector.broadcast %245 : f32 to vector<16x16xf32>
    %581 = arith.mulf %580, %579 : vector<16x16xf32>
    %582 = arith.addf %564, %581 : vector<16x16xf32>
    %583 = vector.extract_strided_slice %578 {offsets = [0, 1], sizes = [16, 16], strides = [1, 1]} : vector<16x22xf32> to vector<16x16xf32>
    %584 = vector.broadcast %246 : f32 to vector<16x16xf32>
    %585 = arith.mulf %584, %583 : vector<16x16xf32>
    %586 = arith.addf %568, %585 : vector<16x16xf32>
    %587 = vector.extract_strided_slice %578 {offsets = [0, 2], sizes = [16, 16], strides = [1, 1]} : vector<16x22xf32> to vector<16x16xf32>
    %588 = vector.broadcast %247 : f32 to vector<16x16xf32>
    %589 = arith.mulf %588, %587 : vector<16x16xf32>
    %590 = arith.addf %572, %589 : vector<16x16xf32>
    %591 = vector.extract_strided_slice %578 {offsets = [0, 3], sizes = [16, 16], strides = [1, 1]} : vector<16x22xf32> to vector<16x16xf32>
    %592 = vector.broadcast %248 : f32 to vector<16x16xf32>
    %593 = arith.mulf %592, %591 : vector<16x16xf32>
    %594 = arith.addf %576, %593 : vector<16x16xf32>
    %595 = vector.extract_strided_slice %578 {offsets = [0, 4], sizes = [16, 16], strides = [1, 1]} : vector<16x22xf32> to vector<16x16xf32>
    %596 = vector.broadcast %249 : f32 to vector<16x16xf32>
    %597 = arith.mulf %596, %595 : vector<16x16xf32>
    %598 = arith.addf %582, %597 : vector<16x16xf32>
    %599 = vector.extract_strided_slice %578 {offsets = [0, 5], sizes = [16, 16], strides = [1, 1]} : vector<16x22xf32> to vector<16x16xf32>
    %600 = vector.broadcast %250 : f32 to vector<16x16xf32>
    %601 = arith.mulf %600, %599 : vector<16x16xf32>
    %602 = arith.addf %586, %601 : vector<16x16xf32>
    %603 = vector.extract_strided_slice %578 {offsets = [0, 6], sizes = [16, 16], strides = [1, 1]} : vector<16x22xf32> to vector<16x16xf32>
    %604 = vector.broadcast %251 : f32 to vector<16x16xf32>
    %605 = arith.mulf %604, %603 : vector<16x16xf32>
    %606 = arith.addf %590, %605 : vector<16x16xf32>
    %607 = vector.extract_strided_slice %174 {offsets = [1, 4, 0], sizes = [1, 16, 22], strides = [1, 1, 1]} : vector<2x22x22xf32> to vector<1x16x22xf32>
    %608 = vector.shape_cast %607 : vector<1x16x22xf32> to vector<16x22xf32>
    %609 = vector.extract_strided_slice %608 {offsets = [0, 0], sizes = [16, 16], strides = [1, 1]} : vector<16x22xf32> to vector<16x16xf32>
    %610 = vector.broadcast %252 : f32 to vector<16x16xf32>
    %611 = arith.mulf %610, %609 : vector<16x16xf32>
    %612 = arith.addf %594, %611 : vector<16x16xf32>
    %613 = vector.extract_strided_slice %608 {offsets = [0, 1], sizes = [16, 16], strides = [1, 1]} : vector<16x22xf32> to vector<16x16xf32>
    %614 = vector.broadcast %253 : f32 to vector<16x16xf32>
    %615 = arith.mulf %614, %613 : vector<16x16xf32>
    %616 = arith.addf %598, %615 : vector<16x16xf32>
    %617 = vector.extract_strided_slice %608 {offsets = [0, 2], sizes = [16, 16], strides = [1, 1]} : vector<16x22xf32> to vector<16x16xf32>
    %618 = vector.broadcast %254 : f32 to vector<16x16xf32>
    %619 = arith.mulf %618, %617 : vector<16x16xf32>
    %620 = arith.addf %602, %619 : vector<16x16xf32>
    %621 = vector.extract_strided_slice %608 {offsets = [0, 3], sizes = [16, 16], strides = [1, 1]} : vector<16x22xf32> to vector<16x16xf32>
    %622 = vector.broadcast %255 : f32 to vector<16x16xf32>
    %623 = arith.mulf %622, %621 : vector<16x16xf32>
    %624 = arith.addf %606, %623 : vector<16x16xf32>
    %625 = vector.extract_strided_slice %608 {offsets = [0, 4], sizes = [16, 16], strides = [1, 1]} : vector<16x22xf32> to vector<16x16xf32>
    %626 = vector.broadcast %256 : f32 to vector<16x16xf32>
    %627 = arith.mulf %626, %625 : vector<16x16xf32>
    %628 = arith.addf %612, %627 : vector<16x16xf32>
    %629 = vector.extract_strided_slice %608 {offsets = [0, 5], sizes = [16, 16], strides = [1, 1]} : vector<16x22xf32> to vector<16x16xf32>
    %630 = vector.broadcast %257 : f32 to vector<16x16xf32>
    %631 = arith.mulf %630, %629 : vector<16x16xf32>
    %632 = arith.addf %616, %631 : vector<16x16xf32>
    %633 = vector.extract_strided_slice %608 {offsets = [0, 6], sizes = [16, 16], strides = [1, 1]} : vector<16x22xf32> to vector<16x16xf32>
    %634 = vector.broadcast %258 : f32 to vector<16x16xf32>
    %635 = arith.mulf %634, %633 : vector<16x16xf32>
    %636 = arith.addf %620, %635 : vector<16x16xf32>
    %637 = vector.extract_strided_slice %174 {offsets = [1, 5, 0], sizes = [1, 16, 22], strides = [1, 1, 1]} : vector<2x22x22xf32> to vector<1x16x22xf32>
    %638 = vector.shape_cast %637 : vector<1x16x22xf32> to vector<16x22xf32>
    %639 = vector.extract_strided_slice %638 {offsets = [0, 0], sizes = [16, 16], strides = [1, 1]} : vector<16x22xf32> to vector<16x16xf32>
    %640 = vector.broadcast %259 : f32 to vector<16x16xf32>
    %641 = arith.mulf %640, %639 : vector<16x16xf32>
    %642 = arith.addf %624, %641 : vector<16x16xf32>
    %643 = vector.extract_strided_slice %638 {offsets = [0, 1], sizes = [16, 16], strides = [1, 1]} : vector<16x22xf32> to vector<16x16xf32>
    %644 = vector.broadcast %260 : f32 to vector<16x16xf32>
    %645 = arith.mulf %644, %643 : vector<16x16xf32>
    %646 = arith.addf %628, %645 : vector<16x16xf32>
    %647 = vector.extract_strided_slice %638 {offsets = [0, 2], sizes = [16, 16], strides = [1, 1]} : vector<16x22xf32> to vector<16x16xf32>
    %648 = vector.broadcast %261 : f32 to vector<16x16xf32>
    %649 = arith.mulf %648, %647 : vector<16x16xf32>
    %650 = arith.addf %632, %649 : vector<16x16xf32>
    %651 = vector.extract_strided_slice %638 {offsets = [0, 3], sizes = [16, 16], strides = [1, 1]} : vector<16x22xf32> to vector<16x16xf32>
    %652 = vector.broadcast %262 : f32 to vector<16x16xf32>
    %653 = arith.mulf %652, %651 : vector<16x16xf32>
    %654 = arith.addf %636, %653 : vector<16x16xf32>
    %655 = vector.extract_strided_slice %638 {offsets = [0, 4], sizes = [16, 16], strides = [1, 1]} : vector<16x22xf32> to vector<16x16xf32>
    %656 = vector.broadcast %263 : f32 to vector<16x16xf32>
    %657 = arith.mulf %656, %655 : vector<16x16xf32>
    %658 = arith.addf %642, %657 : vector<16x16xf32>
    %659 = vector.extract_strided_slice %638 {offsets = [0, 5], sizes = [16, 16], strides = [1, 1]} : vector<16x22xf32> to vector<16x16xf32>
    %660 = vector.broadcast %264 : f32 to vector<16x16xf32>
    %661 = arith.mulf %660, %659 : vector<16x16xf32>
    %662 = arith.addf %646, %661 : vector<16x16xf32>
    %663 = vector.extract_strided_slice %638 {offsets = [0, 6], sizes = [16, 16], strides = [1, 1]} : vector<16x22xf32> to vector<16x16xf32>
    %664 = vector.broadcast %265 : f32 to vector<16x16xf32>
    %665 = arith.mulf %664, %663 : vector<16x16xf32>
    %666 = arith.addf %650, %665 : vector<16x16xf32>
    %667 = vector.extract_strided_slice %174 {offsets = [1, 6, 0], sizes = [1, 16, 22], strides = [1, 1, 1]} : vector<2x22x22xf32> to vector<1x16x22xf32>
    %668 = vector.shape_cast %667 : vector<1x16x22xf32> to vector<16x22xf32>
    %669 = vector.extract_strided_slice %668 {offsets = [0, 0], sizes = [16, 16], strides = [1, 1]} : vector<16x22xf32> to vector<16x16xf32>
    %670 = vector.broadcast %266 : f32 to vector<16x16xf32>
    %671 = arith.mulf %670, %669 : vector<16x16xf32>
    %672 = arith.addf %654, %671 : vector<16x16xf32>
    %673 = vector.extract_strided_slice %668 {offsets = [0, 1], sizes = [16, 16], strides = [1, 1]} : vector<16x22xf32> to vector<16x16xf32>
    %674 = vector.broadcast %267 : f32 to vector<16x16xf32>
    %675 = arith.mulf %674, %673 : vector<16x16xf32>
    %676 = arith.addf %658, %675 : vector<16x16xf32>
    %677 = vector.extract_strided_slice %668 {offsets = [0, 2], sizes = [16, 16], strides = [1, 1]} : vector<16x22xf32> to vector<16x16xf32>
    %678 = vector.broadcast %268 : f32 to vector<16x16xf32>
    %679 = arith.mulf %678, %677 : vector<16x16xf32>
    %680 = arith.addf %662, %679 : vector<16x16xf32>
    %681 = vector.extract_strided_slice %668 {offsets = [0, 3], sizes = [16, 16], strides = [1, 1]} : vector<16x22xf32> to vector<16x16xf32>
    %682 = vector.broadcast %269 : f32 to vector<16x16xf32>
    %683 = arith.mulf %682, %681 : vector<16x16xf32>
    %684 = arith.addf %666, %683 : vector<16x16xf32>
    %685 = vector.extract_strided_slice %668 {offsets = [0, 4], sizes = [16, 16], strides = [1, 1]} : vector<16x22xf32> to vector<16x16xf32>
    %686 = vector.broadcast %270 : f32 to vector<16x16xf32>
    %687 = arith.mulf %686, %685 : vector<16x16xf32>
    %688 = arith.addf %672, %687 : vector<16x16xf32>
    %689 = vector.extract_strided_slice %668 {offsets = [0, 5], sizes = [16, 16], strides = [1, 1]} : vector<16x22xf32> to vector<16x16xf32>
    %690 = vector.broadcast %271 : f32 to vector<16x16xf32>
    %691 = arith.mulf %690, %689 : vector<16x16xf32>
    %692 = arith.addf %676, %691 : vector<16x16xf32>
    %693 = vector.extract_strided_slice %668 {offsets = [0, 6], sizes = [16, 16], strides = [1, 1]} : vector<16x22xf32> to vector<16x16xf32>
    %694 = vector.broadcast %272 : f32 to vector<16x16xf32>
    %695 = arith.mulf %694, %693 : vector<16x16xf32>
    %696 = arith.addf %680, %695 : vector<16x16xf32>
    %697 = arith.addf %692, %696 : vector<16x16xf32>
    %698 = arith.addf %684, %688 : vector<16x16xf32>
    %699 = arith.addf %697, %698 : vector<16x16xf32>
    %700 = arith.negf %699 : vector<16x16xf32>
    %701 = math.exp %700 : vector<16x16xf32>
    %cst_129 = arith.constant 1.000000e+00 : f32
    %702 = vector.broadcast %cst_129 : f32 to vector<16x16xf32>
    %703 = arith.addf %702, %701 : vector<16x16xf32>
    %704 = arith.divf %702, %703 : vector<16x16xf32>
    %705 = vector.shape_cast %704 : vector<16x16xf32> to vector<1x1x16x16xf32>
    %c0_130 = arith.constant 0 : index
    %c0_131 = arith.constant 0 : index
    %c0_132 = arith.constant 0 : index
    %c0_133 = arith.constant 0 : index
    %706 = vector.load %arg7[%c0_130, %c0_131, %c0_132, %c0_133] : memref<1x1x16x16xf32, #tpu.memory_space<vmem>>, vector<1x1x16x16xf32>
    tpu.vector_store %arg7[%c0_130, %c0_131, %c0_132, %c0_133], %705 {strides = array<i32>} : memref<1x1x16x16xf32, #tpu.memory_space<vmem>>, vector<1x1x16x16xf32>,
    return
  }
  func.func @transform_0(%arg0: i32) -> (i32, i32, i32) {
    %c0_i32 = arith.constant 0 : i32
    %c0_i32_0 = arith.constant 0 : i32
    %c0_i32_1 = arith.constant 0 : i32
    return %arg0, %c0_i32, %c0_i32_0 : i32, i32, i32
  }
  func.func @transform_1(%arg0: i32) -> (i32, i32) {
    %c0_i32 = arith.constant 0 : i32
    %c0_i32_0 = arith.constant 0 : i32
    %c0_i32_1 = arith.constant 0 : i32
    return %c0_i32, %c0_i32_0 : i32, i32
  }
  func.func @transform_2(%arg0: i32) -> (i32, i32) {
    %c0_i32 = arith.constant 0 : i32
    %c0_i32_0 = arith.constant 0 : i32
    %c0_i32_1 = arith.constant 0 : i32
    return %c0_i32, %c0_i32_0 : i32, i32
  }
  func.func @transform_3(%arg0: i32) -> (i32, i32) {
    %c0_i32 = arith.constant 0 : i32
    %c0_i32_0 = arith.constant 0 : i32
    %c0_i32_1 = arith.constant 0 : i32
    return %c0_i32, %c0_i32_0 : i32, i32
  }
  func.func @transform_4(%arg0: i32) -> (i32, i32) {
    %c0_i32 = arith.constant 0 : i32
    %c0_i32_0 = arith.constant 0 : i32
    %c0_i32_1 = arith.constant 0 : i32
    return %c0_i32, %c0_i32_0 : i32, i32
  }
  func.func @transform_5(%arg0: i32) -> i32 {
    %c0_i32 = arith.constant 0 : i32
    %c0_i32_0 = arith.constant 0 : i32
    return %c0_i32 : i32
  }
  func.func @transform_6(%arg0: i32) -> (i32, i32, i32, i32) {
    %c0_i32 = arith.constant 0 : i32
    %c0_i32_0 = arith.constant 0 : i32
    %c0_i32_1 = arith.constant 0 : i32
    %c0_i32_2 = arith.constant 0 : i32
    return %arg0, %c0_i32, %c0_i32_0, %c0_i32_1 : i32, i32, i32, i32
  }
}

</mosaic_0001>

<bundles_post_ra>
// kernel: tpu_custom_call.1
= control target key start
LH: loop header
LB: loop body
LE: loop exit
PB: predicated region body
PF: predicated region fallthrough
CT: control target
= control target key end

     0   :  { %11 = vsyncpa [#allocation4], 0  ;;  %s5655_s0 = inlined_call_operand.hbm [shape: f32[2,32,256], index: 0, kind: input, shape index: {}]   ;;  %s5656_s1 = inlined_call_operand.vmem [shape: f32[2,32], index: 1, kind: input, shape index: {}]   ;;  %s5657_s2 = inlined_call_operand.vmem [shape: f32[2,1], index: 2, kind: input, shape index: {}]   ;;  %s5658_s3 = inlined_call_operand.vmem [shape: f32[32,2], index: 3, kind: input, shape index: {}]   ;;  %s5659_s4 = inlined_call_operand.vmem [shape: f32[32,1], index: 4, kind: input, shape index: {}]   ;;  %s5660_s5 = inlined_call_operand.vmem [shape: f32[98], index: 5, kind: input, shape index: {}]   ;;  %s5661_s6 = inlined_call_operand.hbm [shape: f32[2,1,16,16], index: 6, kind: output, shape index: {}]  }
   0x1   :  { %13 = vsyncpa [#allocation4 + $0x1], 0 }
   0x2   :  { %14 = vsyncpa [#allocation6], 0 }
   0x3   :  { %15 = vsyncpa [#allocation5], 0 }
   0x4   :  { %17 = vsyncpa [#allocation5 + $0x1], 0  ;;  %s3266_s21 = smov 0   ;;  %s3268_s22 = smov 0  }
   0x5   :  { %s3270_s23 = smov 0   ;;  %s3272_s24 = smov 0  }
   0x6 LB: > { %s3287_s25 = sadd.s32 4294967295, %s3202_s24   ;;  %s2808_s26 = sadd.s32 4294967294, %s3202_s24   ;;  %s3202_s24 = sphi %s3272_s24, %s5878_s24   ;;  %s3198_s23 = sphi %s3270_s23, %s5877_s23   ;;  %s3194_s22 = sphi %s3268_s22, %s5876_s22   ;;  %s3190_s21 = sphi %s3266_s21, %s5875_s21  }
   0x7   : > { %s3291_s27 = sadd.s32 1, %s3202_s24   ;;  %s30_s28 = sadd.s32 1, %s3198_s23 }
   0x8   : > { %s27_s29 = ssub.s32 %s3202_s24, %s3291_s27  ;;  %p37_p0 = scmp.ne.s32.totalorder %s3198_s23, %s3194_s22 }
   0x9   : > { %p28_p1 = scmp.eq.s32.totalorder %s27_s29, 0  ;;  %p38_p2 = scmp.eq.s32.totalorder %s3202_s24, 0 }
   0xa   : > { %p43_p3 = scmp.ne.s32.totalorder %s3194_s22, %s3190_s21  ;;  %p5663_p4 = scmp.eq.s32.totalorder %s3287_s25, 0 }
   0xb   : > { %s3303_s30 = scalar_select %p28_p1, %s3198_s23, %s30_s28  }
   0xc   : > { %p3305_p5 = por %p38_p2, %p37_p0  ;;  %p3311_p6 = por %p5663_p4, %p43_p3 }
   0xd   : > { %p172_p7 = scmp.eq.s32.totalorder %s3287_s25, 1  ;;  %p178_p8 = scmp.eq.s32.totalorder %s2808_s26, 1 }
   0xe   : > { %s5702_s8 = scalar_select %p3311_p6, 1, 0 }
   0xf   : > { %p2809_p9 = scmp.ge.s32.totalorder %s3202_s24, 1  ;;  %p185_p10 = scmp.lt.s32.totalorder %s3202_s24, 3 }
  0x10   : > { %p3318_p11 = por %p172_p7, %p37_p0  ;;  %p3322_p12 = por %p178_p8, %p43_p3 }
  0x11   : > { %p3326_p13 = pnand %p2809_p9, %p185_p10  ;;  %s210_s14 = sshll.u32 %s5660_s5, 4  ;;  %s211_s14 = int_to_ptr.vmem [resolvable:$true] %s210_s14 }
  0x12   : > { %s5703_s9 = scalar_select %p3318_p11, 1, 0 }
  0x13   : > { %s5704_s10 = scalar_select %p3322_p12, 1, 0 }
  0x14   : > { %p2978_p1 = pneg %p3326_p13  ;;  %p2991_p2 = scmp.lt.s32.totalorder %s3202_s24, 2 }
  0x15   : > { %s221_s16 = sand.u32 1, %s3198_s23   ;;  %s3087_s19 = scalar_lea.vmem %s211_s14, 16 }
  0x16   : > { %p3339_p7 = pnand %p2978_p1, %p5663_p4  ;;  %p3346_p3 = pnand %p2991_p2, %p3305_p5 }
  0x17   : > { %s2812_s18 = sshll.u32 %s221_s16, 6  ;;  %p3088_p8 = scmp.ne.s32.totalorder %s211_s14, %s3087_s19 }
  0x18   : > { %p3089_p9 = pneg %p3339_p7  ;;  %p3095_p12 = scmp.lt.s32.totalorder %s211_s14, %s211_s14 }
  0x19   : > { %p3096_p11 = scmp.lt.s32.totalorder %s3087_s19, %s3087_s19 }
  0x1a   : > { %p3090_p10 = pnand %p3089_p9, %p3088_p8 }
  0x1b   : > { %p3097_p1 = por %p3096_p11, %p3095_p12 }
  0x1c   : > { %p3091_p0 = pneg %p3090_p10 }
  0x1e   : > { %p3098_p4 = pnand %p3097_p1, %p3091_p0 }
  0x20   : > { %3101 = shalt.err (!%p3098_p4)
}
  0x21   : > { %s3204_s20 = smov [#allocation7]   ;;  %s2933_s26 = sshll.u32 %s3202_s24, 10 }
  0x22   : > { %2981 = dma.vmem_to_smem (!%p3339_p7), %s211_s14, 16, %s3204_s20, [#allocation6]  }
  0x23   : > { %s225_s28 = scalar_lea.vmem [#allocation3], %s2812_s18  ;;  %s3358_s13 = scalar_lea.hbm %s5655_s0, %s2933_s26 }
  0x24   : > { %s232_s29 = sshll.u32 %s225_s28, 4  ;;  %s3362_s19 = scalar_lea.sflag [#allocation4], %s221_s16  ;;  %s3360_s29 = int_to_ptr.vmem [resolvable:$true] %s232_s29 }
  0x25   : > { %s3102_s15 = scalar_lea.hbm %s3358_s13, 1024  ;;  %p3104_p5 = pneg %p3346_p3 }
  0x26   : > { %p3103_p4 = scmp.ne.s32.totalorder %s3358_s13, %s3102_s15  ;;  %s3107_s20 = scalar_lea.hbm %s5655_s0, 2048 }
  0x27   : > { %p3108_p0 = scmp.lt.u32.totalorder %s3358_s13, %s5655_s0  ;;  %p3109_p2 = scmp.lt.u32.totalorder %s3107_s20, %s3102_s15 }
  0x28   : > { %p3105_p11 = pnand %p3104_p5, %p3103_p4  ;;  %p3111_p8 = scmp.lt.u32.totalorder %s3102_s15, %s3358_s13 }
  0x29   : > { %p3110_p7 = por %p3109_p2, %p3108_p0 }
  0x2a   : > { %p3106_p12 = pneg %p3105_p11 }
  0x2b   : > { %p3112_p9 = por %p3111_p8, %p3110_p7 }
  0x2d   : > { %p3113_p10 = pnand %p3112_p9, %p3106_p12 }
  0x2f   : > { %3116 = shalt.err (!%p3113_p10)
}
  0x30   : > { %s3117_s16 = scalar_lea.vmem %s3360_s29, 1024  ;;  %s3205_s7 = smov [#allocation3]  }
  0x31   : > { %p3118_p1 = scmp.ne.s32.totalorder %s3360_s29, %s3117_s16  ;;  %s3122_s12 = sshll.u32 %s3205_s7, 4  ;;  %s3123_s12 = int_to_ptr.vmem [resolvable:$false] %s3122_s12 }
  0x32   : > { %s3124_s14 = scalar_lea.vmem %s3123_s12, 2048  ;;  %p3125_p6 = scmp.lt.s32.totalorder %s3360_s29, %s3123_s12 }
  0x33   : > { %p3120_p4 = pnand %p3118_p1, %p3104_p5  ;;  %p3126_p0 = scmp.lt.s32.totalorder %s3124_s14, %s3117_s16 }
  0x35   : > { %p3121_p11 = pneg %p3120_p4  ;;  %p3127_p2 = por %p3126_p0, %p3125_p6 }
  0x37   : > { %p3128_p7 = pnand %p3127_p2, %p3121_p11 }
  0x39   : > { %3131 = shalt.err (!%p3128_p7)
}
  0x3a   : > { %s3206_s15 = smov 256   ;;  %s3207_s18 = smov 16  }
  0x3b   : > { %2985 = dma.hbm_to_vmem [thread:$0]  (!%p3346_p3), %s3358_s13, 1024, %s3360_s29, %s3362_s19, %s3206_s15, %s3206_s15, %s3207_s18  }
  0x3c   : > { %244 = sbr.rel (%p3326_p13) target bundleno = 1780 (0x6f4), region = 44 }
  0x43   : > { %s3393_s20 = sand.u32 1, %s3194_s22   ;;  %p5708_p6 = scmp.ne.s32.totalorder %s5702_s8, 0 }
  0x44   : > { %s2816_s26 = sshll.u32 %s3393_s20, 6  ;;  %s247_s28 = scalar_lea.sflag [#allocation4], %s3393_s20 }
  0x45   : > { %s250_s16 = scalar_lea.vmem [#allocation3], %s2816_s26 }
  0x46   : > { %3177 = dma.done.wait (%p5708_p6), %s247_s28, 1024  }
  0x47   : > { %3179 = vsyncadd (%p5708_p6), %s247_s28, 4294966272  ;;  %p5709_p5 = scmp.eq.s32.totalorder %s3287_s25, 0 }
  0x49   : > { %3181 = dma.done.wait (%p5709_p5), [#allocation6], 16   ;;  %p5710_p3 = pmov %p5709_p5 }
  0x4b   : > { %3183 = vsyncadd (%p5710_p3), [#allocation6], 4294967280 }
  0x4c   : > { %259 = sfence }
  0x4d   : > { %v3405_v0 = vld [vmem:[%s250_s16] sm:$0xff]  ;;  %v3407_v1 = vld [vmem:[%s250_s16 + $0x8] sm:$0xff]  ;;  %v3409_v2 = vld [vmem:[%s250_s16 + $0x10] sm:$0xff]  ;;  %v3208_v16 = vmov 0.0|0.0   ;;  %vm3209_vm0 = vmmov 0   ;;  %v3210_v17 = vmov 0.0   ;;  %v321_v20 = vlaneseq }
  0x4e   : > { %v309_v3 = vmax.f32 %v3405_v0, %v3407_v1  ;;  %v292_v4 = vadd.f32 %v3407_v1, %v3405_v0  ;;  %v3415_v5 = vld [vmem:[%s250_s16 + $0x18] sm:$0xff]  ;;  %v3421_v8 = vld [vmem:[%s250_s16 + $0x30] sm:$0xff]  ;;  %v3425_v10 = vld [vmem:[%s250_s16 + $0x20] sm:$0xff]  ;;  %2964 = vmatprep.subr.bf16.mxu0 %v3208_v16  ;;  %2953 = vmatprep.mubr.msk.f32.mxu0 %vm3209_vm0, %v3210_v17  ;;  %v3211_v19 = vmov 0   ;;  %vm335_vm2 = vcmask 261120   ;;  %s5665_s7 = smov 3  }
  0x4f   : > { %v312_v6 = vmax.f32 %v3409_v2, %v3415_v5  ;;  %v295_v7 = vadd.f32 %v3415_v5, %v3409_v2  ;;  %v3423_v9 = vld [vmem:[%s250_s16 + $0x38] sm:$0xff]  ;;  %v3427_v11 = vld [vmem:[%s250_s16 + $0x28] sm:$0xff]  ;;  %v329_v18 = vld [vmem:[%s5657_s2] sm:$0x3]  ;;  %3051 = vset.pattern.permute.xlu0 %v3211_v19  ;;  %3052 = vset.pattern.permute.xlu1 %v3211_v19  ;;  %v322_v23 = vand.u32 127, %v321_v20  ;;  %vm414_vm3 = vcmask 15360  }
  0x50   : > { %310 = vmax.xlane.f32.xlu1 %v309_v3  ;;  %293 = vadd.xlane.f32.xlu0 %v292_v4  ;;  %v301_v12 = vadd.f32 %v3423_v9, %v3421_v8  ;;  %v298_v13 = vadd.f32 %v3427_v11, %v3425_v10  ;;  %v318_v14 = vmax.f32 %v3421_v8, %v3423_v9  ;;  %v328_v40 = vld [vmem:[%s5656_s1] sm:$0x3]  ;;  %vm427_vm4 = vcmask 1041408   ;;  %v411_v47 = vld [vmem:[%s5658_s3 + $0x8] sm:$0xff]  ;;  %v412_v48 = vld [vmem:[%s5658_s3 + $0x10] sm:$0xff]  ;;  %s3213_s12 = smov 115  }
  0x51   : > { %v315_v15 = vmax.f32 %v3425_v10, %v3427_v11  ;;  %vm323_vm1 = vcmp.eq.s32.totalorder %v322_v23, 0  ;;  %v410_v41 = vld [vmem:[%s5658_s3] sm:$0xff]  ;;  %v413_v49 = vld [vmem:[%s5658_s3 + $0x18] sm:$0xff]  ;;  %v529_v58 = vld [vmem:[%s5659_s4 + $0x8] sm:$0xff]  ;;  %vm631_vm5 = vcmask 179200   ;;  %s3214_s14 = smov 99  }
  0x52   : > { %2958 = vmatprep.mubr.msk.f32.mxu1 %vm414_vm3, %v410_v41  ;;  %v533_v59 = vmul.f32 2.0, %v529_v58  ;;  %v528_v60 = vld [vmem:[%s5659_s4] sm:$0xff]  ;;  %v531_v3 = vld [vmem:[%s5659_s4 + $0x18] sm:$0xff]  ;;  %636 = vst.msk [vmem:[#allocation2 + $0x18] sm:$0xff] %vm631_vm5, %v3210_v17  ;;  %632 = vst.msk [vmem:[#allocation2] sm:$0xff] %vm631_vm5, %v3210_v17  ;;  %s3215_s15 = smov 83  }
  0x53   : > { %v532_v63 = vmul.f32 2.0, %v528_v60  ;;  %633 = vst.msk [vmem:[#allocation2 + $0x8] sm:$0xff] %vm631_vm5, %v3210_v17  ;;  %637 = vst.msk [vmem:[#allocation2 + $0x20] sm:$0xff] %vm631_vm5, %v3210_v17  ;;  %s3216_s18 = smov 67   ;;  %s3217_s26 = smov 51   ;;  %vm634_vm6 = vcmask 177152  }
  0x54   : > { %313 = vmax.xlane.f32.xlu1 %v312_v6  ;;  %296 = vadd.xlane.f32.xlu0 %v295_v7  ;;  %s3218_s28 = smov 35   ;;  %s3219_s16 = smov 19   ;;  %638 = vst.msk [vmem:[#allocation2 + $0x28] sm:$0x3f] %vm634_vm6, %v3210_v17  ;;  %635 = vst.msk [vmem:[#allocation2 + $0x10] sm:$0x3f] %vm634_vm6, %v3210_v17 }
  0x55   : > { %vm643_vm7 = vcmask 147480   ;;  %s3519_s8 = sld [smem:[#allocation7 + $0x33]]  ;;  %s3523_s11 = sld [smem:[#allocation7 + $0x37]]  ;;  %vm1084_vm8 = vcmask 1045504   ;;  %vm1225_vm9 = vcmask 1044480   ;;  %vm1366_vm10 = vcmask 1043456  }
  0x56   : > { %s3528_s17 = sld [smem:[#allocation7 + $0x31]]  ;;  %s3538_s29 = sld [smem:[#allocation7 + $0x32]]  ;;  %vm943_vm11 = vcmask 1046528   ;;  %vm1491_vm12 = vcmask 1042432   ;;  %vm2706_vm13 = vcmask 130048  }
  0x57   : > { %s3220_s13 = smov 1   ;;  %s3547_s19 = sld [smem:[#allocation7 + $0x35]] }
  0x58   : > { %302 = vadd.xlane.f32.xlu1 %v301_v12  ;;  %299 = vadd.xlane.f32.xlu0 %v298_v13  ;;  %v535_v12 = vmul.f32 2.0, %v531_v3  ;;  %v530_v13 = vld [vmem:[%s5659_s4 + $0x10] sm:$0xff]  ;;  %p5872_p12 = scmp.ne.s32.totalorder %s5703_s9, 0 }
  0x5c   : > { %319 = vmax.xlane.f32.xlu1 %v318_v14  ;;  %316 = vmax.xlane.f32.xlu0 %v315_v15 }
  0x72   : > { %332 = vperm.xlu0 %3051, %v329_v18   ;;  %v534_v18 = vmul.f32 2.0, %v530_v13 }
  0xdd   : > { %v311_v21 = vpop.xlane.xlu1 %310  ;;  %v294_v22 = vpop.xlane.xlu0 %293 }
  0xde   : > { %v305_v24 = vmul.f32 0.00390625, %v294_v22 }
  0xe0   : > { %v324_v28 = vsel %vm323_vm1, %v305_v24, %v311_v21 }
  0xe1   : > { %v314_v25 = vpop.xlane.xlu1 %313  ;;  %v297_v26 = vpop.xlane.xlu0 %296 }
  0xe2   : > { %v306_v27 = vmul.f32 0.00390625, %v297_v26 }
  0xe4   : > { %v325_v29 = vsel %vm323_vm1, %v306_v27, %v314_v25 }
  0xe5   : > { %v303_v30 = vpop.xlane.xlu1 %302  ;;  %v300_v31 = vpop.xlane.xlu0 %299  ;;  %v2965_v32 = vpack.c.bf16 %v325_v29, %v324_v28 }
  0xe6   : > { %v308_v33 = vmul.f32 0.00390625, %v303_v30  ;;  %v307_v34 = vmul.f32 0.00390625, %v300_v31 }
  0xe7   : > { %2966 = vmatpush3.bf16.msra.mxu0 %v2965_v32 }
  0xe8   : > { %2967 = vmatprep.subr.bf16.mxu0 %v3208_v16 }
  0xe9   : > { %v320_v35 = vpop.xlane.xlu1 %319  ;;  %v317_v36 = vpop.xlane.xlu0 %316 }
  0xea   : > { %v327_v37 = vsel %vm323_vm1, %v308_v33, %v320_v35  ;;  %v326_v38 = vsel %vm323_vm1, %v307_v34, %v317_v36 }
  0xeb   : > { %v2968_v39 = vpack.c.bf16 %v327_v37, %v326_v38 }
  0xed   : > { %2969 = vmatpush3.bf16.msra.mxu0 %v2968_v39 }
  0xf0   : > { %2954 = vmatmul.mubr.msk.f32.vlgmr.msra.gmra.mrb[0].mxu0 %vm335_vm2, %v328_v40 }
  0xf1   : > { %v333_v42 = vpop.permute.xlu0 %332 }
 0x1c3   : > { %v405_v43 = vpop.f32.mrb[0].mxu0 }
 0x1c4   : > { %v406_v44 = vadd.f32 %v405_v43, %v333_v42  ;;  %v2955_v45 = vpop.f32.mrb[1].mxu0 }
 0x1c6   : > { %v409_v46 = vmax.f32 %v406_v44, 0.0 }
 0x1c8   : > { %2956 = vmatprep.subr.msk.mxu1 %vm427_vm4, %v409_v46 }
 0x1c9   : > { %2957 = vmatpush3.msk.msra.mxu1 %vm427_vm4, %v409_v46 }
 0x1ca   : > { %2959 = vmatmul.mubr.msk.f32.vlgmr.msra.gmra.mrb[0].mxu1 %vm414_vm3, %v411_v47 }
 0x1cb   : > { %2961 = vmatprep.mubr.msk.f32.mxu1 %vm414_vm3, %v412_v48 }
 0x1ce   : > { %2962 = vmatmul.mubr.msk.f32.gmra.mrb[2].mxu1 %vm414_vm3, %v413_v49 }
 0x29d   : > { %v2960_v50 = vpop.f32.mrb[0].mxu1 }
 0x29e   : > { %v497_v51 = vpop.f32.mrb[1].mxu1  ;;  %v519_v52 = vsel %vm414_vm3, %v2960_v50, 0.0 }
 0x29f   : > { %520 = vadd.xlane.f32.xlu1 %v519_v52  ;;  %v516_v54 = vsel %vm414_vm3, %v497_v51, 0.0 }
 0x2a1   : > { %v2963_v53 = vpop.f32.mrb[2].mxu1 }
 0x2a2   : > { %v507_v55 = vpop.f32.mrb[3].mxu1  ;;  %v525_v56 = vsel %vm414_vm3, %v2963_v53, 0.0 }
 0x2a3   : > { %517 = vadd.xlane.f32.xlu1 %v516_v54  ;;  %v522_v57 = vsel %vm414_vm3, %v507_v55, 0.0 }
 0x2a7   : > { %526 = vadd.xlane.f32.xlu1 %v525_v56 }
 0x2ab   : > { %523 = vadd.xlane.f32.xlu1 %v522_v57 }
 0x32c   : > { %v521_v61 = vpop.xlane.xlu1 %520 }
 0x32d   : > { %v537_v62 = vadd.f32 %v533_v59, %v521_v61 }
 0x32f   : > { %v2826_v4 = vmul.f32 -1.442695, %v537_v62 }
 0x330   : > { %v518_v6 = vpop.xlane.xlu1 %517 }
 0x331   : > { %3053 = vpow2.f32 %v2826_v4  ;;  %v536_v7 = vadd.f32 %v532_v63, %v518_v6 }
 0x333   : > { %v2825_v14 = vmul.f32 -1.442695, %v536_v7 }
 0x334   : > { %v527_v15 = vpop.xlane.xlu1 %526 }
 0x335   : > { %3055 = vpow2.f32 %v2825_v14  ;;  %v539_v16 = vadd.f32 %v535_v12, %v527_v15 }
 0x337   : > { %v2828_v19 = vmul.f32 -1.442695, %v539_v16 }
 0x338   : > { %v524_v20 = vpop.xlane.xlu1 %523 }
 0x339   : > { %3057 = vpow2.f32 %v2828_v19  ;;  %v538_v21 = vadd.f32 %v534_v18, %v524_v20 }
 0x33b   : > { %v3054_v22 = vpop.eup %3053  ;;  %v2827_v23 = vmul.f32 -1.442695, %v538_v21 }
 0x33c   : > { %v553_v24 = vadd.f32 1.0, %v3054_v22 }
 0x33d   : > { %3059 = vpow2.f32 %v2827_v23 }
 0x33e   : > { %3061 = vrcp.f32 %v553_v24 }
 0x33f   : > { %v3056_v25 = vpop.eup %3055 }
 0x340   : > { %v552_v26 = vadd.f32 1.0, %v3056_v25 }
 0x342   : > { %3063 = vrcp.f32 %v552_v26 }
 0x343   : > { %v3058_v27 = vpop.eup %3057 }
 0x344   : > { %v555_v28 = vadd.f32 1.0, %v3058_v27 }
 0x346   : > { %3065 = vrcp.f32 %v555_v28 }
 0x347   : > { %v3060_v29 = vpop.eup %3059 }
 0x348   : > { %v3062_v30 = vpop.eup %3061  ;;  %v554_v31 = vadd.f32 1.0, %v3060_v29 }
 0x349   : > { %571 = vperm.xlu1 %3052, %v3062_v30  }
 0x34a   : > { %3067 = vrcp.f32 %v554_v31 }
 0x34c   : > { %v3064_v32 = vpop.eup %3063 }
 0x34d   : > { %566 = vperm.xlu1 %3052, %v3064_v32  }
 0x350   : > { %v3066_v33 = vpop.eup %3065 }
 0x351   : > { %581 = vperm.xlu1 %3052, %v3066_v33   ;;  %v1791_v33 = vstv %s3519_s8  ;;  %s2907_s8 = sld [smem:[#allocation7 + $0x4f]] }
 0x354   : > { %v3068_v34 = vpop.eup %3067 }
 0x355   : > { %576 = vperm.xlu1 %3052, %v3068_v34  }
 0x3c8   : > { %v572_v35 = vpop.permute.xlu1 %571 }
 0x3c9   : > { %v586_v39 = vmul.f32 %v572_v35, %v3409_v2 }
 0x3cc   : > { %v567_v36 = vpop.permute.xlu1 %566 }
 0x3cd   : > { %v584_v38 = vmul.f32 %v567_v36, %v3405_v0  ;;  %v585_v0 = vmul.f32 %v567_v36, %v3407_v1 }
 0x3cf   : > { %v592_v42 = vadd.f32 %v586_v39, %v584_v38 }
 0x3d0   : > { %v582_v37 = vpop.permute.xlu1 %581 }
 0x3d1   : > { %v590_v40 = vmul.f32 %v582_v37, %v3421_v8  ;;  %v587_v8 = vmul.f32 %v572_v35, %v3415_v5  ;;  %v591_v61 = vmul.f32 %v582_v37, %v3423_v9 }
 0x3d3   : > { %v614_v44 = vmax.f32 %v586_v39, %v590_v40  ;;  %v601_v58 = vadd.f32 %v587_v8, %v585_v0  ;;  %v623_v1 = vmax.f32 %v587_v8, %v591_v61 }
 0x3d4   : > { %v577_v41 = vpop.permute.xlu1 %576 }
 0x3d5   : > { %v588_v43 = vmul.f32 %v577_v41, %v3425_v10  ;;  %v589_v56 = vmul.f32 %v577_v41, %v3427_v11 }
 0x3d7   : > { %v593_v45 = vadd.f32 %v592_v42, %v588_v43  ;;  %v613_v46 = vmax.f32 %v584_v38, %v588_v43  ;;  %v602_v62 = vadd.f32 %v601_v58, %v589_v56  ;;  %v622_v3 = vmax.f32 %v585_v0, %v589_v56 }
 0x3d8   : > { %v1843_v38 = vstv %s3523_s11  ;;  %v1765_v42 = vstv %s3528_s17  ;;  %s5712_s11 = smov 3   ;;  %s2919_s17 = sld [smem:[#allocation7 + $0x5b]] }
 0x3d9   : > { %v594_v47 = vadd.f32 %v593_v45, %v590_v40  ;;  %v615_v48 = vmax.f32 %v613_v46, %v614_v44  ;;  %v603_v4 = vadd.f32 %v602_v62, %v591_v61  ;;  %v624_v5 = vmax.f32 %v622_v3, %v623_v1 }
 0x3da   : > { %v1778_v46 = vstv %s3538_s29  ;;  %s2923_s29 = sld [smem:[#allocation7 + $0x5f]] }
 0x3db   : > { %v595_v49 = vrot.slane %v594_v47, 4  ;;  %v616_v50 = vrot.slane %v615_v48, 4  ;;  %v604_v11 = vrot.slane %v603_v4, 4  ;;  %v625_v9 = vrot.slane %v624_v5, 4 }
 0x3dd   : > { %v596_v51 = vadd.f32 %v595_v49, %v594_v47  ;;  %v617_v52 = vmax.f32 %v615_v48, %v616_v50  ;;  %v605_v6 = vadd.f32 %v604_v11, %v603_v4  ;;  %v626_v7 = vmax.f32 %v624_v5, %v625_v9 }
 0x3de   : > { %v1817_v50 = vstv %s3547_s19  ;;  %s2889_s19 = sld [smem:[#allocation7 + $0x3d]] }
 0x3df   : > { %v597_v53 = vrot.slane %v596_v51, 2  ;;  %v618_v54 = vrot.slane %v617_v52, 2  ;;  %v606_v12 = vrot.slane %v605_v6, 2  ;;  %v627_v13 = vrot.slane %v626_v7, 2 }
 0x3e1   : > { %v598_v2 = vadd.f32 %v597_v53, %v596_v51  ;;  %v619_v55 = vmax.f32 %v617_v52, %v618_v54  ;;  %v607_v14 = vadd.f32 %v606_v12, %v605_v6  ;;  %v628_v15 = vmax.f32 %v626_v7, %v627_v13 }
 0x3e3   : > { %v599_v10 = vrot.slane %v598_v2, 1  ;;  %v620_v57 = vrot.slane %v619_v55, 1  ;;  %v608_v16 = vrot.slane %v607_v14, 1  ;;  %v629_v18 = vrot.slane %v628_v15, 1 }
 0x3e5   : > { %v600_v59 = vadd.f32 %v599_v10, %v598_v2  ;;  %v621_v60 = vmax.f32 %v619_v55, %v620_v57  ;;  %v609_v19 = vadd.f32 %v608_v16, %v607_v14  ;;  %v630_v20 = vmax.f32 %v628_v15, %v629_v18 }
 0x3e7   : > { %v611_v63 = vmul.f32 0.03125, %v600_v59  ;;  %646 = vrot.lane.b32.xlu1 %v621_v60, %s5665_s7  ;;  %v612_v21 = vmul.f32 0.03125, %v609_v19 }
 0x3e9   : > { %640 = vrot.lane.b32.xlu0 %v611_v63, %s5665_s7 }
 0x3eb   : > { %655 = vrot.lane.b32.xlu1 %v621_v60, %s3213_s12 }
 0x3ed   : > { %651 = vrot.lane.b32.xlu0 %v611_v63, %s3213_s12 }
 0x3ef   : > { %663 = vrot.lane.b32.xlu1 %v621_v60, %s3214_s14 }
 0x3f1   : > { %659 = vrot.lane.b32.xlu0 %v611_v63, %s3214_s14 }
 0x3f3   : > { %671 = vrot.lane.b32.xlu1 %v621_v60, %s3215_s15 }
 0x3f5   : > { %667 = vrot.lane.b32.xlu0 %v611_v63, %s3215_s15 }
 0x3f7   : > { %679 = vrot.lane.b32.xlu1 %v621_v60, %s3216_s18 }
 0x3f9   : > { %675 = vrot.lane.b32.xlu0 %v611_v63, %s3216_s18 }
 0x3fb   : > { %687 = vrot.lane.b32.xlu1 %v621_v60, %s3217_s26 }
 0x3fd   : > { %683 = vrot.lane.b32.xlu0 %v611_v63, %s3217_s26 }
 0x3ff   : > { %695 = vrot.lane.b32.xlu1 %v621_v60, %s3218_s28 }
 0x401   : > { %691 = vrot.lane.b32.xlu0 %v611_v63, %s3218_s28 }
 0x403   : > { %703 = vrot.lane.b32.xlu1 %v621_v60, %s3219_s16 }
 0x405   : > { %699 = vrot.lane.b32.xlu0 %v611_v63, %s3219_s16 }
 0x407   : > { %713 = vrot.lane.b32.xlu1 %v630_v20, %s5665_s7 }
 0x409   : > { %708 = vrot.lane.b32.xlu0 %v612_v21, %s5665_s7  ;;  %s5669_s7 = smov 124  }
 0x40b   : > { %721 = vrot.lane.b32.xlu1 %v630_v20, %s3213_s12 }
 0x40d   : > { %717 = vrot.lane.b32.xlu0 %v612_v21, %s3213_s12  ;;  %s5667_s12 = smov 125  }
 0x40f   : > { %729 = vrot.lane.b32.xlu1 %v630_v20, %s3214_s14 }
 0x411   : > { %725 = vrot.lane.b32.xlu0 %v612_v21, %s3214_s14  ;;  %s3556_s14 = sld [smem:[#allocation7 + $0x36]] }
 0x413   : > { %737 = vrot.lane.b32.xlu1 %v630_v20, %s3215_s15 }
 0x415   : > { %733 = vrot.lane.b32.xlu0 %v612_v21, %s3215_s15  ;;  %s3565_s15 = sld [smem:[#allocation7 + $0x4]] }
 0x417   : > { %745 = vrot.lane.b32.xlu1 %v630_v20, %s3216_s18  ;;  %v1830_v54 = vstv %s3556_s14  ;;  %s2890_s14 = sld [smem:[#allocation7 + $0x3e]] }
 0x419   : > { %741 = vrot.lane.b32.xlu0 %v612_v21, %s3216_s18  ;;  %s3574_s18 = sld [smem:[#allocation7 + $0x5]] }
 0x41b   : > { %753 = vrot.lane.b32.xlu1 %v630_v20, %s3217_s26  ;;  %v897_v56 = vstv %s3565_s15  ;;  %s2893_s15 = sld [smem:[#allocation7 + $0x41]] }
 0x41d   : > { %749 = vrot.lane.b32.xlu0 %v612_v21, %s3217_s26  ;;  %s2891_s26 = sld [smem:[#allocation7 + $0x3f]] }
 0x41f   : > { %761 = vrot.lane.b32.xlu1 %v630_v20, %s3218_s28  ;;  %v910_v59 = vstv %s3574_s18  ;;  %s2894_s18 = sld [smem:[#allocation7 + $0x42]] }
 0x421   : > { %757 = vrot.lane.b32.xlu0 %v612_v21, %s3218_s28  ;;  %s3585_s28 = sld [smem:[#allocation7 + $0x6]] }
 0x423   : > { %769 = vrot.lane.b32.xlu1 %v630_v20, %s3219_s16  ;;  %v3596_v61 = vstv %s2891_s26  ;;  %s2903_s26 = sld [smem:[#allocation7 + $0x4b]] }
 0x425   : > { %765 = vrot.lane.b32.xlu0 %v612_v21, %s3219_s16  ;;  %s2895_s16 = sld [smem:[#allocation7 + $0x43]] }
 0x427   : > { %v923_v3 = vstv %s3585_s28  ;;  %s2897_s28 = sld [smem:[#allocation7 + $0x45]] }
 0x42b   : > { %v3620_v7 = vstv %s2895_s16  ;;  %s5711_s16 = smov 125  }
 0x459   : > { %v647_v17 = vpop.permute.xlu1 %646 }
 0x45a   : > { %650 = vst.msk [vmem:[#allocation2 + $0x1b] sm:$0x1] %vm643_vm7, %v647_v17 }
 0x45b   : > { %v641_v22 = vpop.permute.xlu0 %640 }
 0x45c   : > { %644 = vst.msk [vmem:[#allocation2 + $0x3] sm:$0x1] %vm643_vm7, %v641_v22 }
 0x45d   : > { %v656_v23 = vpop.permute.xlu1 %655 }
 0x45e   : > { %658 = vst.msk [vmem:[#allocation2 + $0x1c] sm:$0x1] %vm643_vm7, %v656_v23 }
 0x45f   : > { %v652_v24 = vpop.permute.xlu0 %651 }
 0x460   : > { %654 = vst.msk [vmem:[#allocation2 + $0x4] sm:$0x1] %vm643_vm7, %v652_v24 }
 0x461   : > { %v664_v25 = vpop.permute.xlu1 %663 }
 0x462   : > { %666 = vst.msk [vmem:[#allocation2 + $0x1d] sm:$0x1] %vm643_vm7, %v664_v25 }
 0x463   : > { %v660_v26 = vpop.permute.xlu0 %659 }
 0x464   : > { %662 = vst.msk [vmem:[#allocation2 + $0x5] sm:$0x1] %vm643_vm7, %v660_v26 }
 0x465   : > { %v672_v27 = vpop.permute.xlu1 %671 }
 0x466   : > { %674 = vst.msk [vmem:[#allocation2 + $0x1e] sm:$0x1] %vm643_vm7, %v672_v27  ;;  %v3654_v27 = vstv %s2903_s26  ;;  %s3224_s26 = smov 2  }
 0x467   : > { %v668_v28 = vpop.permute.xlu0 %667 }
 0x468   : > { %670 = vst.msk [vmem:[#allocation2 + $0x6] sm:$0x1] %vm643_vm7, %v668_v28 }
 0x469   : > { %v680_v29 = vpop.permute.xlu1 %679 }
 0x46a   : > { %682 = vst.msk [vmem:[#allocation2 + $0x1f] sm:$0x1] %vm643_vm7, %v680_v29 }
 0x46b   : > { %v676_v30 = vpop.permute.xlu0 %675 }
 0x46c   : > { %678 = vst.msk [vmem:[#allocation2 + $0x7] sm:$0x1] %vm643_vm7, %v676_v30 }
 0x46d   : > { %v688_v31 = vpop.permute.xlu1 %687 }
 0x46e   : > { %690 = vst.msk [vmem:[#allocation2 + $0x20] sm:$0x1] %vm643_vm7, %v688_v31 }
 0x46f   : > { %v684_v32 = vpop.permute.xlu0 %683 }
 0x470   : > { %686 = vst.msk [vmem:[#allocation2 + $0x8] sm:$0x1] %vm643_vm7, %v684_v32 }
 0x471   : > { %v3531_v34 = vld [vmem:[#allocation2 + $0x18] sm:$0xff]  ;;  %v696_v35 = vpop.permute.xlu1 %695 }
 0x472   : > { %698 = vst.msk [vmem:[#allocation2 + $0x21] sm:$0x1] %vm643_vm7, %v696_v35  ;;  %v1792_v36 = vmul.f32 %v1791_v33, %v3531_v34  ;;  %v1844_v40 = vmul.f32 %v1843_v38, %v3531_v34  ;;  %v1766_v44 = vmul.f32 %v1765_v42, %v3531_v34  ;;  %v1779_v48 = vmul.f32 %v1778_v46, %v3531_v34 }
 0x473   : > { %v692_v37 = vpop.permute.xlu0 %691  ;;  %v1818_v52 = vmul.f32 %v1817_v50, %v3531_v34  ;;  %v1831_v2 = vmul.f32 %v1830_v54, %v3531_v34  ;;  %v3582_v55 = vld [vmem:[#allocation2] sm:$0xff]  ;;  %v1981_v1 = vmul.f32 %v3596_v61, %v3531_v34  ;;  %v2061_v18 = vmul.f32 %v3620_v7, %v3531_v34 }
 0x474   : > { %694 = vst.msk [vmem:[#allocation2 + $0x9] sm:$0x1] %vm643_vm7, %v692_v37  ;;  %1796 = vrot.lane.b32.xlu0 %v1792_v36, %s3220_s13  ;;  %v898_v57 = vmul.f32 %v897_v56, %v3582_v55  ;;  %v911_v62 = vmul.f32 %v910_v59, %v3582_v55  ;;  %v924_v9 = vmul.f32 %v923_v3, %v3582_v55  ;;  %v3671_v35 = vstv %s2907_s8  ;;  %s3225_s8 = smov 126  }
 0x475   : > { %v704_v39 = vpop.permute.xlu1 %703  ;;  %v1987_v14 = vrot.slane %v1981_v1, 2  ;;  %v2067_v24 = vrot.slane %v2061_v18, 2  ;;  %v2221_v32 = vmul.f32 %v3654_v27, %v3531_v34  ;;  %v3743_v1 = vstv %s2889_s19  ;;  %s2837_s19 = sld [smem:[#allocation7 + $0x9]] }
 0x476   : > { %706 = vst.msk [vmem:[#allocation2 + $0x22] sm:$0x1] %vm643_vm7, %v704_v39 }
 0x477   : > { %v700_v41 = vpop.permute.xlu0 %699  ;;  %v2227_v39 = vrot.slane %v2221_v32, 3 }
 0x478   : > { %702 = vst.msk [vmem:[#allocation2 + $0xa] sm:$0x1] %vm643_vm7, %v700_v41  ;;  %1848 = vrot.lane.b32.xlu0 %v1844_v40, %s5667_s12  ;;  %v2301_v40 = vmul.f32 %v3671_v35, %v3531_v34 }
 0x479   : > { %v714_v43 = vpop.permute.xlu1 %713 }
 0x47a   : > { %716 = vst.msk [vmem:[#allocation2 + $0x23] sm:$0x1] %vm643_vm7, %v714_v43 }
 0x47b   : > { %v709_v45 = vpop.permute.xlu0 %708 }
 0x47c   : > { %711 = vst.msk [vmem:[#allocation2 + $0xb] sm:$0x1] %vm643_vm7, %v709_v45  ;;  %1770 = vrot.lane.b32.xlu0 %v1766_v44, %s3220_s13 }
 0x47d   : > { %v722_v47 = vpop.permute.xlu1 %721 }
 0x47e   : > { %724 = vst.msk [vmem:[#allocation2 + $0x24] sm:$0x1] %vm643_vm7, %v722_v47 }
 0x47f   : > { %v718_v49 = vpop.permute.xlu0 %717 }
 0x480   : > { %720 = vst.msk [vmem:[#allocation2 + $0xc] sm:$0x1] %vm643_vm7, %v718_v49  ;;  %1783 = vrot.lane.b32.xlu0 %v1779_v48, %s3220_s13  ;;  %v3705_v49 = vstv %s2919_s17  ;;  %s2835_s17 = sld [smem:[#allocation7 + $0x7]] }
 0x481   : > { %v730_v51 = vpop.permute.xlu1 %729 }
 0x482   : > { %732 = vst.msk [vmem:[#allocation2 + $0x25] sm:$0x1] %vm643_vm7, %v730_v51 }
 0x483   : > { %v726_v53 = vpop.permute.xlu0 %725 }
 0x484   : > { %728 = vst.msk [vmem:[#allocation2 + $0xd] sm:$0x1] %vm643_vm7, %v726_v53  ;;  %1822 = vrot.lane.b32.xlu0 %v1818_v52, %s5667_s12 }
 0x485   : > { %v738_v0 = vpop.permute.xlu1 %737 }
 0x486   : > { %740 = vst.msk [vmem:[#allocation2 + $0x26] sm:$0x1] %vm643_vm7, %v738_v0  ;;  %v2525_v0 = vmul.f32 %v3705_v49, %v3531_v34 }
 0x487   : > { %v734_v8 = vpop.permute.xlu0 %733 }
 0x488   : > { %736 = vst.msk [vmem:[#allocation2 + $0xe] sm:$0x1] %vm643_vm7, %v734_v8  ;;  %1835 = vrot.lane.b32.xlu0 %v1831_v2, %s5667_s12  ;;  %s2899_s12 = sld [smem:[#allocation7 + $0x47]]  ;;  %v3724_v8 = vstv %s2923_s29  ;;  %s2836_s29 = sld [smem:[#allocation7 + $0x8]] }
 0x489   : > { %v746_v10 = vpop.permute.xlu1 %745 }
 0x48a   : > { %748 = vst.msk [vmem:[#allocation2 + $0x27] sm:$0x1] %vm643_vm7, %v746_v10 }
 0x48b   : > { %v742_v58 = vpop.permute.xlu0 %741 }
 0x48c   : > { %744 = vst.msk [vmem:[#allocation2 + $0xf] sm:$0x1] %vm643_vm7, %v742_v58  ;;  %902 = vrot.lane.b32.xlu0 %v898_v57, %s5669_s7 }
 0x48d   : > { %v754_v60 = vpop.permute.xlu1 %753 }
 0x48e   : > { %756 = vst.msk [vmem:[#allocation2 + $0x28] sm:$0x1] %vm643_vm7, %v754_v60  ;;  %v3639_v21 = vstv %s2899_s12  ;;  %s2911_s12 = sld [smem:[#allocation7 + $0x53]] }
 0x48f   : > { %v750_v63 = vpop.permute.xlu0 %749  ;;  %v2141_v25 = vmul.f32 %v3639_v21, %v3531_v34 }
 0x490   : > { %752 = vst.msk [vmem:[#allocation2 + $0x10] sm:$0x1] %vm643_vm7, %v750_v63  ;;  %915 = vrot.lane.b32.xlu0 %v911_v62, %s5669_s7  ;;  %v2605_v62 = vmul.f32 %v3724_v8, %v3531_v34 }
 0x491   : > { %v3607_v4 = vld [vmem:[#allocation2 + $0x20] sm:$0xff]  ;;  %v762_v5 = vpop.permute.xlu1 %761  ;;  %v2147_v31 = vrot.slane %v2141_v25, 3 }
 0x492   : > { %764 = vst.msk [vmem:[#allocation2 + $0x29] sm:$0x1] %vm643_vm7, %v762_v5  ;;  %v1793_v11 = vmul.f32 %v1791_v33, %v3607_v4  ;;  %v3618_v6 = vmul.f32 %v3596_v61, %v3607_v4  ;;  %v3624_v13 = vmul.f32 %v3620_v7, %v3607_v4  ;;  %v1845_v19 = vmul.f32 %v1843_v38, %v3607_v4 }
 0x493   : > { %v758_v12 = vpop.permute.xlu0 %757  ;;  %v3644_v23 = vmul.f32 %v3639_v21, %v3607_v4  ;;  %v1767_v26 = vmul.f32 %v1765_v42, %v3607_v4  ;;  %v3662_v30 = vmul.f32 %v3654_v27, %v3607_v4  ;;  %v1780_v33 = vmul.f32 %v1778_v46, %v3607_v4 }
 0x494   : > { %760 = vst.msk [vmem:[#allocation2 + $0x11] sm:$0x1] %vm643_vm7, %v758_v12  ;;  %1798 = vrot.lane.b32.xlu1 %v1793_v11, %s3220_s13  ;;  %928 = vrot.lane.b32.xlu0 %v924_v9, %s5669_s7  ;;  %v1988_v15 = vrot.slane %v3618_v6, 2  ;;  %v2068_v22 = vrot.slane %v3624_v13, 2  ;;  %s3223_s7 = smov 127   ;;  %v3679_v38 = vmul.f32 %v3671_v35, %v3607_v4  ;;  %v1819_v41 = vmul.f32 %v1817_v50, %v3607_v4  ;;  %v3707_v50 = vld [vmem:[#allocation2 + $0x8] sm:$0xff] }
 0x495   : > { %v770_v16 = vpop.permute.xlu1 %769  ;;  %v2148_v29 = vrot.slane %v3644_v23, 3  ;;  %v2228_v37 = vrot.slane %v3662_v30, 3  ;;  %v3688_v42 = vstv %s2911_s12  ;;  %v2307_v46 = vrot.slane %v2301_v40, 4  ;;  %s5713_s12 = smov 124  }
 0x496   : > { %772 = vst.msk [vmem:[#allocation2 + $0x2a] sm:$0x1] %vm643_vm7, %v770_v16  ;;  %v1989_v20 = vsel %vm1084_vm8, %v1987_v14, %v1988_v15  ;;  %v2069_v28 = vsel %vm1084_vm8, %v2067_v24, %v2068_v22  ;;  %v2308_v44 = vrot.slane %v3679_v38, 4  ;;  %v3696_v45 = vmul.f32 %v3688_v42, %v3607_v4 }
 0x497   : > { %v766_v17 = vpop.permute.xlu0 %765  ;;  %v2149_v36 = vsel %vm1225_vm9, %v2147_v31, %v2148_v29  ;;  %v2229_v43 = vsel %vm1225_vm9, %v2227_v39, %v2228_v37  ;;  %v2381_v47 = vmul.f32 %v3688_v42, %v3531_v34  ;;  %v1832_v48 = vmul.f32 %v1830_v54, %v3607_v4 }
 0x498   : > { %768 = vst.msk [vmem:[#allocation2 + $0x12] sm:$0x1] %vm643_vm7, %v766_v17  ;;  %1850 = vrot.lane.b32.xlu1 %v1845_v19, %s5711_s16  ;;  %1992 = vrot.lane.b32.xlu0 %v1989_v20, %s5712_s11  ;;  %v2309_v51 = vsel %vm1366_vm10, %v2307_v46, %v2308_v44  ;;  %v2388_v52 = vrot.slane %v3696_v45, 4  ;;  %v3715_v53 = vmul.f32 %v3705_v49, %v3607_v4  ;;  %v3759_v16 = vstv %s2890_s14  ;;  %s2838_s14 = sld [smem:[#allocation7 + $0xa]] }
 0x499   : > { %v2387_v54 = vrot.slane %v2381_v47, 4  ;;  %v899_v2 = vmul.f32 %v897_v56, %v3707_v50  ;;  %v3732_v58 = vmul.f32 %v3724_v8, %v3607_v4  ;;  %v2531_v56 = vrot.slane %v2525_v0, 6 }
 0x49a   : > { %v2532_v57 = vrot.slane %v3715_v53, 6  ;;  %v912_v63 = vmul.f32 %v910_v59, %v3707_v50  ;;  %v3751_v9 = vmul.f32 %v3743_v1, %v3607_v4  ;;  %v2611_v59 = vrot.slane %v2605_v62, 6 }
 0x49b   : > { %v2389_v10 = vsel %vm1366_vm10, %v2387_v54, %v2388_v52  ;;  %v2612_v11 = vrot.slane %v3732_v58, 6  ;;  %v1941_v14 = vmul.f32 %v3743_v1, %v3531_v34  ;;  %v925_v18 = vmul.f32 %v923_v3, %v3707_v50 }
 0x49c   : > { %1772 = vrot.lane.b32.xlu1 %v1767_v26, %s3220_s13  ;;  %2072 = vrot.lane.b32.xlu0 %v2069_v28, %s3223_s7  ;;  %v2533_v5 = vsel %vm427_vm4, %v2531_v56, %v2532_v57  ;;  %v3766_v19 = vmul.f32 %v3759_v16, %v3607_v4  ;;  %v1948_v20 = vrot.slane %v3751_v9, 1  ;;  %v1961_v25 = vmul.f32 %v3759_v16, %v3531_v34 }
 0x49d   : > { %v3734_v60 = vld [vmem:[#allocation2 + $0x28] sm:$0x3f]  ;;  %v1947_v3 = vrot.slane %v1941_v14, 1  ;;  %v3778_v26 = vstv %s2893_s15  ;;  %v3816_v54 = vstv %s2897_s28  ;;  %s3226_s15 = smov 123   ;;  %s2840_s28 = sld [smem:[#allocation7 + $0xc]] }
 0x49e   : > { %v1983_v12 = vmul.f32 %v3596_v61, %v3734_v60  ;;  %v2613_v61 = vsel %vm427_vm4, %v2611_v59, %v2612_v11  ;;  %v2063_v24 = vmul.f32 %v3620_v7, %v3734_v60  ;;  %v1968_v28 = vrot.slane %v3766_v19, 1 }
 0x49f   : > { %v3783_v31 = vmul.f32 %v3778_v26, %v3607_v4  ;;  %v1949_v7 = vsel %vm943_vm11, %v1947_v3, %v1948_v20  ;;  %v1967_v39 = vrot.slane %v1961_v25, 1  ;;  %v2021_v40 = vmul.f32 %v3778_v26, %v3531_v34 }
 0x4a0   : > { %1785 = vrot.lane.b32.xlu1 %v1780_v33, %s3220_s13  ;;  %2152 = vrot.lane.b32.xlu0 %v2149_v36, %s3224_s26  ;;  %v1990_v17 = vrot.slane %v1983_v12, 2  ;;  %v2070_v33 = vrot.slane %v2063_v24, 2  ;;  %v2143_v36 = vmul.f32 %v3639_v21, %v3734_v60  ;;  %v2223_v47 = vmul.f32 %v3654_v27, %v3734_v60 }
 0x4a1   : > { %v3821_v13 = vmul.f32 %v3816_v54, %v3607_v4  ;;  %v2101_v62 = vmul.f32 %v3816_v54, %v3531_v34  ;;  %v2527_v24 = vmul.f32 %v3705_v49, %v3734_v60 }
 0x4a2   : > { %v1991_v32 = vsel %vm1084_vm8, %v1988_v15, %v1990_v17  ;;  %v1969_v15 = vsel %vm943_vm11, %v1967_v39, %v1968_v28  ;;  %v2071_v21 = vsel %vm1084_vm8, %v2068_v22, %v2070_v33  ;;  %v2150_v46 = vrot.slane %v2143_v36, 3 }
 0x4a3   : > { %v2107_v14 = vrot.slane %v2101_v62, 2  ;;  %v2607_v36 = vmul.f32 %v3724_v8, %v3734_v60  ;;  %v3930_v62 = vstv %s2840_s28  ;;  %s2846_s28 = sld [smem:[#allocation7 + $0x12]] }
 0x4a4   : > { %1824 = vrot.lane.b32.xlu1 %v1819_v41, %s5711_s16  ;;  %2232 = vrot.lane.b32.xlu0 %v2229_v43, %s3225_s8  ;;  %v3797_v41 = vstv %s2894_s18  ;;  %v2028_v43 = vrot.slane %v3783_v31, 2  ;;  %v2151_v27 = vsel %vm1225_vm9, %v2148_v29, %v2150_v46  ;;  %s2839_s18 = sld [smem:[#allocation7 + $0xb]]  ;;  %v3935_v58 = vmul.f32 %v3930_v62, %v3707_v50 }
 0x4a5   : > { %v3802_v6 = vmul.f32 %v3797_v41, %v3607_v4  ;;  %v2614_v46 = vrot.slane %v2607_v36, 6 }
 0x4a6   : > { %v1045_v9 = vrot.slane %v3935_v58, 1 }
 0x4a7   : > { %v2048_v0 = vrot.slane %v3802_v6, 2 }
 0x4a8   : > { %1837 = vrot.lane.b32.xlu1 %v1832_v48, %s5711_s16  ;;  %2312 = vrot.lane.b32.xlu0 %v2309_v51, %s3220_s13  ;;  %v2027_v48 = vrot.slane %v2021_v40, 2  ;;  %v2041_v51 = vmul.f32 %v3797_v41, %v3531_v34  ;;  %v2383_v34 = vmul.f32 %v3688_v42, %v3734_v60 }
 0x4aa   : > { %v2029_v22 = vsel %vm1084_vm8, %v2027_v48, %v2028_v43  ;;  %v2047_v56 = vrot.slane %v2041_v51, 2  ;;  %v2390_v17 = vrot.slane %v2383_v34, 4  ;;  %v2023_v34 = vmul.f32 %v3778_v26, %v3734_v60 }
 0x4ac   : > { %2392 = vrot.lane.b32.xlu0 %v2389_v10, %s5711_s16  ;;  %904 = vrot.lane.b32.xlu1 %v899_v2, %s5713_s12  ;;  %v2230_v2 = vrot.slane %v2223_v47, 3  ;;  %v2303_v10 = vmul.f32 %v3671_v35, %v3734_v60  ;;  %v2049_v29 = vsel %vm1084_vm8, %v2047_v56, %v2048_v0  ;;  %v2391_v49 = vsel %vm1366_vm10, %v2388_v52, %v2390_v17 }
 0x4ad   : > { %v1943_v47 = vmul.f32 %v3743_v1, %v3734_v60 }
 0x4ae   : > { %v2231_v35 = vsel %vm1225_vm9, %v2228_v37, %v2230_v2  ;;  %v2310_v12 = vrot.slane %v2303_v10, 4 }
 0x4af   : > { %v1950_v10 = vrot.slane %v1943_v47, 1 }
 0x4b0   : > { %2536 = vrot.lane.b32.xlu0 %v2533_v5, %s5712_s11  ;;  %917 = vrot.lane.b32.xlu1 %v912_v63, %s5713_s12  ;;  %v3835_v63 = vstv %s2835_s17  ;;  %v2108_v5 = vrot.slane %v3821_v13, 2  ;;  %v2311_v42 = vsel %vm1366_vm10, %v2308_v44, %v2310_v12  ;;  %s2841_s17 = sld [smem:[#allocation7 + $0xd]] }
 0x4b1   : > { %v3840_v23 = vmul.f32 %v3835_v63, %v3707_v50  ;;  %v937_v59 = vmul.f32 %v3835_v63, %v3582_v55 }
 0x4b2   : > { %v2109_v37 = vsel %vm1084_vm8, %v2107_v14, %v2108_v5  ;;  %v1038_v14 = vmul.f32 %v3930_v62, %v3582_v55 }
 0x4b3   : > { %v944_v3 = vrot.slane %v937_v59, 1 }
 0x4b4   : > { %2616 = vrot.lane.b32.xlu0 %v2613_v61, %s3223_s7  ;;  %930 = vrot.lane.b32.xlu1 %v925_v18, %s5713_s12  ;;  %v3854_v18 = vstv %s2836_s29  ;;  %v945_v61 = vrot.slane %v3840_v23, 1  ;;  %s2842_s29 = sld [smem:[#allocation7 + $0xe]] }
 0x4b5   : > { %v3859_v30 = vmul.f32 %v3854_v18, %v3707_v50  ;;  %v958_v25 = vmul.f32 %v3854_v18, %v3582_v55 }
 0x4b6   : > { %v946_v38 = vsel %vm943_vm11, %v944_v3, %v945_v61  ;;  %v1044_v3 = vrot.slane %v1038_v14, 1 }
 0x4b7   : > { %v965_v44 = vrot.slane %v3859_v30, 1  ;;  %v964_v39 = vrot.slane %v958_v25, 1 }
 0x4b8   : > { %1952 = vrot.lane.b32.xlu0 %v1949_v7, %s5713_s12  ;;  %1994 = vrot.lane.b32.xlu1 %v1991_v32, %s5712_s11  ;;  %v3877_v7 = vstv %s2837_s19  ;;  %v2534_v32 = vrot.slane %v2527_v24, 6  ;;  %s2843_s19 = sld [smem:[#allocation7 + $0xf]]  ;;  %v2043_v24 = vmul.f32 %v3797_v41, %v3734_v60  ;;  %v1046_v19 = vsel %vm943_vm11, %v1044_v3, %v1045_v9  ;;  %v3977_v41 = vld [vmem:[#allocation2 + $0x10] sm:$0x3f] }
 0x4b9   : > { %v3884_v33 = vmul.f32 %v3877_v7, %v3707_v50  ;;  %v978_v40 = vmul.f32 %v3877_v7, %v3582_v55  ;;  %v966_v45 = vsel %vm943_vm11, %v964_v39, %v965_v44  ;;  %v2103_v39 = vmul.f32 %v3816_v54, %v3734_v60 }
 0x4ba   : > { %v2535_v8 = vsel %vm427_vm4, %v2532_v57, %v2534_v32  ;;  %v1963_v57 = vmul.f32 %v3759_v16, %v3734_v60  ;;  %v2050_v36 = vrot.slane %v2043_v24, 2  ;;  %v980_v14 = vmul.f32 %v3877_v7, %v3977_v41 }
 0x4bb   : > { %v984_v48 = vrot.slane %v978_v40, 1  ;;  %v2110_v47 = vrot.slane %v2103_v39, 2 }
 0x4bc   : > { %1972 = vrot.lane.b32.xlu0 %v1969_v15, %s5713_s12  ;;  %2074 = vrot.lane.b32.xlu1 %v2071_v21, %s3223_s7  ;;  %v3892_v15 = vstv %s2838_s14  ;;  %v985_v21 = vrot.slane %v3884_v33, 1  ;;  %v1970_v12 = vrot.slane %v1963_v57, 1  ;;  %s2844_s14 = sld [smem:[#allocation7 + $0x10]]  ;;  %v2051_v54 = vsel %vm1084_vm8, %v2048_v0, %v2050_v36 }
 0x4bd   : > { %v3899_v52 = vmul.f32 %v3892_v15, %v3707_v50  ;;  %v998_v51 = vmul.f32 %v3892_v15, %v3582_v55 }
 0x4be   : > { %v986_v1 = vsel %vm943_vm11, %v984_v48, %v985_v21  ;;  %v1971_v26 = vsel %vm943_vm11, %v1968_v28, %v1970_v12 }
 0x4bf   : > { %v1005_v2 = vrot.slane %v3899_v52, 1  ;;  %v1004_v16 = vrot.slane %v998_v51, 1 }
 0x4c0   : > { %2032 = vrot.lane.b32.xlu0 %v2029_v22, %s3223_s7  ;;  %2154 = vrot.lane.b32.xlu1 %v2151_v27, %s3224_s26  ;;  %v3911_v22 = vstv %s2839_s18  ;;  %v2615_v27 = vsel %vm427_vm4, %v2612_v11, %v2614_v46  ;;  %s2845_s18 = sld [smem:[#allocation7 + $0x11]] }
 0x4c1   : > { %v3915_v53 = vmul.f32 %v3911_v22, %v3707_v50  ;;  %v1018_v56 = vmul.f32 %v3911_v22, %v3582_v55  ;;  %v1006_v11 = vsel %vm943_vm11, %v1004_v16, %v1005_v2 }
 0x4c2   : > { %v4008_v51 = vstv %s2844_s14  ;;  %s2850_s14 = sld [smem:[#allocation7 + $0x16]] }
 0x4c3   : > { %v1024_v59 = vrot.slane %v1018_v56, 1  ;;  %v4015_v0 = vmul.f32 %v4008_v51, %v3707_v50  ;;  %v960_v56 = vmul.f32 %v3854_v18, %v3977_v41 }
 0x4c4   : > { %2052 = vrot.lane.b32.xlu0 %v2049_v29, %s3223_s7  ;;  %2234 = vrot.lane.b32.xlu1 %v2231_v35, %s3225_s8  ;;  %v1025_v29 = vrot.slane %v3915_v53, 1  ;;  %v1951_v35 = vsel %vm943_vm11, %v1948_v20, %v1950_v10  ;;  %v3953_v20 = vstv %s2841_s17  ;;  %s2847_s17 = sld [smem:[#allocation7 + $0x13]] }
 0x4c5   : > { %v3960_v17 = vmul.f32 %v3953_v20, %v3707_v50  ;;  %v1058_v25 = vmul.f32 %v3953_v20, %v3582_v55 }
 0x4c6   : > { %v4035_v12 = vstv %s2845_s18  ;;  %s2851_s18 = sld [smem:[#allocation7 + $0x17]] }
 0x4c7   : > { %v1065_v32 = vrot.slane %v3960_v17, 1  ;;  %v1064_v40 = vrot.slane %v1058_v25, 1  ;;  %v987_v25 = vrot.slane %v980_v14, 1  ;;  %v1060_v14 = vmul.f32 %v3953_v20, %v3977_v41 }
 0x4c8   : > { %2112 = vrot.lane.b32.xlu0 %v2109_v37, %s3226_s15  ;;  %2314 = vrot.lane.b32.xlu1 %v2311_v42, %s3220_s13  ;;  %v1026_v37 = vsel %vm943_vm11, %v1024_v59, %v1025_v29  ;;  %v2030_v42 = vrot.slane %v2023_v34, 2  ;;  %v967_v34 = vrot.slane %v960_v56, 1  ;;  %v4042_v59 = vmul.f32 %v4035_v12, %v3707_v50 }
 0x4c9   : > { %v1066_v60 = vsel %vm943_vm11, %v1064_v40, %v1065_v32 }
 0x4ca   : > { %v968_v24 = vsel %vm943_vm11, %v965_v44, %v967_v34  ;;  %v1146_v3 = vrot.slane %v4042_v59, 2  ;;  %v4071_v39 = vstv %s2847_s17  ;;  %v1020_v44 = vmul.f32 %v3911_v22, %v3977_v41  ;;  %s3227_s17 = smov 122  }
 0x4cb   : > { %v4077_v30 = vmul.f32 %v4071_v39, %v3707_v50 }
 0x4cc   : > { %949 = vrot.lane.b32.xlu0 %v946_v38, %s5712_s11  ;;  %2394 = vrot.lane.b32.xlu1 %v2391_v49, %s5711_s16  ;;  %v3968_v38 = vstv %s2842_s29  ;;  %v2031_v49 = vsel %vm1084_vm8, %v2028_v43, %v2030_v42  ;;  %v939_v43 = vmul.f32 %v3835_v63, %v3977_v41  ;;  %v4050_v42 = vstv %s2846_s28  ;;  %s2848_s29 = sld [smem:[#allocation7 + $0x14]]  ;;  %s2852_s28 = sld [smem:[#allocation7 + $0x18]] }
 0x4cd   : > { %v3975_v28 = vmul.f32 %v3968_v38, %v3707_v50  ;;  %v4059_v7 = vmul.f32 %v4050_v42, %v3707_v50  ;;  %v1159_v36 = vmul.f32 %v4050_v42, %v3582_v55  ;;  %v1186_v33 = vrot.slane %v4077_v30, 2 }
 0x4ce   : > { %v947_v10 = vrot.slane %v939_v43, 1 }
 0x4cf   : > { %v1086_v46 = vrot.slane %v3975_v28, 2  ;;  %v1166_v43 = vrot.slane %v4059_v7, 2  ;;  %v1165_v22 = vrot.slane %v1159_v36, 2 }
 0x4d0   : > { %969 = vrot.lane.b32.xlu0 %v966_v45, %s3223_s7  ;;  %2538 = vrot.lane.b32.xlu1 %v2535_v8, %s5712_s11  ;;  %v1078_v45 = vmul.f32 %v3968_v38, %v3582_v55  ;;  %v3989_v8 = vstv %s2843_s19  ;;  %v948_v18 = vsel %vm943_vm11, %v945_v61, %v947_v10  ;;  %s2849_s19 = sld [smem:[#allocation7 + $0x15]]  ;;  %v1040_v10 = vmul.f32 %v3930_v62, %v3977_v41 }
 0x4d1   : > { %v3993_v31 = vmul.f32 %v3989_v8, %v3707_v50  ;;  %v1099_v48 = vmul.f32 %v3989_v8, %v3582_v55 }
 0x4d2   : > { %v1085_v63 = vrot.slane %v1078_v45, 2  ;;  %v988_v45 = vsel %vm943_vm11, %v985_v21, %v987_v25 }
 0x4d3   : > { %v1106_v6 = vrot.slane %v3993_v31, 2  ;;  %v1105_v16 = vrot.slane %v1099_v48, 2 }
 0x4d4   : > { %989 = vrot.lane.b32.xlu0 %v986_v1, %s3223_s7  ;;  %2618 = vrot.lane.b32.xlu1 %v2615_v27, %s3223_s7  ;;  %v1087_v1 = vsel %vm1084_vm8, %v1085_v63, %v1086_v46  ;;  %v2111_v27 = vsel %vm1084_vm8, %v2108_v5, %v2110_v47  ;;  %v1126_v5 = vrot.slane %v4015_v0, 2  ;;  %v4092_v47 = vstv %s2848_s29  ;;  %s2853_s29 = sld [smem:[#allocation7 + $0x19]] }
 0x4d5   : > { %v1107_v13 = vsel %vm1084_vm8, %v1105_v16, %v1106_v6  ;;  %v4099_v21 = vmul.f32 %v4092_v47, %v3707_v50  ;;  %v1167_v63 = vsel %vm1084_vm8, %v1165_v22, %v1166_v43  ;;  %v1199_v16 = vmul.f32 %v4092_v47, %v3582_v55 }
 0x4d8   : > { %1009 = vrot.lane.b32.xlu0 %v1006_v11, %s3223_s7  ;;  %1954 = vrot.lane.b32.xlu1 %v1951_v35, %s5713_s12  ;;  %v1119_v11 = vmul.f32 %v4008_v51, %v3582_v55 }
 0x4dc   : > { %1029 = vrot.lane.b32.xlu0 %v1026_v37, %s3223_s7  ;;  %1974 = vrot.lane.b32.xlu1 %v1971_v26, %s5713_s12  ;;  %v1125_v37 = vrot.slane %v1119_v11, 2  ;;  %v1139_v26 = vmul.f32 %v4035_v12, %v3582_v55 }
 0x4de   : > { %v1127_v61 = vsel %vm1084_vm8, %v1125_v37, %v1126_v5  ;;  %v1205_v37 = vrot.slane %v1199_v16, 2 }
 0x4e0   : > { %1049 = vrot.lane.b32.xlu0 %v1046_v19, %s3226_s15  ;;  %2034 = vrot.lane.b32.xlu1 %v2031_v49, %s3223_s7  ;;  %v1000_v19 = vmul.f32 %v3892_v15, %v3977_v41  ;;  %v1145_v49 = vrot.slane %v1139_v26, 2 }
 0x4e2   : > { %v1147_v15 = vsel %vm1084_vm8, %v1145_v49, %v1146_v3  ;;  %v1080_v49 = vmul.f32 %v3968_v38, %v3977_v41  ;;  %v1101_v38 = vmul.f32 %v3989_v8, %v3977_v41 }
 0x4e4   : > { %1069 = vrot.lane.b32.xlu0 %v1066_v60, %s3226_s15  ;;  %2054 = vrot.lane.b32.xlu1 %v2051_v54, %s3223_s7  ;;  %v1007_v60 = vrot.slane %v1000_v19, 1  ;;  %v1179_v54 = vmul.f32 %v4071_v39, %v3582_v55  ;;  %v1067_v19 = vrot.slane %v1060_v14, 1  ;;  %v1088_v22 = vrot.slane %v1080_v49, 2 }
 0x4e5   : > { %v1141_v49 = vmul.f32 %v4035_v12, %v3977_v41 }
 0x4e6   : > { %v4010_v57 = vpop.permute.xlu0 %1796  ;;  %v1185_v56 = vrot.slane %v1179_v54, 2  ;;  %v1089_v16 = vsel %vm1084_vm8, %v1086_v46, %v1088_v22 }
 0x4e7   : > { %5714 = vst [vmem:[#allocation12_spill] sm:$0xff] %v4010_v57 }
 0x4e8   : > { %1090 = vrot.lane.b32.xlu0 %v1087_v1, %s3224_s26  ;;  %2114 = vrot.lane.b32.xlu1 %v2111_v27, %s3226_s15  ;;  %v1008_v1 = vsel %vm943_vm11, %v1005_v2, %v1007_v60  ;;  %v1027_v27 = vrot.slane %v1020_v44, 1  ;;  %v1187_v52 = vsel %vm1084_vm8, %v1185_v56, %v1186_v33  ;;  %v1206_v2 = vrot.slane %v4099_v21, 2 }
 0x4e9   : > { %v1068_v60 = vsel %vm943_vm11, %v1065_v32, %v1067_v19 }
 0x4ea   : > { %v4029_v35 = vpop.permute.xlu0 %1848  ;;  %v1028_v62 = vsel %vm943_vm11, %v1025_v29, %v1027_v27  ;;  %v1207_v29 = vsel %vm1084_vm8, %v1205_v37, %v1206_v2 }
 0x4eb   : > { %5715 = vst [vmem:[#allocation13_spill] sm:$0xff] %v4029_v35 }
 0x4ec   : > { %1110 = vrot.lane.b32.xlu0 %v1107_v13, %s3224_s26  ;;  %951 = vrot.lane.b32.xlu1 %v948_v18, %s5712_s11  ;;  %v4119_v13 = vstv %s2849_s19  ;;  %v1047_v18 = vrot.slane %v1040_v10, 1  ;;  %s2854_s19 = sld [smem:[#allocation7 + $0x1a]] }
 0x4ed   : > { %v4126_v34 = vmul.f32 %v4119_v13, %v3707_v50  ;;  %v1219_v26 = vmul.f32 %v4119_v13, %v3582_v55 }
 0x4ee   : > { %v4052_v23 = vpop.permute.xlu0 %1770 }
 0x4ef   : > { %5716 = vst [vmem:[#allocation14_spill] sm:$0xff] %v4052_v23  ;;  %v1227_v25 = vrot.slane %v4126_v34, 3  ;;  %v1226_v36 = vrot.slane %v1219_v26, 3 }
 0x4f0   : > { %1130 = vrot.lane.b32.xlu0 %v1127_v61, %s3225_s8  ;;  %971 = vrot.lane.b32.xlu1 %v968_v24, %s3223_s7  ;;  %v4134_v61 = vstv %s2850_s14  ;;  %v1048_v24 = vsel %vm943_vm11, %v1045_v9, %v1047_v18  ;;  %s2855_s14 = sld [smem:[#allocation7 + $0x1b]] }
 0x4f1   : > { %v4143_v20 = vmul.f32 %v4134_v61, %v3707_v50  ;;  %v1240_v44 = vmul.f32 %v4134_v61, %v3582_v55 }
 0x4f2   : > { %v4073_v40 = vpop.permute.xlu0 %1783 }
 0x4f3   : > { %5717 = vst [vmem:[#allocation15_spill] sm:$0xff] %v4073_v40  ;;  %v1247_v54 = vrot.slane %v4143_v20, 3  ;;  %v1246_v8 = vrot.slane %v1240_v44, 3 }
 0x4f4   : > { %1150 = vrot.lane.b32.xlu0 %v1147_v15, %s3225_s8  ;;  %991 = vrot.lane.b32.xlu1 %v988_v45, %s3223_s7  ;;  %v4155_v15 = vstv %s2851_s18  ;;  %v1228_v45 = vsel %vm1225_vm9, %v1226_v36, %v1227_v25  ;;  %s2860_s18 = sld [smem:[#allocation7 + $0x20]] }
 0x4f5   : > { %v4161_v9 = vmul.f32 %v4155_v15, %v3707_v50  ;;  %v1248_v56 = vsel %vm1225_vm9, %v1246_v8, %v1247_v54  ;;  %v1161_v8 = vmul.f32 %v4050_v42, %v3977_v41  ;;  %v1181_v42 = vmul.f32 %v4071_v39, %v3977_v41 }
 0x4f6   : > { %v4094_v48 = vpop.permute.xlu0 %1822 }
 0x4f7   : > { %5718 = vst [vmem:[#allocation16_spill] sm:$0xff] %v4094_v48  ;;  %v1267_v17 = vrot.slane %v4161_v9, 3 }
 0x4f8   : > { %1170 = vrot.lane.b32.xlu0 %v1167_v63, %s3225_s8  ;;  %1011 = vrot.lane.b32.xlu1 %v1008_v1, %s3223_s7  ;;  %v1260_v63 = vmul.f32 %v4155_v15, %v3582_v55  ;;  %v4176_v1 = vstv %s2852_s28  ;;  %s2861_s28 = sld [smem:[#allocation7 + $0x21]] }
 0x4f9   : > { %v4185_v32 = vmul.f32 %v4176_v1, %v3707_v50  ;;  %v1280_v14 = vmul.f32 %v4176_v1, %v3582_v55 }
 0x4fa   : > { %v4113_v11 = vpop.permute.xlu0 %1835  ;;  %v1266_v18 = vrot.slane %v1260_v63, 3  ;;  %v1148_v63 = vrot.slane %v1141_v49, 2 }
 0x4fb   : > { %5719 = vst [vmem:[#allocation17_spill] sm:$0xff] %v4113_v11  ;;  %v5675_v46 = vrot.slane %v4185_v32, 3  ;;  %v1286_v36 = vrot.slane %v1280_v14, 3 }
 0x4fc   : > { %1190 = vrot.lane.b32.xlu0 %v1187_v52, %s3225_s8  ;;  %1031 = vrot.lane.b32.xlu1 %v1028_v62, %s3223_s7  ;;  %v1108_v52 = vrot.slane %v1101_v38, 2  ;;  %v1121_v62 = vmul.f32 %v4008_v51, %v3977_v41  ;;  %v1268_v28 = vsel %vm1225_vm9, %v1266_v18, %v1267_v17  ;;  %v4207_v51 = vstv %s2853_s29  ;;  %s2863_s29 = sld [smem:[#allocation7 + $0x23]] }
 0x4fd   : > { %v4214_v19 = vmul.f32 %v4207_v51, %v3707_v50  ;;  %v1300_v44 = vmul.f32 %v4207_v51, %v3582_v55  ;;  %v4222_v38 = vstv %s2854_s19  ;;  %v1149_v14 = vsel %vm1084_vm8, %v1146_v3, %v1148_v63  ;;  %s2867_s19 = sld [smem:[#allocation7 + $0x27]] }
 0x4fe   : > { %v4136_v53 = vpop.permute.xlu0 %902  ;;  %v4233_v12 = vmul.f32 %v4222_v38, %v3707_v50  ;;  %v4273_v3 = vstv %s2860_s18  ;;  %s2875_s18 = sld [smem:[#allocation7 + $0x2f]] }
 0x4ff   : > { %v5673_v22 = vrot.slane %v4214_v19, 3  ;;  %v4283_v63 = vmul.f32 %v4273_v3, %v3707_v50 }
 0x500   : > { %1210 = vrot.lane.b32.xlu0 %v1207_v29, %s3227_s17  ;;  %1051 = vrot.lane.b32.xlu1 %v1048_v24, %s3226_s15  ;;  %v1109_v29 = vsel %vm1084_vm8, %v1106_v6, %v1108_v52  ;;  %v1128_v24 = vrot.slane %v1121_v62, 2  ;;  %v4245_v52 = vstv %s2855_s14  ;;  %s2871_s14 = sld [smem:[#allocation7 + $0x2b]] }
 0x502   : > { %v4157_v58 = vpop.permute.xlu0 %915 }
 0x504   : > { %1231 = vrot.lane.b32.xlu0 %v1228_v45, %s3220_s13  ;;  %1071 = vrot.lane.b32.xlu1 %v1068_v60, %s3226_s15  ;;  %v1288_v45 = vsel %vm1225_vm9, %v1286_v36, %v5675_v46  ;;  %v1129_v60 = vsel %vm1084_vm8, %v1126_v5, %v1128_v24  ;;  %v4253_v5 = vmul.f32 %v4245_v52, %v3707_v50 }
 0x505   : > { %v1340_v24 = vmul.f32 %v4245_v52, %v3582_v55 }
 0x506   : > { %v4178_v27 = vpop.permute.xlu1 %1798  ;;  %v4180_v10 = vpop.permute.xlu0 %928  ;;  %v5671_v59 = vrot.slane %v4253_v5, 3 }
 0x507   : > { %5720 = vst [vmem:[#allocation18_spill] sm:$0xff] %v4178_v27 }
 0x508   : > { %1251 = vrot.lane.b32.xlu0 %v1248_v56, %s3220_s13  ;;  %1092 = vrot.lane.b32.xlu1 %v1089_v16, %s3224_s26  ;;  %v1306_v56 = vrot.slane %v1300_v44, 3  ;;  %v1320_v16 = vmul.f32 %v4222_v38, %v3582_v55  ;;  %v1188_v44 = vrot.slane %v1181_v42, 2 }
 0x50a   : > { %v4199_v37 = vpop.permute.xlu1 %1850  ;;  %v4201_v26 = vpop.permute.xlu0 %1992  ;;  %v1308_v18 = vsel %vm1225_vm9, %v1306_v56, %v5673_v22  ;;  %v1326_v39 = vrot.slane %v1320_v16, 3  ;;  %v1346_v56 = vrot.slane %v1340_v24, 3  ;;  %v1425_v16 = vmul.f32 %v4273_v3, %v3582_v55 }
 0x50b   : > { %5721 = vst [vmem:[#allocation19_spill] sm:$0xff] %v4199_v37  ;;  %5722 = vst [vmem:[#allocation20_spill] sm:$0xff] %v4201_v26  ;;  %v4850_v26 = vld [vmem:[#allocation2 + $0x10] sm:$0x3f] }
 0x50c   : > { %1271 = vrot.lane.b32.xlu0 %v1268_v28, %s3220_s13  ;;  %1112 = vrot.lane.b32.xlu1 %v1109_v29, %s3224_s26  ;;  %v5672_v28 = vrot.slane %v4233_v12, 3  ;;  %v1168_v29 = vrot.slane %v1161_v8, 2  ;;  %v1201_v8 = vmul.f32 %v4092_v47, %v3977_v41  ;;  %v1189_v47 = vsel %vm1084_vm8, %v1186_v33, %v1188_v44 }
 0x50d   : > { %v4314_v33 = vstv %s2863_s29  ;;  %s2901_s29 = sld [smem:[#allocation7 + $0x49]] }
 0x50e   : > { %v4224_v31 = vpop.permute.xlu1 %1772  ;;  %v4226_v6 = vpop.permute.xlu0 %2072 }
 0x50f   : > { %5723 = vst [vmem:[#allocation21_spill] sm:$0xff] %v4224_v31  ;;  %5724 = vst [vmem:[#allocation22_spill] sm:$0xff] %v4226_v6 }
 0x510   : > { %1291 = vrot.lane.b32.xlu0 %v1288_v45, %s5711_s16  ;;  %1132 = vrot.lane.b32.xlu1 %v1129_v60, %s3225_s8  ;;  %v1328_v45 = vsel %vm1225_vm9, %v1326_v39, %v5672_v28  ;;  %v1169_v60 = vsel %vm1084_vm8, %v1166_v43, %v1168_v29  ;;  %v1348_v43 = vsel %vm1225_vm9, %v1346_v56, %v5671_v59  ;;  %v1208_v29 = vrot.slane %v1201_v8, 2 }
 0x511   : > { %v1221_v39 = vmul.f32 %v4119_v13, %v3977_v41  ;;  %v4322_v8 = vmul.f32 %v4314_v33, %v3707_v50  ;;  %v1242_v13 = vmul.f32 %v4134_v61, %v3977_v41  ;;  %v1485_v61 = vmul.f32 %v4314_v33, %v3582_v55 }
 0x512   : > { %v4247_v62 = vpop.permute.xlu1 %1785  ;;  %v4249_v0 = vpop.permute.xlu0 %2152  ;;  %v4337_v28 = vstv %s2867_s19  ;;  %s2902_s19 = sld [smem:[#allocation7 + $0x4a]] }
 0x513   : > { %5725 = vst [vmem:[#allocation23_spill] sm:$0xff] %v4247_v62  ;;  %5726 = vst [vmem:[#allocation24_spill] sm:$0xff] %v4249_v0  ;;  %v4345_v21 = vmul.f32 %v4337_v28, %v3707_v50  ;;  %v4433_v62 = vstv %s2901_s29  ;;  %s2910_s29 = sld [smem:[#allocation7 + $0x52]] }
 0x514   : > { %1311 = vrot.lane.b32.xlu0 %v1308_v18, %s5711_s16  ;;  %1152 = vrot.lane.b32.xlu1 %v1149_v14, %s3225_s8  ;;  %v4301_v18 = vstv %s2861_s28  ;;  %v5674_v14 = vrot.slane %v4283_v63, 4  ;;  %s2898_s28 = sld [smem:[#allocation7 + $0x46]] }
 0x515   : > { %v4306_v24 = vmul.f32 %v4301_v18, %v3707_v50  ;;  %v1445_v30 = vmul.f32 %v4301_v18, %v3582_v55  ;;  %v5677_v34 = vrot.slane %v4345_v21, 5 }
 0x516   : > { %v4268_v49 = vpop.permute.xlu1 %1824  ;;  %v4270_v36 = vpop.permute.xlu0 %2232 }
 0x517   : > { %5727 = vst [vmem:[#allocation25_spill] sm:$0xff] %v4268_v49  ;;  %5728 = vst [vmem:[#allocation26_spill] sm:$0xff] %v4270_v36  ;;  %v1451_v59 = vrot.slane %v1445_v30, 4  ;;  %v5676_v30 = vrot.slane %v4322_v8, 5 }
 0x518   : > { %1331 = vrot.lane.b32.xlu0 %v1328_v45, %s5711_s16  ;;  %1172 = vrot.lane.b32.xlu1 %v1169_v60, %s3225_s8  ;;  %v1431_v45 = vrot.slane %v1425_v16, 4  ;;  %v1209_v16 = vsel %vm1084_vm8, %v1206_v2, %v1208_v29  ;;  %v1262_v2 = vmul.f32 %v4155_v15, %v3977_v41  ;;  %v1492_v15 = vrot.slane %v1485_v61, 5 }
 0x519   : > { %v1282_v61 = vmul.f32 %v4176_v1, %v3977_v41 }
 0x51a   : > { %v4291_v42 = vpop.permute.xlu1 %1837  ;;  %v4293_v7 = vpop.permute.xlu0 %2312  ;;  %v1433_v56 = vsel %vm1366_vm10, %v1431_v45, %v5674_v14 }
 0x51b   : > { %5729 = vst [vmem:[#allocation27_spill] sm:$0xff] %v4291_v42  ;;  %5730 = vst [vmem:[#allocation28_spill] sm:$0xff] %v4293_v7  ;;  %v4429_v42 = vld [vmem:[#allocation2 + $0x18] sm:$0xff] }
 0x51c   : > { %1351 = vrot.lane.b32.xlu0 %v1348_v43, %s5711_s16  ;;  %1192 = vrot.lane.b32.xlu1 %v1189_v47, %s3225_s8  ;;  %v5678_v43 = vrot.slane %v4306_v24, 4  ;;  %v1229_v47 = vrot.slane %v1221_v39, 3  ;;  %5739 = vst [vmem:[#allocation36_spill] sm:$0xff] %v4429_v42 }
 0x51e   : > { %v4316_v44 = vpop.permute.xlu1 %904  ;;  %v4318_v60 = vpop.permute.xlu0 %2392  ;;  %v1453_v29 = vsel %vm1366_vm10, %v1451_v59, %v5678_v43  ;;  %v1230_v39 = vsel %vm1225_vm9, %v1227_v25, %v1229_v47  ;;  %v1269_v25 = vrot.slane %v1262_v2, 3  ;;  %v4365_v59 = vstv %s2871_s14  ;;  %s2905_s14 = sld [smem:[#allocation7 + $0x4d]] }
 0x51f   : > { %5731 = vst [vmem:[#allocation29_spill] sm:$0xff] %v4318_v60  ;;  %v4375_v47 = vmul.f32 %v4365_v59, %v3707_v50 }
 0x520   : > { %1436 = vrot.lane.b32.xlu0 %v1433_v56, %s5713_s12  ;;  %1212 = vrot.lane.b32.xlu1 %v1209_v16, %s3227_s17  ;;  %v1249_v56 = vrot.slane %v1242_v13, 3  ;;  %v1566_v16 = vmul.f32 %v4337_v28, %v3582_v55  ;;  %v1494_v13 = vsel %vm1491_vm12, %v1492_v15, %v5676_v30  ;;  %v1270_v1 = vsel %vm1225_vm9, %v1267_v17, %v1269_v25 }
 0x521   : > { %v4395_v15 = vstv %s2875_s18  ;;  %v4408_v17 = vstv %s2898_s28  ;;  %s2906_s18 = sld [smem:[#allocation7 + $0x4e]]  ;;  %s2909_s28 = sld [smem:[#allocation7 + $0x51]] }
 0x522   : > { %v4339_v22 = vpop.permute.xlu1 %917  ;;  %v4341_v45 = vpop.permute.xlu0 %2536  ;;  %v1250_v55 = vsel %vm1225_vm9, %v1247_v54, %v1249_v56  ;;  %v1572_v2 = vrot.slane %v1566_v16, 5  ;;  %v5679_v16 = vrot.slane %v4375_v47, 6  ;;  %v4402_v30 = vmul.f32 %v4395_v15, %v3707_v50 }
 0x523   : > { %5732 = vst [vmem:[#allocation30_spill] sm:$0xff] %v4341_v45  ;;  %v4418_v50 = vmul.f32 %v4408_v17, %v3607_v4  ;;  %v2121_v4 = vmul.f32 %v4429_v42, %v4408_v17 }
 0x524   : > { %1456 = vrot.lane.b32.xlu0 %v1453_v29, %s5713_s12  ;;  %1233 = vrot.lane.b32.xlu1 %v1230_v39, %s3220_s13  ;;  %v4381_v29 = vld [vmem:[#allocation2] sm:$0xff]  ;;  %v1574_v56 = vsel %vm1491_vm12, %v1572_v2, %v5677_v34  ;;  %v5680_v43 = vrot.slane %v4402_v30, 6 }
 0x525   : > { %v1646_v39 = vmul.f32 %v4381_v29, %v4365_v59  ;;  %v1726_v9 = vmul.f32 %v4381_v29, %v4395_v15  ;;  %v5681_v49 = vrot.slane %v4418_v50, 3  ;;  %v2127_v31 = vrot.slane %v2121_v4, 3 }
 0x526   : > { %v4360_v14 = vpop.permute.xlu1 %930  ;;  %v4362_v46 = vpop.permute.xlu0 %2616  ;;  %v1427_v4 = vmul.f32 %v4273_v3, %v3977_v41 }
 0x527   : > { %5733 = vst [vmem:[#allocation31_spill] sm:$0xff] %v4362_v46  ;;  %v1652_v2 = vrot.slane %v1646_v39, 6 }
 0x528   : > { %1497 = vrot.lane.b32.xlu0 %v1494_v13, %s5712_s11  ;;  %1253 = vrot.lane.b32.xlu1 %v1250_v55, %s3220_s13  ;;  %v1289_v13 = vrot.slane %v1282_v61, 3  ;;  %v1302_v55 = vmul.f32 %v4207_v51, %v3977_v41  ;;  %v1322_v51 = vmul.f32 %v4222_v38, %v3977_v41  ;;  %v1732_v38 = vrot.slane %v1726_v9, 6 }
 0x529   : > { %v1654_v39 = vsel %vm427_vm4, %v1652_v2, %v5679_v16  ;;  %v5742_v9 = vrot.slane %v4214_v19, 3 }
 0x52a   : > { %v4385_v20 = vpop.permute.xlu1 %1994  ;;  %v4387_v54 = vpop.permute.xlu0 %1952  ;;  %v1309_v34 = vrot.slane %v1302_v55, 3  ;;  %v4441_v55 = vld [vmem:[#allocation2 + $0x20] sm:$0xff]  ;;  %v1329_v16 = vrot.slane %v1322_v51, 3  ;;  %v5745_v51 = vrot.slane %v4233_v12, 3 }
 0x52b   : > { %5734 = vst [vmem:[#allocation32_spill] sm:$0xff] %v4385_v20  ;;  %5735 = vst [vmem:[#allocation33_spill] sm:$0xff] %v4387_v54 }
 0x52c   : > { %1577 = vrot.lane.b32.xlu0 %v1574_v56, %s3223_s7  ;;  %1273 = vrot.lane.b32.xlu1 %v1270_v1, %s3220_s13  ;;  %v5738_v56 = vrot.slane %v4185_v32, 3 }
 0x52e   : > { %v4410_v25 = vpop.permute.xlu1 %2074  ;;  %v4412_v61 = vpop.permute.xlu0 %1972  ;;  %v1290_v1 = vsel %vm1225_vm9, %v5738_v56, %v1289_v13  ;;  %v1342_v13 = vmul.f32 %v4245_v52, %v3977_v41  ;;  %v1310_v56 = vsel %vm1225_vm9, %v5742_v9, %v1309_v34  ;;  %v2181_v52 = vmul.f32 %v4429_v42, %v4433_v62 }
 0x52f   : > { %5736 = vst [vmem:[#allocation34_spill] sm:$0xff] %v4410_v25  ;;  %5737 = vst [vmem:[#allocation35_spill] sm:$0xff] %v4412_v61 }
 0x530   : > { %1657 = vrot.lane.b32.xlu0 %v1654_v39, %s3224_s26  ;;  %1293 = vrot.lane.b32.xlu1 %v1290_v1, %s5711_s16  ;;  %v4445_v39 = vmul.f32 %v4441_v55, %v4433_v62  ;;  %v1734_v1 = vsel %vm427_vm4, %v1732_v38, %v5680_v43  ;;  %v1349_v34 = vrot.slane %v1342_v13, 3  ;;  %v4463_v38 = vstv %s2902_s19  ;;  %s2862_s19 = sld [smem:[#allocation7 + $0x22]] }
 0x531   : > { %v4475_v43 = vmul.f32 %v4441_v55, %v4463_v38  ;;  %v2187_v13 = vrot.slane %v2181_v52, 3  ;;  %v2201_v12 = vmul.f32 %v4429_v42, %v4463_v38 }
 0x532   : > { %v4435_v2 = vpop.permute.xlu1 %2154  ;;  %v4437_v32 = vpop.permute.xlu0 %2032  ;;  %v5682_v9 = vrot.slane %v4445_v39, 3 }
 0x533   : > { %5740 = vst [vmem:[#allocation37_spill] sm:$0xff] %v4435_v2  ;;  %5741 = vst [vmem:[#allocation38_spill] sm:$0xff] %v4437_v32  ;;  %v5683_v52 = vrot.slane %v4475_v43, 3  ;;  %v5771_v25 = vrot.slane %v4475_v43, 3 }
 0x534   : > { %1313 = vrot.lane.b32.xlu1 %v1310_v56, %s5711_s16  ;;  %1737 = vrot.lane.b32.xlu0 %v1734_v1, %s3225_s8  ;;  %v1330_v56 = vsel %vm1225_vm9, %v5745_v51, %v1329_v16  ;;  %v2129_v1 = vsel %vm1225_vm9, %v2127_v31, %v5681_v49  ;;  %v5748_v31 = vrot.slane %v4253_v5, 3  ;;  %v2189_v49 = vsel %vm1225_vm9, %v2187_v13, %v5682_v9 }
 0x535   : > { %v2207_v5 = vrot.slane %v2201_v12, 3  ;;  %v4504_v13 = vstv %s2906_s18  ;;  %s2866_s18 = sld [smem:[#allocation7 + $0x26]] }
 0x536   : > { %v4458_v61 = vpop.permute.xlu1 %2234  ;;  %v4460_v19 = vpop.permute.xlu0 %2052  ;;  %v1350_v3 = vsel %vm1225_vm9, %v5748_v31, %v1349_v34  ;;  %v4514_v9 = vmul.f32 %v4441_v55, %v4504_v13  ;;  %v2281_v54 = vmul.f32 %v4429_v42, %v4504_v13  ;;  %v4580_v48 = vstv %s2862_s19  ;;  %s2874_s19 = sld [smem:[#allocation7 + $0x2e]] }
 0x537   : > { %5743 = vst [vmem:[#allocation39_spill] sm:$0xff] %v4458_v61  ;;  %5744 = vst [vmem:[#allocation40_spill] sm:$0xff] %v4460_v19  ;;  %v4491_v19 = vstv %s2905_s14  ;;  %s2865_s14 = sld [smem:[#allocation7 + $0x25]] }
 0x538   : > { %1333 = vrot.lane.b32.xlu1 %v1330_v56, %s5711_s16  ;;  %2132 = vrot.lane.b32.xlu0 %v2129_v1, %s3224_s26  ;;  %v1434_v56 = vrot.slane %v1427_v4, 4  ;;  %v1447_v1 = vmul.f32 %v4301_v18, %v3977_v41  ;;  %v2261_v34 = vmul.f32 %v4429_v42, %v4491_v19  ;;  %v1487_v18 = vmul.f32 %v4314_v33, %v3977_v41 }
 0x53a   : > { %v4481_v16 = vpop.permute.xlu1 %2314  ;;  %v4483_v51 = vpop.permute.xlu0 %2112  ;;  %v1454_v32 = vrot.slane %v1447_v1, 4  ;;  %v2267_v33 = vrot.slane %v2261_v34, 4  ;;  %v5752_v1 = vrot.slane %v4306_v24, 4 }
 0x53b   : > { %5746 = vst [vmem:[#allocation41_spill] sm:$0xff] %v4481_v16  ;;  %5747 = vst [vmem:[#allocation42_spill] sm:$0xff] %v4483_v51  ;;  %v4498_v51 = vmul.f32 %v4441_v55, %v4491_v19 }
 0x53c   : > { %1353 = vrot.lane.b32.xlu1 %v1350_v3, %s5711_s16  ;;  %2192 = vrot.lane.b32.xlu0 %v2189_v49, %s3225_s8  ;;  %v5750_v49 = vrot.slane %v4283_v63, 4  ;;  %v2209_v3 = vsel %vm1225_vm9, %v2207_v5, %v5683_v52  ;;  %v4533_v5 = vstv %s2909_s28  ;;  %s2870_s28 = sld [smem:[#allocation7 + $0x2a]] }
 0x53d   : > { %v5684_v11 = vrot.slane %v4498_v51, 4  ;;  %v4544_v52 = vmul.f32 %v4441_v55, %v4533_v5  ;;  %v2341_v24 = vmul.f32 %v4429_v42, %v4533_v5  ;;  %v5773_v20 = vrot.slane %v4498_v51, 4 }
 0x53e   : > { %v4506_v4 = vpop.permute.xlu1 %2394  ;;  %v4508_v31 = vpop.permute.xlu0 %949  ;;  %v1435_v12 = vsel %vm1366_vm10, %v5750_v49, %v1434_v56  ;;  %v1495_v56 = vrot.slane %v1487_v18, 5  ;;  %v1568_v49 = vmul.f32 %v4337_v28, %v3977_v41  ;;  %v2287_v28 = vrot.slane %v2281_v54, 4 }
 0x53f   : > { %5749 = vst [vmem:[#allocation43_spill] sm:$0xff] %v4506_v4  ;;  %v2269_v34 = vsel %vm1366_vm10, %v2267_v33, %v5684_v11  ;;  %v4556_v11 = vstv %s2910_s29  ;;  %v5755_v54 = vrot.slane %v4514_v9, 4  ;;  %s2873_s29 = sld [smem:[#allocation7 + $0x2d]] }
 0x540   : > { %1438 = vrot.lane.b32.xlu1 %v1435_v12, %s5713_s12  ;;  %2212 = vrot.lane.b32.xlu0 %v2209_v3, %s3225_s8  ;;  %v1455_v12 = vsel %vm1366_vm10, %v5752_v1, %v1454_v32  ;;  %v1575_v33 = vrot.slane %v1568_v49, 5  ;;  %v1648_v1 = vmul.f32 %v4365_v59, %v3977_v41  ;;  %v5754_v3 = vrot.slane %v4322_v8, 5 }
 0x541   : > { %v2347_v59 = vrot.slane %v2341_v24, 4  ;;  %v2361_v8 = vmul.f32 %v4429_v42, %v4556_v11 }
 0x542   : > { %v4527_v40 = vpop.permute.xlu1 %2538  ;;  %v4529_v63 = vpop.permute.xlu0 %969 }
 0x543   : > { %5751 = vst [vmem:[#allocation44_spill] sm:$0xff] %v4527_v40  ;;  %v1728_v40 = vmul.f32 %v4395_v15, %v3977_v41  ;;  %v4604_v15 = vld [vmem:[#allocation2 + $0x28] sm:$0x3f] }
 0x544   : > { %1458 = vrot.lane.b32.xlu1 %v1455_v12, %s5713_s12  ;;  %2272 = vrot.lane.b32.xlu0 %v2269_v34, %s3220_s13  ;;  %v1496_v12 = vsel %vm1491_vm12, %v5754_v3, %v1495_v56  ;;  %v2289_v34 = vsel %vm1366_vm10, %v2287_v28, %v5755_v54  ;;  %v5757_v3 = vrot.slane %v4345_v21, 5  ;;  %v1655_v54 = vrot.slane %v1648_v1, 6 }
 0x545   : > { %v1465_v1 = vmul.f32 %v4381_v29, %v4580_v48  ;;  %v2123_v24 = vmul.f32 %v4604_v15, %v4408_v17  ;;  %v1735_v4 = vrot.slane %v1728_v40, 6  ;;  %v5763_v40 = vrot.slane %v4402_v30, 6 }
 0x546   : > { %v4550_v32 = vpop.permute.xlu1 %2618  ;;  %v4552_v18 = vpop.permute.xlu0 %989  ;;  %v1576_v28 = vsel %vm1491_vm12, %v5757_v3, %v1575_v33  ;;  %v2367_v33 = vrot.slane %v2361_v8, 4  ;;  %v5760_v8 = vrot.slane %v4375_v47, 6  ;;  %v2363_v45 = vmul.f32 %v4604_v15, %v4556_v11 }
 0x547   : > { %5753 = vst [vmem:[#allocation45_spill] sm:$0xff] %v4550_v32  ;;  %v4567_v32 = vmul.f32 %v4441_v55, %v4556_v11  ;;  %v1471_v17 = vrot.slane %v1465_v1, 4 }
 0x548   : > { %1499 = vrot.lane.b32.xlu1 %v1496_v12, %s5712_s11  ;;  %2292 = vrot.lane.b32.xlu0 %v2289_v34, %s3220_s13  ;;  %v5758_v12 = vrot.slane %v4544_v52, 4  ;;  %s2869_s11 = sld [smem:[#allocation7 + $0x29]] }
 0x549   : > { %v5761_v23 = vrot.slane %v4567_v32, 4 }
 0x54a   : > { %v4573_v49 = vpop.permute.xlu1 %1954  ;;  %v4575_v56 = vpop.permute.xlu0 %1009  ;;  %v2349_v34 = vsel %vm1366_vm10, %v2347_v59, %v5758_v12  ;;  %v4598_v59 = vstv %s2865_s14  ;;  %s2917_s14 = sld [smem:[#allocation7 + $0x59]] }
 0x54b   : > { %5756 = vst [vmem:[#allocation46_spill] sm:$0xff] %v4573_v49  ;;  %v4588_v49 = vld [vmem:[#allocation2 + $0x8] sm:$0xff]  ;;  %v1526_v61 = vmul.f32 %v4381_v29, %v4598_v59 }
 0x54c   : > { %v4592_v21 = vmul.f32 %v4588_v49, %v4580_v48  ;;  %1579 = vrot.lane.b32.xlu1 %v1576_v28, %s3223_s7  ;;  %2352 = vrot.lane.b32.xlu0 %v2349_v34, %s5711_s16  ;;  %v4610_v28 = vmul.f32 %v4588_v49, %v4598_v59  ;;  %v1656_v34 = vsel %vm427_vm4, %v5760_v8, %v1655_v54  ;;  %v2130_v54 = vrot.slane %v2123_v24, 3 }
 0x54d   : > { %v2183_v8 = vmul.f32 %v4604_v15, %v4433_v62  ;;  %v1532_v62 = vrot.slane %v1526_v61, 5  ;;  %v4678_v61 = vstv %s2870_s28  ;;  %s4784_s28 = sld [smem:[#allocation7 + $0x1]] }
 0x54e   : > { %v4600_v3 = vpop.permute.xlu1 %1974  ;;  %v4602_v12 = vpop.permute.xlu0 %1029  ;;  %v5685_v16 = vrot.slane %v4592_v21, 4 }
 0x54f   : > { %5759 = vst [vmem:[#allocation47_spill] sm:$0xff] %v4600_v3  ;;  %v2369_v3 = vsel %vm1366_vm10, %v2367_v33, %v5761_v23  ;;  %v4629_v23 = vstv %s2866_s18  ;;  %v1736_v33 = vsel %vm427_vm4, %v5763_v40, %v1735_v4  ;;  %s2918_s18 = sld [smem:[#allocation7 + $0x5a]] }
 0x550   : > { %1659 = vrot.lane.b32.xlu1 %v1656_v34, %s3224_s26  ;;  %2372 = vrot.lane.b32.xlu0 %v2369_v3, %s5711_s16  ;;  %v1473_v1 = vsel %vm1366_vm10, %v1471_v17, %v5685_v16  ;;  %v4640_v34 = vmul.f32 %v4588_v49, %v4629_v23  ;;  %v1546_v30 = vmul.f32 %v4381_v29, %v4629_v23  ;;  %v5765_v17 = vrot.slane %v4418_v50, 3 }
 0x551   : > { %v2190_v16 = vrot.slane %v2183_v8, 3  ;;  %v4653_v3 = vstv %s2869_s11  ;;  %v4745_v27 = vstv %s2917_s14  ;;  %s2921_s11 = sld [smem:[#allocation7 + $0x5d]]  ;;  %s4819_s14 = sld [smem:[#allocation7 + $0x24]] }
 0x552   : > { %v4623_v2 = vpop.permute.xlu1 %2034  ;;  %v4625_v47 = vpop.permute.xlu0 %1049  ;;  %v2131_v40 = vsel %vm1225_vm9, %v5765_v17, %v2130_v54  ;;  %v1552_v50 = vrot.slane %v1546_v30, 5  ;;  %v1606_v54 = vmul.f32 %v4381_v29, %v4653_v3  ;;  %v5768_v17 = vrot.slane %v4445_v39, 3 }
 0x553   : > { %5762 = vst [vmem:[#allocation48_spill] sm:$0xff] %v4623_v2  ;;  %v2203_v2 = vmul.f32 %v4604_v15, %v4463_v38  ;;  %v4755_v60 = vmul.f32 %v4441_v55, %v4745_v27  ;;  %v5787_v35 = vrot.slane %v4640_v34, 5 }
 0x554   : > { %1739 = vrot.lane.b32.xlu1 %v1736_v33, %s3225_s8  ;;  %1476 = vrot.lane.b32.xlu0 %v1473_v1, %s5713_s12  ;;  %v5766_v33 = vrot.slane %v4610_v28, 5  ;;  %v2191_v38 = vsel %vm1225_vm9, %v5768_v17, %v2190_v16  ;;  %v1612_v39 = vrot.slane %v1606_v54, 5 }
 0x555   : > { %v5686_v7 = vrot.slane %v4755_v60, 5 }
 0x556   : > { %v4646_v24 = vpop.permute.xlu1 %2054  ;;  %v4648_v4 = vpop.permute.xlu0 %1069  ;;  %v1534_v1 = vsel %vm1491_vm12, %v1532_v62, %v5766_v33  ;;  %v2263_v33 = vmul.f32 %v4604_v15, %v4491_v19  ;;  %v1626_v19 = vmul.f32 %v4381_v29, %v4678_v61 }
 0x557   : > { %5764 = vst [vmem:[#allocation49_spill] sm:$0xff] %v4646_v24  ;;  %v4663_v24 = vmul.f32 %v4588_v49, %v4653_v3 }
 0x558   : > { %2134 = vrot.lane.b32.xlu1 %v2131_v40, %s3224_s26  ;;  %1537 = vrot.lane.b32.xlu0 %v1534_v1, %s3223_s7  ;;  %v5769_v40 = vrot.slane %v4640_v34, 5  ;;  %v2210_v1 = vrot.slane %v2203_v2, 3  ;;  %v2283_v2 = vmul.f32 %v4604_v15, %v4504_v13  ;;  %v1632_v13 = vrot.slane %v1626_v19, 6 }
 0x559   : > { %v5772_v54 = vrot.slane %v4663_v24, 5 }
 0x55a   : > { %v4669_v8 = vpop.permute.xlu1 %2114  ;;  %v4671_v62 = vpop.permute.xlu0 %1090  ;;  %v1554_v30 = vsel %vm1491_vm12, %v1552_v50, %v5769_v40  ;;  %v2270_v50 = vrot.slane %v2263_v33, 4  ;;  %v4698_v40 = vstv %s2873_s29  ;;  %s2925_s29 = sld [smem:[#allocation7 + $0x61]] }
 0x55b   : > { %5767 = vst [vmem:[#allocation50_spill] sm:$0xff] %v4669_v8  ;;  %v4686_v8 = vmul.f32 %v4588_v49, %v4678_v61  ;;  %v4709_v37 = vmul.f32 %v4588_v49, %v4698_v40  ;;  %v1686_v43 = vmul.f32 %v4381_v29, %v4698_v40 }
 0x55c   : > { %2194 = vrot.lane.b32.xlu1 %v2191_v38, %s3225_s8  ;;  %1557 = vrot.lane.b32.xlu0 %v1554_v30, %s3223_s7  ;;  %v2211_v38 = vsel %vm1225_vm9, %v5771_v25, %v2210_v1  ;;  %v1614_v30 = vsel %vm1491_vm12, %v1612_v39, %v5772_v54  ;;  %v2290_v1 = vrot.slane %v2283_v2, 4  ;;  %v2343_v39 = vmul.f32 %v4604_v15, %v4533_v5 }
 0x55d   : > { %v4721_v54 = vstv %s2874_s19  ;;  %v5774_v19 = vrot.slane %v4686_v8, 6  ;;  %v1692_v5 = vrot.slane %v1686_v43, 6  ;;  %v4770_v43 = vstv %s2918_s18  ;;  %s4807_s19 = sld [smem:[#allocation7 + $0x2]]  ;;  %s4836_s18 = sld [smem:[#allocation7]] }
 0x55e   : > { %v4692_v16 = vpop.permute.xlu1 %951  ;;  %v4694_v17 = vpop.permute.xlu0 %1110  ;;  %v4732_v46 = vmul.f32 %v4588_v49, %v4721_v54  ;;  %v1706_v51 = vmul.f32 %v4381_v29, %v4721_v54  ;;  %v4778_v36 = vmul.f32 %v4441_v55, %v4770_v43 }
 0x55f   : > { %5770 = vst [vmem:[#allocation51_spill] sm:$0xff] %v4692_v16 }
 0x560   : > { %2214 = vrot.lane.b32.xlu1 %v2211_v38, %s3225_s8  ;;  %1617 = vrot.lane.b32.xlu0 %v1614_v30, %s3226_s15  ;;  %v2271_v38 = vsel %vm1366_vm10, %v5773_v20, %v2270_v50  ;;  %v1634_v30 = vsel %vm427_vm4, %v1632_v13, %v5774_v19  ;;  %v5775_v50 = vrot.slane %v4514_v9, 4  ;;  %v2350_v19 = vrot.slane %v2343_v39, 4 }
 0x561   : > { %v1712_v9 = vrot.slane %v1706_v51, 6  ;;  %v5687_v0 = vrot.slane %v4778_v36, 5 }
 0x562   : > { %v4715_v33 = vpop.permute.xlu1 %971  ;;  %v4717_v25 = vpop.permute.xlu0 %1130  ;;  %v2291_v13 = vsel %vm1366_vm10, %v5775_v50, %v2290_v1  ;;  %v2485_v1 = vmul.f32 %v4429_v42, %v4745_v27  ;;  %v5777_v50 = vrot.slane %v4544_v52, 4 }
 0x564   : > { %2274 = vrot.lane.b32.xlu1 %v2271_v38, %s3220_s13  ;;  %1637 = vrot.lane.b32.xlu0 %v1634_v30, %s3224_s26  ;;  %v5776_v38 = vrot.slane %v4709_v37, 6  ;;  %v2351_v11 = vsel %vm1366_vm10, %v5777_v50, %v2350_v19  ;;  %v2491_v52 = vrot.slane %v2485_v1, 5  ;;  %v1528_v50 = vmul.f32 %v4598_v59, %v3977_v41 }
 0x566   : > { %v4738_v2 = vpop.permute.xlu1 %991  ;;  %v4740_v20 = vpop.permute.xlu0 %1150  ;;  %v1694_v30 = vsel %vm427_vm4, %v1692_v5, %v5776_v38  ;;  %v1467_v38 = vmul.f32 %v4580_v48, %v3977_v41  ;;  %v2505_v48 = vmul.f32 %v4429_v42, %v4770_v43 }
 0x568   : > { %2294 = vrot.lane.b32.xlu1 %v2291_v13, %s3220_s13  ;;  %1697 = vrot.lane.b32.xlu0 %v1694_v30, %s3225_s8  ;;  %s2922_s13 = sld [smem:[#allocation7 + $0x5e]]  ;;  %v5778_v13 = vrot.slane %v4732_v46, 6  ;;  %v2370_v30 = vrot.slane %v2363_v45, 4  ;;  %v1474_v45 = vrot.slane %v1467_v38, 4  ;;  %v2511_v59 = vrot.slane %v2505_v48, 5 }
 0x56a   : > { %v4761_v39 = vpop.permute.xlu1 %1011  ;;  %v4763_v5 = vpop.permute.xlu0 %1170  ;;  %v1714_v51 = vsel %vm427_vm4, %v1712_v9, %v5778_v13  ;;  %v4792_v13 = vstv %s2921_s11  ;;  %s4899_s11 = sld [smem:[#allocation7 + $0x1c]] }
 0x56c   : > { %2354 = vrot.lane.b32.xlu1 %v2351_v11, %s5711_s16  ;;  %1717 = vrot.lane.b32.xlu0 %v1714_v51, %s3225_s8  ;;  %v5780_v11 = vrot.slane %v4567_v32, 4  ;;  %v2493_v51 = vsel %vm1491_vm12, %v2491_v52, %v5686_v7  ;;  %v2565_v32 = vmul.f32 %v4429_v42, %v4792_v13  ;;  %v1535_v52 = vrot.slane %v1528_v50, 5 }
 0x56e   : > { %v4786_v19 = vpop.permute.xlu1 %1031  ;;  %v4788_v9 = vpop.permute.xlu0 %1190  ;;  %v2371_v1 = vsel %vm1366_vm10, %v5780_v11, %v2370_v30  ;;  %v1548_v11 = vmul.f32 %v4629_v23, %v3977_v41  ;;  %v4817_v7 = vstv %s2922_s13  ;;  %v2571_v41 = vrot.slane %v2565_v32, 6  ;;  %s2857_s13 = sld [smem:[#allocation7 + $0x1d]] }
 0x56f   : > { %5779 = vst [vmem:[#allocation52_spill] sm:$0xff] %v4786_v19  ;;  %v4803_v19 = vmul.f32 %v4441_v55, %v4792_v13  ;;  %v4830_v50 = vmul.f32 %v4441_v55, %v4817_v7  ;;  %v1608_v23 = vmul.f32 %v4850_v26, %v4653_v3 }
 0x570   : > { %2374 = vrot.lane.b32.xlu1 %v2371_v1, %s5711_s16  ;;  %2496 = vrot.lane.b32.xlu0 %v2493_v51, %s5713_s12  ;;  %v5782_v1 = vrot.slane %v4592_v21, 4  ;;  %v2513_v51 = vsel %vm1491_vm12, %v2511_v59, %v5687_v0  ;;  %v2585_v21 = vmul.f32 %v4429_v42, %v4817_v7  ;;  %v1555_v6 = vrot.slane %v1548_v11, 5 }
 0x571   : > { %v5784_v32 = vrot.slane %v4803_v19, 6 }
 0x572   : > { %v4811_v38 = vpop.permute.xlu1 %1051  ;;  %v4813_v30 = vpop.permute.xlu0 %1210  ;;  %v1475_v48 = vsel %vm1366_vm10, %v5782_v1, %v1474_v45  ;;  %v5783_v1 = vrot.slane %v4610_v28, 5  ;;  %v2591_v11 = vrot.slane %v2585_v21, 6  ;;  %v1556_v57 = vsel %vm1491_vm12, %v5787_v35, %v1555_v6 }
 0x573   : > { %5781 = vst [vmem:[#allocation53_spill] sm:$0xff] %v4811_v38  ;;  %v5788_v21 = vrot.slane %v4830_v50, 6  ;;  %v1615_v38 = vrot.slane %v1608_v23, 5 }
 0x574   : > { %1478 = vrot.lane.b32.xlu1 %v1475_v48, %s5713_s12  ;;  %2516 = vrot.lane.b32.xlu0 %v2513_v51, %s5713_s12  ;;  %v1536_v0 = vsel %vm1491_vm12, %v5783_v1, %v1535_v52  ;;  %v4844_v48 = vstv %s2925_s29  ;;  %v2573_v51 = vsel %vm427_vm4, %v2571_v41, %v5784_v32  ;;  %v5785_v1 = vstv %s4784_s28  ;;  %s4929_s29 = sld [smem:[#allocation7 + $0x3]] }
 0x575   : > { %v4856_v28 = vmul.f32 %v4441_v55, %v4844_v48  ;;  %v2645_v41 = vmul.f32 %v4429_v42, %v4844_v48  ;;  %v883_v32 = vmul.f32 %v4381_v29, %v5785_v1  ;;  %v2593_v52 = vsel %vm427_vm4, %v2591_v11, %v5788_v21 }
 0x576   : > { %v4839_v45 = vpop.permute.xlu1 %1071  ;;  %v1232_v59 = vpop.permute.xlu0 %1231  ;;  %v5789_v11 = vstv %s4807_s19 }
 0x577   : > { %v921_v35 = vadd.f32 %v4157_v58, %v883_v32  ;;  %v2651_v6 = vrot.slane %v2645_v41, 6  ;;  %v888_v23 = vmul.f32 %v4381_v29, %v5789_v11  ;;  %v5792_v32 = vrot.slane %v4856_v28, 6 }
 0x578   : > { %1539 = vrot.lane.b32.xlu1 %v1536_v0, %s3223_s7  ;;  %2576 = vrot.lane.b32.xlu0 %v2573_v51, %s3223_s7  ;;  %v1628_v0 = vmul.f32 %v4850_v26, %v4678_v61  ;;  %v4874_v51 = vstv %s4819_s14  ;;  %s2887_s14 = sld [smem:[#allocation7 + $0x3b]] }
 0x579   : > { %v4882_v42 = vmul.f32 %v4588_v49, %v4874_v51  ;;  %v1506_v34 = vmul.f32 %v4381_v29, %v4874_v51  ;;  %v995_v58 = vadd.f32 %v4552_v18, %v921_v35  ;;  %v2653_v11 = vsel %vm427_vm4, %v2651_v6, %v5792_v32 }
 0x57a   : > { %v4866_v16 = vpop.permute.xlu1 %1092  ;;  %v1252_v3 = vpop.permute.xlu0 %1251 }
 0x57b   : > { %5786 = vst [vmem:[#allocation54_spill] sm:$0xff] %v4866_v16  ;;  %v1635_v16 = vrot.slane %v1628_v0, 6  ;;  %v1513_v61 = vrot.slane %v4882_v42, 5  ;;  %v5793_v0 = vstv %s4836_s18  ;;  %v1075_v18 = vadd.f32 %v4648_v4, %v995_v58 }
 0x57c   : > { %1559 = vrot.lane.b32.xlu1 %v1556_v57, %s3223_s7  ;;  %2596 = vrot.lane.b32.xlu0 %v2593_v52, %s3223_s7  ;;  %v1688_v57 = vmul.f32 %v4850_v26, %v4698_v40  ;;  %v5791_v52 = vrot.slane %v4663_v24, 5  ;;  %v878_v40 = vmul.f32 %v4381_v29, %v5793_v0  ;;  %v1512_v24 = vrot.slane %v1506_v34, 5 }
 0x57d   : > { %v1156_v4 = vadd.f32 %v4740_v20, %v1075_v18  ;;  %v2487_v20 = vmul.f32 %v4604_v15, %v4745_v27 }
 0x57e   : > { %v4893_v21 = vpop.permute.xlu1 %1112  ;;  %v4895_v1 = vpop.permute.xlu0 %1271  ;;  %v1616_v41 = vsel %vm1491_vm12, %v5791_v52, %v1615_v38  ;;  %v5794_v52 = vrot.slane %v4686_v8, 6  ;;  %v1695_v32 = vrot.slane %v1688_v57, 6  ;;  %v1514_v34 = vsel %vm1491_vm12, %v1512_v24, %v1513_v61 }
 0x57f   : > { %5790 = vst [vmem:[#allocation55_spill] sm:$0xff] %v4893_v21  ;;  %v934_v21 = vadd.f32 %v4180_v10, %v888_v23  ;;  %v4959_v24 = vstv %s2857_s13  ;;  %s2876_s13 = sld [smem:[#allocation7 + $0x30]] }
 0x580   : > { %1619 = vrot.lane.b32.xlu1 %v1616_v41, %s3226_s15  ;;  %2656 = vrot.lane.b32.xlu0 %v2653_v11, %s3226_s15  ;;  %v1636_v6 = vsel %vm427_vm4, %v5794_v52, %v1635_v16  ;;  %v1708_v41 = vmul.f32 %v4850_v26, %v4721_v54  ;;  %v908_v11 = vadd.f32 %v4136_v53, %v878_v40 }
 0x581   : > { %v1015_v10 = vadd.f32 %v4575_v56, %v934_v21  ;;  %v1237_v54 = vadd.f32 %v1232_v59, %v1156_v4  ;;  %v4940_v21 = vstv %s4899_s11  ;;  %s2872_s11 = sld [smem:[#allocation7 + $0x2c]] }
 0x582   : > { %v4916_v35 = vpop.permute.xlu1 %1132  ;;  %v1292_v38 = vpop.permute.xlu0 %1291  ;;  %v975_v8 = vadd.f32 %v4529_v63, %v908_v11  ;;  %v1715_v23 = vrot.slane %v1708_v41, 6  ;;  %v5795_v63 = vrot.slane %v4709_v37, 6  ;;  %v4950_v59 = vmul.f32 %v4588_v49, %v4940_v21  ;;  %v5805_v42 = vld [vmem:[#allocation54_spill] sm:$0xff] }
 0x583   : > { %v1096_v16 = vadd.f32 %v4671_v62, %v1015_v10  ;;  %v2507_v37 = vmul.f32 %v4604_v15, %v4770_v43  ;;  %v892_v41 = vstv %s4929_s29  ;;  %v4972_v43 = vmul.f32 %v4588_v49, %v4959_v24  ;;  %s5174_s29 = sld [smem:[#allocation7 + $0x34]] }
 0x584   : > { %1639 = vrot.lane.b32.xlu1 %v1636_v6, %s3224_s26  ;;  %1517 = vrot.lane.b32.xlu0 %v1514_v34, %s3223_s7  ;;  %v1055_v57 = vadd.f32 %v4625_v47, %v975_v8  ;;  %v1696_v62 = vsel %vm427_vm4, %v5795_v63, %v1695_v32  ;;  %v5796_v32 = vrot.slane %v4732_v46, 6  ;;  %v1368_v11 = vrot.slane %v4950_v59, 4  ;;  %s2859_s26 = sld [smem:[#allocation7 + $0x1f]]  ;;  %v5814_v59 = vld [vmem:[#allocation24_spill] sm:$0xff] }
 0x585   : > { %v1176_v58 = vadd.f32 %v4763_v5, %v1096_v16  ;;  %v1360_v5 = vmul.f32 %v4381_v29, %v4940_v21  ;;  %v2514_v8 = vrot.slane %v2507_v37, 5  ;;  %v1377_v46 = vmul.f32 %v4381_v29, %v4959_v24 }
 0x586   : > { %v4935_v53 = vpop.permute.xlu1 %1152  ;;  %v1312_v56 = vpop.permute.xlu0 %1311  ;;  %v1136_v27 = vadd.f32 %v4717_v25, %v1055_v57  ;;  %v1716_v25 = vsel %vm427_vm4, %v5796_v32, %v1715_v23  ;;  %v893_v16 = vmul.f32 %v4381_v29, %v892_v41  ;;  %v2567_v23 = vmul.f32 %v4604_v15, %v4792_v13 }
 0x587   : > { %v1317_v0 = vadd.f32 %v1312_v56, %v1237_v54  ;;  %v1257_v40 = vadd.f32 %v1252_v3, %v1176_v58  ;;  %v2494_v3 = vrot.slane %v2487_v20, 5  ;;  %v1367_v34 = vrot.slane %v1360_v5, 4 }
 0x588   : > { %1699 = vrot.lane.b32.xlu1 %v1696_v62, %s3225_s8  ;;  %v1216_v52 = vadd.f32 %v4813_v30, %v1136_v27  ;;  %v5797_v54 = vrot.slane %v4755_v60, 5  ;;  %v1384_v20 = vrot.slane %v4972_v43, 4  ;;  %v955_v57 = vadd.f32 %v4508_v31, %v893_v16 }
 0x589   : > { %v5798_v60 = vrot.slane %v4778_v36, 5  ;;  %v2574_v5 = vrot.slane %v2567_v23, 6  ;;  %v2587_v37 = vmul.f32 %v4604_v15, %v4817_v7  ;;  %v2647_v7 = vmul.f32 %v4604_v15, %v4844_v48 }
 0x58a   : > { %v4953_v18 = vpop.permute.xlu1 %1172  ;;  %v1332_v47 = vpop.permute.xlu0 %1331  ;;  %v1297_v10 = vadd.f32 %v1292_v38, %v1216_v52  ;;  %v2495_v56 = vsel %vm1491_vm12, %v5797_v54, %v2494_v3  ;;  %v1369_v38 = vsel %vm1366_vm10, %v1367_v34, %v1368_v11  ;;  %v1035_v13 = vadd.f32 %v4602_v12, %v955_v57 }
 0x58b   : > { %v4962_v6 = vadd.f32 %v1332_v47, %v1257_v40  ;;  %v2515_v27 = vsel %vm1491_vm12, %v5798_v60, %v2514_v8  ;;  %v1383_v40 = vrot.slane %v1377_v46, 4  ;;  %v5007_v32 = vstv %s2859_s26  ;;  %s2888_s26 = sld [smem:[#allocation7 + $0x3c]] }
 0x58c   : > { %1719 = vrot.lane.b32.xlu1 %v1716_v25, %s3225_s8  ;;  %v1374_v58 = vadd.f32 %v1369_v38, %v1297_v10  ;;  %v1116_v52 = vadd.f32 %v4694_v17, %v1035_v13  ;;  %v5011_v3 = vmul.f32 %v4588_v49, %v5007_v32  ;;  %v5799_v8 = vrot.slane %v4803_v19, 6 }
 0x58d   : > { %v1385_v31 = vsel %vm1366_vm10, %v1383_v40, %v1384_v20  ;;  %v1409_v46 = vmul.f32 %v4381_v29, %v5007_v32  ;;  %v5800_v19 = vstv %s4784_s28  ;;  %v5801_v57 = vrot.slane %v4830_v50, 6  ;;  %s2915_s28 = sld [smem:[#allocation7 + $0x57]] }
 0x58e   : > { %v4974_v4 = vpop.permute.xlu1 %1192  ;;  %v1352_v30 = vpop.permute.xlu0 %1351  ;;  %v1390_v36 = vadd.f32 %v1385_v31, %v1317_v0  ;;  %v1196_v10 = vadd.f32 %v4788_v9, %v1116_v52  ;;  %v2575_v17 = vsel %vm427_vm4, %v5799_v8, %v2574_v5  ;;  %v2594_v0 = vrot.slane %v2587_v37, 6 }
 0x58f   : > { %v1416_v48 = vrot.slane %v5011_v3, 4  ;;  %v1508_v9 = vmul.f32 %v4850_v26, %v4874_v51  ;;  %v884_v23 = vmul.f32 %v4588_v49, %v5800_v19  ;;  %v5802_v5 = vstv %s4807_s19  ;;  %s2868_s19 = sld [smem:[#allocation7 + $0x28]] }
 0x590   : > { %2498 = vrot.lane.b32.xlu1 %v2495_v56, %s5713_s12  ;;  %v1277_v16 = vadd.f32 %v4895_v1, %v1196_v10  ;;  %v1415_v1 = vrot.slane %v1409_v46, 4  ;;  %v5803_v31 = vrot.slane %v4856_v28, 6 }
 0x591   : > { %v922_v60 = vadd.f32 %v4339_v22, %v884_v23  ;;  %v1515_v13 = vrot.slane %v1508_v9, 5  ;;  %v5804_v22 = vstv %s4836_s18  ;;  %s2858_s18 = sld [smem:[#allocation7 + $0x1e]] }
 0x592   : > { %v4992_v63 = vpop.permute.xlu1 %1212  ;;  %v1437_v62 = vpop.permute.xlu0 %1436  ;;  %v1357_v38 = vadd.f32 %v1352_v30, %v1277_v16  ;;  %v1417_v51 = vsel %vm1366_vm10, %v1415_v1, %v1416_v48  ;;  %v889_v30 = vmul.f32 %v4588_v49, %v5802_v5 }
 0x593   : > { %v4998_v47 = vadd.f32 %v1437_v62, %v1374_v58  ;;  %v2595_v58 = vsel %vm427_vm4, %v5801_v57, %v2594_v0  ;;  %v2654_v62 = vrot.slane %v2647_v7, 6  ;;  %v996_v50 = vadd.f32 %v4738_v2, %v922_v60  ;;  %v5807_v57 = vld [vmem:[#allocation53_spill] sm:$0xff] }
 0x594   : > { %2518 = vrot.lane.b32.xlu1 %v2515_v27, %s5713_s12  ;;  %v1422_v37 = vadd.f32 %v1417_v51, %v1357_v38  ;;  %v1516_v2 = vsel %vm1491_vm12, %v1513_v61, %v1515_v13  ;;  %v5057_v0 = vstv %s2887_s14  ;;  %s2892_s14 = sld [smem:[#allocation7 + $0x40]] }
 0x595   : > { %v2655_v52 = vsel %vm427_vm4, %v5803_v31, %v2654_v62  ;;  %v1076_v7 = vadd.f32 %v4839_v45, %v996_v50 }
 0x596   : > { %v1234_v25 = vpop.permute.xlu1 %1233  ;;  %v1457_v12 = vpop.permute.xlu0 %1456 }
 0x597   : > { %v5016_v34 = vadd.f32 %v1457_v12, %v1390_v36  ;;  %v879_v36 = vmul.f32 %v4588_v49, %v5804_v22  ;;  %v935_v12 = vadd.f32 %v4360_v14, %v889_v30  ;;  %v1157_v16 = vadd.f32 %v4935_v53, %v1076_v7 }
 0x598   : > { %2578 = vrot.lane.b32.xlu1 %v2575_v17, %s3223_s7  ;;  %v5065_v14 = vmul.f32 %v4441_v55, %v5057_v0 }
 0x599   : > { %v909_v28 = vadd.f32 %v4316_v44, %v879_v36  ;;  %v1016_v46 = vadd.f32 %v4761_v39, %v935_v12  ;;  %v1238_v61 = vadd.f32 %v1234_v25, %v1157_v16  ;;  %v5806_v44 = vld [vmem:[#allocation36_spill] sm:$0xff] }
 0x59a   : > { %v1254_v54 = vpop.permute.xlu1 %1253  ;;  %v1498_v56 = vpop.permute.xlu0 %1497  ;;  %v1905_v38 = vmul.f32 %v5806_v44, %v5057_v0  ;;  %v1912_v60 = vrot.slane %v5065_v14, 1 }
 0x59b   : > { %v1503_v10 = vadd.f32 %v1498_v56, %v1422_v37  ;;  %v976_v45 = vadd.f32 %v4715_v33, %v909_v28  ;;  %v1097_v56 = vadd.f32 %v5805_v42, %v1016_v46  ;;  %v1362_v33 = vmul.f32 %v4850_v26, %v4940_v21  ;;  %v5809_v37 = vld [vmem:[#allocation13_spill] sm:$0xff]  ;;  %v5811_v46 = vld [vmem:[#allocation51_spill] sm:$0xff] }
 0x59c   : > { %2598 = vrot.lane.b32.xlu1 %v2595_v58, %s3223_s7  ;;  %v1911_v5 = vrot.slane %v1905_v38, 1 }
 0x59d   : > { %v1056_v53 = vadd.f32 %v5807_v57, %v976_v45  ;;  %v1177_v58 = vadd.f32 %v4953_v18, %v1097_v56  ;;  %v5816_v57 = vld [vmem:[#allocation55_spill] sm:$0xff] }
 0x59e   : > { %v5039_v27 = vpop.permute.xlu1 %1273  ;;  %v1578_v40 = vpop.permute.xlu0 %1577  ;;  %v1913_v21 = vsel %vm943_vm11, %v1911_v5, %v1912_v60 }
 0x59f   : > { %v1583_v9 = vadd.f32 %v1578_v40, %v1503_v10  ;;  %v1137_v51 = vadd.f32 %v4916_v35, %v1056_v53  ;;  %v1258_v25 = vadd.f32 %v1254_v54, %v1177_v58  ;;  %v5808_v40 = vld [vmem:[#allocation12_spill] sm:$0xff]  ;;  %v1370_v35 = vrot.slane %v1362_v33, 4  ;;  %v5817_v58 = vld [vmem:[#allocation26_spill] sm:$0xff] }
 0x5a0   : > { %2658 = vrot.lane.b32.xlu1 %v2655_v52, %s3226_s15  ;;  %v1379_v54 = vmul.f32 %v4850_v26, %v4959_v24  ;;  %v5810_v10 = vld [vmem:[#allocation20_spill] sm:$0xff] }
 0x5a1   : > { %v1217_v18 = vadd.f32 %v4992_v63, %v1137_v51  ;;  %v894_v63 = vmul.f32 %v4588_v49, %v892_v41 }
 0x5a2   : > { %v1294_v8 = vpop.permute.xlu1 %1293  ;;  %v1658_v17 = vpop.permute.xlu0 %1657  ;;  %v1386_v28 = vrot.slane %v1379_v54, 4  ;;  %v5135_v54 = vstv %s2868_s19  ;;  %s2896_s19 = sld [smem:[#allocation7 + $0x44]] }
 0x5a3   : > { %v1663_v19 = vadd.f32 %v1658_v17, %v1583_v9  ;;  %v1298_v22 = vadd.f32 %v1294_v8, %v1217_v18  ;;  %v956_v16 = vadd.f32 %v5811_v46, %v894_v63  ;;  %v5812_v9 = vld [vmem:[#allocation22_spill] sm:$0xff]  ;;  %v5100_v8 = vstv %s2915_s28  ;;  %v5819_v18 = vld [vmem:[#allocation29_spill] sm:$0xff]  ;;  %s2885_s28 = sld [smem:[#allocation7 + $0x39]] }
 0x5a4   : > { %1519 = vrot.lane.b32.xlu1 %v1516_v2, %s3223_s7  ;;  %v1371_v2 = vsel %vm1366_vm10, %v1368_v11, %v1370_v35  ;;  %v5106_v41 = vmul.f32 %v4441_v55, %v5100_v8  ;;  %v1387_v38 = vsel %vm1366_vm10, %v1384_v20, %v1386_v28  ;;  %v5818_v20 = vld [vmem:[#allocation28_spill] sm:$0xff]  ;;  %v5820_v63 = vld [vmem:[#allocation30_spill] sm:$0xff]  ;;  %v1586_v28 = vmul.f32 %v4381_v29, %v5135_v54 }
 0x5a5   : > { %v1375_v24 = vadd.f32 %v1371_v2, %v1298_v22  ;;  %v5137_v22 = vstv %s2858_s18  ;;  %s2886_s18 = sld [smem:[#allocation7 + $0x3a]] }
 0x5a6   : > { %v1314_v23 = vpop.permute.xlu1 %1313  ;;  %v1738_v39 = vpop.permute.xlu0 %1737  ;;  %v1393_v46 = vmul.f32 %v4381_v29, %v5137_v22  ;;  %v1592_v29 = vrot.slane %v1586_v28, 5  ;;  %v5200_v28 = vstv %s2888_s26  ;;  %s5258_s26 = sld [smem:[#allocation7 + $0x4c]] }
 0x5a7   : > { %v1318_v62 = vadd.f32 %v1314_v23, %v1238_v61  ;;  %v1743_v1 = vadd.f32 %v1738_v39, %v1663_v19  ;;  %v5813_v61 = vld [vmem:[#allocation52_spill] sm:$0xff]  ;;  %v2449_v39 = vmul.f32 %v5806_v44, %v5100_v8 }
 0x5a8   : > { %v1036_v19 = vadd.f32 %v5813_v61, %v956_v16 }
 0x5a9   : > { %v1802_v13 = vadd.f32 %v5808_v40, %v1743_v1  ;;  %v1391_v1 = vadd.f32 %v1387_v38, %v1318_v62  ;;  %v2456_v40 = vrot.slane %v5106_v41, 5  ;;  %v2455_v44 = vrot.slane %v2449_v39, 5  ;;  %v3083_v38 = vld [vmem:[#allocation2] sm:$0xff] }
 0x5aa   : > { %v1334_v30 = vpop.permute.xlu1 %1333  ;;  %v5078_v50 = vpop.permute.xlu0 %2132  ;;  %v1117_v53 = vadd.f32 %v5816_v57, %v1036_v19 }
 0x5ab   : > { %v1854_v31 = vadd.f32 %v5809_v37, %v1802_v13  ;;  %v5082_v52 = vadd.f32 %v1334_v30, %v1258_v25  ;;  %v1411_v25 = vmul.f32 %v4850_v26, %v5007_v32  ;;  %v2457_v32 = vsel %vm1491_vm12, %v2455_v44, %v2456_v40 }
 0x5ac   : > { %v1197_v43 = vadd.f32 %v4974_v4, %v1117_v53  ;;  %v1907_v53 = vmul.f32 %v4604_v15, %v5057_v0 }
 0x5ad   : > { %v1918_v36 = vadd.f32 %v1913_v21, %v1854_v31  ;;  %v1418_v37 = vrot.slane %v1411_v25, 4 }
 0x5ae   : > { %v1354_v12 = vpop.permute.xlu1 %1353  ;;  %v5089_v7 = vpop.permute.xlu0 %2192  ;;  %v1278_v30 = vadd.f32 %v5039_v27, %v1197_v43  ;;  %v5141_v27 = vmul.f32 %v4588_v49, %v5135_v54 }
 0x5af   : > { %v1998_v17 = vadd.f32 %v5810_v10, %v1918_v36  ;;  %v5145_v36 = vmul.f32 %v4588_v49, %v5137_v22 }
 0x5b0   : > { %v1358_v35 = vadd.f32 %v1354_v12, %v1278_v30  ;;  %v1419_v12 = vsel %vm1366_vm10, %v1416_v48, %v1418_v37  ;;  %v1914_v37 = vrot.slane %v1907_v53, 1 }
 0x5b1   : > { %v2078_v45 = vadd.f32 %v5812_v9, %v1998_v17  ;;  %v5821_v9 = vld [vmem:[#allocation31_spill] sm:$0xff]  ;;  %v5698_v3 = vrot.slane %v5145_v36, 4 }
 0x5b2   : > { %v1439_v42 = vpop.permute.xlu1 %1438  ;;  %v5102_v56 = vpop.permute.xlu0 %2212  ;;  %v1423_v16 = vadd.f32 %v1419_v12, %v1358_v35 }
 0x5b3   : > { %v2158_v23 = vadd.f32 %v5814_v59, %v2078_v45  ;;  %v5110_v11 = vadd.f32 %v1439_v42, %v1375_v24  ;;  %v5158_v24 = vstv %s2872_s11  ;;  %v1593_v42 = vrot.slane %v5141_v27, 5  ;;  %s5235_s11 = sld [smem:[#allocation7 + $0x48]] }
 0x5b4   : > { %v5164_v48 = vmul.f32 %v4588_v49, %v5158_v24  ;;  %v1666_v39 = vmul.f32 %v3083_v38, %v5158_v24 }
 0x5b5   : > { %5815 = vst [vmem:[#allocation54_spill] sm:$0xff] %v5110_v11  ;;  %v2238_v55 = vadd.f32 %v5817_v58, %v2158_v23  ;;  %v1399_v23 = vrot.slane %v1393_v46, 4  ;;  %v5172_v58 = vstv %s2876_s13  ;;  %v1915_v46 = vsel %vm943_vm11, %v1912_v60, %v1914_v37  ;;  %s5244_s13 = sld [smem:[#allocation7 + $0x55]] }
 0x5b6   : > { %v1459_v33 = vpop.permute.xlu1 %1458  ;;  %v5119_v51 = vpop.permute.xlu0 %2272  ;;  %v5185_v25 = vmul.f32 %v4588_v49, %v5172_v58  ;;  %v1672_v44 = vrot.slane %v1666_v39, 6  ;;  %v1746_v30 = vmul.f32 %v3083_v38, %v5172_v58 }
 0x5b7   : > { %v5125_v13 = vadd.f32 %v1459_v33, %v1391_v1  ;;  %v2318_v5 = vadd.f32 %v5818_v20, %v2238_v55  ;;  %v1594_v55 = vsel %vm1491_vm12, %v1592_v29, %v1593_v42  ;;  %v1401_v1 = vsel %vm1366_vm10, %v1399_v23, %v5698_v3  ;;  %v5219_v23 = vld [vmem:[#allocation2 + $0x18] sm:$0xff] }
 0x5b8   : > { %v5694_v33 = vrot.slane %v5164_v48, 6  ;;  %v1406_v43 = vadd.f32 %v1401_v1, %v4962_v6  ;;  %v1921_v38 = vmul.f32 %v5219_v23, %v5200_v28 }
 0x5b9   : > { %v2398_v62 = vadd.f32 %v5819_v18, %v2318_v5 }
 0x5ba   : > { %v1500_v31 = vpop.permute.xlu1 %1499  ;;  %v5130_v21 = vpop.permute.xlu0 %2292  ;;  %v1674_v49 = vsel %vm427_vm4, %v1672_v44, %v5694_v33  ;;  %v5240_v44 = vstv %s2896_s19  ;;  %v1927_v37 = vrot.slane %v1921_v38, 1  ;;  %s5342_s19 = sld [smem:[#allocation7 + $0x56]] }
 0x5bb   : > { %v2462_v4 = vadd.f32 %v2457_v32, %v2398_v62  ;;  %v1504_v61 = vadd.f32 %v1500_v31, %v1423_v16  ;;  %v5692_v31 = vrot.slane %v5185_v25, 6  ;;  %v5822_v32 = vld [vmem:[#allocation18_spill] sm:$0xff] }
 0x5bd   : > { %v2542_v10 = vadd.f32 %v5820_v63, %v2462_v4  ;;  %v1752_v63 = vrot.slane %v1746_v30, 6  ;;  %v5242_v30 = vstv %s2886_s18  ;;  %s5349_s18 = sld [smem:[#allocation7 + $0x5c]] }
 0x5be   : > { %v1580_v17 = vpop.permute.xlu1 %1579  ;;  %v5151_v2 = vpop.permute.xlu0 %2352  ;;  %v1889_v38 = vmul.f32 %v5219_v23, %v5242_v30 }
 0x5bf   : > { %v2622_v45 = vadd.f32 %v5821_v9, %v2542_v10  ;;  %v1584_v57 = vadd.f32 %v1580_v17, %v1504_v61  ;;  %v5823_v10 = vld [vmem:[#allocation19_spill] sm:$0xff]  ;;  %v5691_v17 = vstv %s5174_s29  ;;  %v1754_v16 = vsel %vm427_vm4, %v1752_v63, %v5692_v31  ;;  %v5208_v9 = vld [vmem:[#allocation2 + $0x20] sm:$0xff]  ;;  %v5826_v63 = vld [vmem:[#allocation37_spill] sm:$0xff] }
 0x5c0   : > { %v5214_v61 = vstv %s2892_s14  ;;  %v1805_v60 = vmul.f32 %v5219_v23, %v5691_v17  ;;  %s5288_s14 = sld [smem:[#allocation7 + $0x50]] }
 0x5c1   : > { %2676 = vrot.lane.b32.xlu0 %v2622_v45, %s3223_s7  ;;  %v5212_v45 = vmul.f32 %v5208_v9, %v5200_v28  ;;  %v5228_v39 = vmul.f32 %v5208_v9, %v5214_v61  ;;  %v2001_v1 = vmul.f32 %v5219_v23, %v5214_v61 }
 0x5c2   : > { %v1660_v19 = vpop.permute.xlu1 %1659  ;;  %v5167_v59 = vpop.permute.xlu0 %2372 }
 0x5c3   : > { %v1664_v0 = vadd.f32 %v1660_v19, %v1584_v57  ;;  %v5824_v57 = vld [vmem:[#allocation32_spill] sm:$0xff] }
 0x5c5   : > { %1597 = vrot.lane.b32.xlu0 %v1594_v55, %s3226_s15 }
 0x5c6   : > { %v1740_v20 = vpop.permute.xlu1 %1739  ;;  %v1477_v5 = vpop.permute.xlu0 %1476 }
 0x5c7   : > { %v1744_v18 = vadd.f32 %v1740_v20, %v1664_v0  ;;  %v1482_v62 = vadd.f32 %v1477_v5, %v1406_v43  ;;  %v5233_v0 = vstv %s2885_s28  ;;  %v5690_v43 = vrot.slane %v5212_v45, 1  ;;  %v5825_v20 = vld [vmem:[#allocation34_spill] sm:$0xff]  ;;  %s5318_s28 = sld [smem:[#allocation7 + $0x58]] }
 0x5c9   : > { %v1803_v35 = vadd.f32 %v5822_v32, %v1744_v18  ;;  %1677 = vrot.lane.b32.xlu0 %v1674_v49, %s3225_s8  ;;  %v5693_v49 = vrot.slane %v5228_v39, 2  ;;  %v1873_v32 = vmul.f32 %v5219_v23, %v5233_v0 }
 0x5ca   : > { %v5196_v6 = vpop.permute.xlu1 %2134  ;;  %v1538_v4 = vpop.permute.xlu0 %1537 }
 0x5cb   : > { %v1855_v12 = vadd.f32 %v5823_v10, %v1803_v35  ;;  %v2451_v35 = vmul.f32 %v4604_v15, %v5100_v8  ;;  %v5267_v15 = vmul.f32 %v5208_v9, %v5240_v44  ;;  %v5271_v8 = vmul.f32 %v5208_v9, %v5242_v30 }
 0x5cd   : > { %v1919_v19 = vadd.f32 %v1915_v46, %v1855_v12  ;;  %1757 = vrot.lane.b32.xlu0 %v1754_v16, %s3227_s17  ;;  %v2007_v12 = vrot.slane %v2001_v1, 2  ;;  %v5256_v46 = vmul.f32 %v5208_v9, %v5233_v0  ;;  %v1929_v16 = vsel %vm943_vm11, %v1927_v37, %v5690_v43 }
 0x5ce   : > { %v5217_v29 = vpop.permute.xlu1 %2194  ;;  %v1558_v14 = vpop.permute.xlu0 %1557  ;;  %v1543_v37 = vadd.f32 %v1538_v4, %v5016_v34  ;;  %v5697_v17 = vrot.slane %v5267_v15, 2  ;;  %v5695_v31 = vrot.slane %v5271_v8, 1  ;;  %v1895_v34 = vrot.slane %v1889_v38, 1  ;;  %v5829_v4 = vld [vmem:[#allocation43_spill] sm:$0xff] }
 0x5cf   : > { %v1999_v53 = vadd.f32 %v5824_v57, %v1919_v19  ;;  %v1563_v55 = vadd.f32 %v1558_v14, %v1482_v62  ;;  %v2081_v19 = vmul.f32 %v5219_v23, %v5240_v44  ;;  %v5827_v14 = vld [vmem:[#allocation39_spill] sm:$0xff]  ;;  %v2009_v1 = vsel %vm1084_vm8, %v2007_v12, %v5693_v49 }
 0x5d0   : > { %v1395_v38 = vmul.f32 %v4850_v26, %v5137_v22  ;;  %v5385_v11 = vstv %s5318_s28 }
 0x5d1   : > { %v2079_v5 = vadd.f32 %v5825_v20, %v1999_v53  ;;  %1809 = vrot.lane.b32.xlu0 %v1805_v60, %s5711_s16  ;;  %v1879_v20 = vrot.slane %v1873_v32, 1  ;;  %v2087_v43 = vrot.slane %v2081_v19, 2 }
 0x5d2   : > { %v5246_v18 = vpop.permute.xlu1 %2214  ;;  %v1618_v62 = vpop.permute.xlu0 %1617  ;;  %v1402_v3 = vrot.slane %v1395_v38, 4  ;;  %v1668_v38 = vmul.f32 %v4850_v26, %v5158_v24 }
 0x5d3   : > { %v2159_v10 = vadd.f32 %v5826_v63, %v2079_v5  ;;  %v2458_v5 = vrot.slane %v2451_v35, 5  ;;  %v5696_v63 = vrot.slane %v5256_v46, 1  ;;  %v1623_v35 = vadd.f32 %v1618_v62, %v1543_v37 }
 0x5d4   : > { %v1588_v62 = vmul.f32 %v4850_v26, %v5135_v54  ;;  %v2089_v41 = vsel %vm1084_vm8, %v2087_v43, %v5697_v17 }
 0x5d5   : > { %v2239_v60 = vadd.f32 %v5827_v14, %v2159_v10  ;;  %1932 = vrot.lane.b32.xlu0 %v1929_v16, %s5713_s12  ;;  %v5828_v10 = vld [vmem:[#allocation41_spill] sm:$0xff]  ;;  %v5286_v16 = vstv %s5235_s11  ;;  %v2459_v49 = vsel %vm1491_vm12, %v2456_v40, %v2458_v5  ;;  %v1897_v40 = vsel %vm943_vm11, %v1895_v34, %v5695_v31  ;;  %s5387_s11 = sld [smem:[#allocation7 + $0x60]] }
 0x5d6   : > { %v5277_v57 = vpop.permute.xlu1 %2274  ;;  %v1638_v53 = vpop.permute.xlu0 %1637  ;;  %v5294_v32 = vmul.f32 %v5208_v9, %v5286_v16  ;;  %v2161_v33 = vmul.f32 %v5219_v23, %v5286_v16 }
 0x5d7   : > { %v2319_v14 = vadd.f32 %v5828_v10, %v2239_v60  ;;  %v5299_v60 = vstv %s5244_s13 }
 0x5d8   : > { %v5699_v54 = vrot.slane %v5294_v32, 3  ;;  %v5336_v43 = vmul.f32 %v5219_v23, %v5299_v60  ;;  %v2167_v31 = vrot.slane %v2161_v33, 3 }
 0x5d9   : > { %2012 = vrot.lane.b32.xlu0 %v2009_v1, %s3223_s7  ;;  %v2399_v12 = vadd.f32 %v5829_v4, %v2319_v14  ;;  %v1881_v1 = vsel %vm943_vm11, %v1879_v20, %v5696_v63  ;;  %v5316_v4 = vstv %s5258_s26  ;;  %v5830_v20 = vld [vmem:[#allocation14_spill] sm:$0xff]  ;;  %v1595_v63 = vrot.slane %v1588_v62, 5 }
 0x5da   : > { %v5301_v10 = vpop.permute.xlu1 %2294  ;;  %v1698_v19 = vpop.permute.xlu0 %1697  ;;  %v5329_v22 = vmul.f32 %v5208_v9, %v5316_v4  ;;  %v2241_v17 = vmul.f32 %v5219_v23, %v5316_v4  ;;  %v2169_v33 = vsel %vm1225_vm9, %v2167_v31, %v5699_v54  ;;  %v5366_v31 = vmul.f32 %v5208_v9, %v5299_v60 }
 0x5db   : > { %v1703_v37 = vadd.f32 %v1698_v19, %v1623_v35  ;;  %v2463_v14 = vadd.f32 %v2459_v49, %v2399_v12  ;;  %v1643_v49 = vadd.f32 %v1638_v53, %v1563_v55  ;;  %v5831_v35 = vld [vmem:[#allocation44_spill] sm:$0xff]  ;;  %v1596_v24 = vsel %vm1491_vm12, %v1593_v42, %v1595_v63  ;;  %v5839_v63 = vld [vmem:[#allocation38_spill] sm:$0xff] }
 0x5dc   : > { %v5832_v55 = vld [vmem:[#allocation16_spill] sm:$0xff]  ;;  %v5837_v54 = vrot.slane %v5145_v36, 4  ;;  %v5838_v27 = vrot.slane %v5329_v22, 3 }
 0x5dd   : > { %v1776_v5 = vadd.f32 %v5830_v20, %v1703_v37  ;;  %2092 = vrot.lane.b32.xlu0 %v2089_v41, %s3226_s15  ;;  %v2543_v12 = vadd.f32 %v5831_v35, %v2463_v14  ;;  %v5833_v41 = vld [vmem:[#allocation45_spill] sm:$0xff]  ;;  %v5347_v20 = vstv %s5288_s14  ;;  %v5834_v35 = vld [vmem:[#allocation15_spill] sm:$0xff]  ;;  %s2710_s14 = scalar_lea.sflag [#allocation5], %s3393_s20 }
 0x5de   : > { %v5338_v19 = vpop.permute.xlu1 %2354  ;;  %v1718_v34 = vpop.permute.xlu0 %1717  ;;  %v1403_v62 = vsel %vm1366_vm10, %v5837_v54, %v1402_v3 }
 0x5df   : > { %v1828_v53 = vadd.f32 %v5832_v55, %v1776_v5  ;;  %v1723_v37 = vadd.f32 %v1718_v34, %v1643_v49  ;;  %v2623_v14 = vadd.f32 %v5833_v41, %v2543_v12  ;;  %v5359_v5 = vmul.f32 %v5208_v9, %v5347_v20 }
 0x5e0   : > { %v2247_v41 = vrot.slane %v2241_v17, 3  ;;  %v1675_v17 = vrot.slane %v1668_v38, 6  ;;  %v1407_v3 = vadd.f32 %v1403_v62, %v5082_v52 }
 0x5e1   : > { %v1886_v49 = vadd.f32 %v1881_v1, %v1828_v53  ;;  %v1789_v12 = vadd.f32 %v5834_v35, %v1723_v37  ;;  %2678 = vrot.lane.b32.xlu1 %v2623_v14, %s3223_s7  ;;  %2172 = vrot.lane.b32.xlu0 %v2169_v33, %s3225_s8  ;;  %v2321_v1 = vmul.f32 %v5219_v23, %v5347_v20  ;;  %v5835_v37 = vld [vmem:[#allocation33_spill] sm:$0xff]  ;;  %v5843_v62 = vrot.slane %v5359_v5, 4 }
 0x5e2   : > { %v5368_v34 = vpop.permute.xlu1 %2374  ;;  %v5370_v55 = vpop.permute.xlu0 %2496  ;;  %v1748_v53 = vmul.f32 %v4850_v26, %v5172_v58  ;;  %v5836_v33 = vld [vmem:[#allocation17_spill] sm:$0xff]  ;;  %v2249_v42 = vsel %vm1225_vm9, %v2247_v41, %v5838_v27  ;;  %v5395_v58 = vmul.f32 %v5208_v9, %v5385_v11  ;;  %v5840_v27 = vld [vmem:[#allocation35_spill] sm:$0xff] }
 0x5e3   : > { %v1958_v14 = vadd.f32 %v5835_v37, %v1886_v49  ;;  %v1841_v35 = vadd.f32 %v5836_v33, %v1789_v12  ;;  %v5402_v12 = vstv %s5342_s19  ;;  %v2327_v41 = vrot.slane %v2321_v1, 4 }
 0x5e4   : > { %v1755_v37 = vrot.slane %v1748_v53, 6  ;;  %v2465_v33 = vmul.f32 %v5219_v23, %v5385_v11  ;;  %v5700_v1 = vrot.slane %v5395_v58, 5 }
 0x5e5   : > { %v2038_v36 = vadd.f32 %v5839_v63, %v1958_v14  ;;  %v1902_v49 = vadd.f32 %v1897_v40, %v1841_v35  ;;  %1599 = vrot.lane.b32.xlu1 %v1596_v24, %s3226_s15  ;;  %2252 = vrot.lane.b32.xlu0 %v2249_v42, %s3227_s17  ;;  %v5841_v14 = vld [vmem:[#allocation42_spill] sm:$0xff]  ;;  %v5411_v24 = vstv %s5349_s18  ;;  %v5842_v42 = vrot.slane %v5164_v48, 6 }
 0x5e6   : > { %v1479_v54 = vpop.permute.xlu1 %1478  ;;  %v5404_v38 = vpop.permute.xlu0 %2516  ;;  %v2329_v63 = vsel %vm1366_vm10, %v2327_v41, %v5843_v62  ;;  %v5422_v53 = vmul.f32 %v5208_v9, %v5411_v24  ;;  %v5434_v41 = vmul.f32 %v5208_v9, %v5402_v12  ;;  %v5444_v62 = vstv %s5387_s11 }
 0x5e7   : > { %v1978_v26 = vadd.f32 %v5840_v27, %v1902_v49  ;;  %v2118_v40 = vadd.f32 %v5841_v14, %v2038_v36  ;;  %v1483_v35 = vadd.f32 %v1479_v54, %v1407_v3  ;;  %v1676_v52 = vsel %vm427_vm4, %v5842_v42, %v1675_v17  ;;  %v5844_v49 = vld [vmem:[#allocation40_spill] sm:$0xff] }
 0x5e8   : > { %v2423_v54 = vrot.slane %v5336_v43, 5  ;;  %v2433_v17 = vmul.f32 %v5219_v23, %v5402_v12  ;;  %v5845_v42 = vrot.slane %v5185_v25, 6  ;;  %v5846_v25 = vrot.slane %v5366_v31, 5 }
 0x5e9   : > { %v2058_v36 = vadd.f32 %v5844_v49, %v1978_v26  ;;  %v2198_v3 = vadd.f32 %v5089_v7, %v2118_v40  ;;  %1679 = vrot.lane.b32.xlu1 %v1676_v52, %s3225_s8  ;;  %2332 = vrot.lane.b32.xlu0 %v2329_v63, %s5711_s16  ;;  %v2471_v26 = vrot.slane %v2465_v33, 5  ;;  %v2545_v7 = vmul.f32 %v5219_v23, %v5411_v24  ;;  %v5450_v33 = vld [vmem:[#allocation2 + $0x28] sm:$0x3f] }
 0x5ea   : > { %v1540_v27 = vpop.permute.xlu1 %1539  ;;  %v2577_v14 = vpop.permute.xlu0 %2576  ;;  %v1756_v52 = vsel %vm427_vm4, %v5845_v42, %v1755_v37  ;;  %v1923_v48 = vmul.f32 %v5450_v33, %v5200_v28  ;;  %v2425_v37 = vsel %vm1491_vm12, %v2423_v54, %v5846_v25  ;;  %v5847_v25 = vstv %s5174_s29 }
 0x5eb   : > { %v2278_v43 = vadd.f32 %v5119_v51, %v2198_v3  ;;  %v2138_v40 = vadd.f32 %v5078_v50, %v2058_v36  ;;  %v2473_v63 = vsel %vm1491_vm12, %v2471_v26, %v5700_v1  ;;  %v5456_v50 = vmul.f32 %v5208_v9, %v5444_v62 }
 0x5ec   : > { %v2439_v3 = vrot.slane %v2433_v17, 5  ;;  %v2551_v1 = vrot.slane %v2545_v7, 6  ;;  %v2003_v7 = vmul.f32 %v5450_v33, %v5214_v61 }
 0x5ed   : > { %v2358_v51 = vadd.f32 %v5151_v2, %v2278_v43  ;;  %v2218_v36 = vadd.f32 %v5102_v56, %v2138_v40  ;;  %1759 = vrot.lane.b32.xlu1 %v1756_v52, %s3227_s17  ;;  %2476 = vrot.lane.b32.xlu0 %v2473_v63, %s5713_s12  ;;  %v2625_v2 = vmul.f32 %v5219_v23, %v5444_v62  ;;  %v5848_v40 = vrot.slane %v5422_v53, 6 }
 0x5ee   : > { %v1560_v26 = vpop.permute.xlu1 %1559  ;;  %v5466_v42 = vpop.permute.xlu0 %2596  ;;  %v1806_v56 = vmul.f32 %v5208_v9, %v5847_v25  ;;  %v1930_v52 = vrot.slane %v1923_v48, 1  ;;  %v2632_v63 = vrot.slane %v5456_v50, 6  ;;  %v5850_v25 = vrot.slane %v5212_v45, 1 }
 0x5ef   : > { %v2430_v43 = vadd.f32 %v2425_v37, %v2358_v51  ;;  %v2298_v49 = vadd.f32 %v5130_v21, %v2218_v36  ;;  %v1564_v54 = vadd.f32 %v1560_v26, %v1483_v35  ;;  %v2553_v17 = vsel %vm427_vm4, %v2551_v1, %v5848_v40 }
 0x5f0   : > { %v5849_v21 = vrot.slane %v5434_v41, 5  ;;  %v2631_v48 = vrot.slane %v2625_v2, 6  ;;  %v1931_v61 = vsel %vm943_vm11, %v5850_v25, %v1930_v52  ;;  %v1544_v45 = vadd.f32 %v1540_v27, %v5125_v13 }
 0x5f1   : > { %v2502_v28 = vadd.f32 %v5370_v55, %v2430_v43  ;;  %v2378_v51 = vadd.f32 %v5167_v59, %v2298_v49  ;;  %1811 = vrot.lane.b32.xlu1 %v1806_v56, %s5711_s16  ;;  %2556 = vrot.lane.b32.xlu0 %v2553_v17, %s3223_s7  ;;  %v2010_v55 = vrot.slane %v2003_v7, 2  ;;  %v2083_v49 = vmul.f32 %v5450_v33, %v5240_v44 }
 0x5f2   : > { %v2441_v35 = vsel %vm1491_vm12, %v2439_v3, %v5849_v21  ;;  %v1620_v37 = vpop.permute.xlu1 %1619  ;;  %v2657_v1 = vpop.permute.xlu0 %2656  ;;  %v2633_v59 = vsel %vm427_vm4, %v2631_v48, %v2632_v63  ;;  %v5851_v56 = vrot.slane %v5228_v39, 2  ;;  %v1875_v44 = vmul.f32 %v5450_v33, %v5233_v0  ;;  %v5854_v48 = vld [vmem:[#allocation25_spill] sm:$0xff] }
 0x5f3   : > { %v2446_v36 = vadd.f32 %v2441_v35, %v2378_v51  ;;  %v2582_v26 = vadd.f32 %v2577_v14, %v2502_v28  ;;  %v2163_v17 = vmul.f32 %v5450_v33, %v5286_v16  ;;  %v1624_v52 = vadd.f32 %v1620_v37, %v1544_v45  ;;  %v5853_v35 = vld [vmem:[#allocation21_spill] sm:$0xff]  ;;  %v5858_v45 = vld [vmem:[#allocation46_spill] sm:$0xff] }
 0x5f4   : > { %v2011_v40 = vsel %vm1084_vm8, %v5851_v56, %v2010_v55  ;;  %v1882_v39 = vrot.slane %v1875_v44, 1  ;;  %v5852_v7 = vrot.slane %v5267_v15, 2  ;;  %v2243_v21 = vmul.f32 %v5450_v33, %v5316_v4  ;;  %v5859_v56 = vld [vmem:[#allocation27_spill] sm:$0xff] }
 0x5f5   : > { %v5496_v43 = vadd.f32 %v5404_v38, %v2446_v36  ;;  %1934 = vrot.lane.b32.xlu1 %v1931_v61, %s5713_s12  ;;  %2636 = vrot.lane.b32.xlu0 %v2633_v59, %s3226_s15  ;;  %v2662_v28 = vadd.f32 %v2657_v1, %v2582_v26  ;;  %v2090_v38 = vrot.slane %v2083_v49, 2  ;;  %v2170_v0 = vrot.slane %v2163_v17, 3  ;;  %v5857_v49 = vld [vmem:[#allocation23_spill] sm:$0xff] }
 0x5f6   : > { %v1640_v14 = vpop.permute.xlu1 %1639  ;;  %v1518_v3 = vpop.permute.xlu0 %1517  ;;  %v5856_v61 = vrot.slane %v5294_v32, 3  ;;  %v2250_v55 = vrot.slane %v2243_v21, 3  ;;  %v2323_v4 = vmul.f32 %v5450_v33, %v5347_v20  ;;  %v5861_v44 = vrot.slane %v5329_v22, 3 }
 0x5f7   : > { %v5502_v2 = vadd.f32 %v1518_v3, %v4998_v47  ;;  %v1891_v47 = vmul.f32 %v5450_v33, %v5242_v30  ;;  %v2091_v51 = vsel %vm1084_vm8, %v5852_v7, %v2090_v38  ;;  %v1644_v16 = vadd.f32 %v1640_v14, %v1564_v54 }
 0x5f8   : > { %v5855_v30 = vrot.slane %v5256_v46, 1  ;;  %v2171_v59 = vsel %vm1225_vm9, %v5856_v61, %v2170_v0  ;;  %v2251_v38 = vsel %vm1225_vm9, %v5861_v44, %v2250_v55  ;;  %v2330_v17 = vrot.slane %v2323_v4, 4 }
 0x5f9   : > { %2014 = vrot.lane.b32.xlu1 %v2011_v40, %s3223_s7  ;;  %2666 = vrot.lane.b32.xlu0 %v2662_v28, %s3223_s7  ;;  %v1898_v26 = vrot.slane %v1891_v47, 1  ;;  %v5860_v40 = vrot.slane %v5271_v8, 1  ;;  %v2467_v20 = vmul.f32 %v5450_v33, %v5385_v11  ;;  %v2419_v47 = vmul.f32 %v5450_v33, %v5299_v60  ;;  %v5863_v8 = vld [vmem:[#allocation47_spill] sm:$0xff] }
 0x5fa   : > { %v1700_v13 = vpop.permute.xlu1 %1699  ;;  %v1883_v15 = vsel %vm943_vm11, %v5855_v30, %v1882_v39  ;;  %v5865_v22 = vrot.slane %v5359_v5, 4  ;;  %v2547_v11 = vmul.f32 %v5450_v33, %v5411_v24  ;;  %v5869_v4 = vrot.slane %v5422_v53, 6 }
 0x5fb   : > { %v1704_v27 = vadd.f32 %v1700_v13, %v1624_v52  ;;  %v1899_v32 = vsel %vm943_vm11, %v5860_v40, %v1898_v26  ;;  %v5862_v52 = vld [vmem:[#allocation48_spill] sm:$0xff]  ;;  %v2426_v60 = vrot.slane %v2419_v47, 5 }
 0x5fc   : > { %v2331_v21 = vsel %vm1366_vm10, %v5865_v22, %v2330_v17  ;;  %v2554_v24 = vrot.slane %v2547_v11, 6 }
 0x5fd   : > { %v1777_v37 = vadd.f32 %v5853_v35, %v1704_v27  ;;  %2094 = vrot.lane.b32.xlu1 %v2091_v51, %s3226_s15  ;;  %v5864_v51 = vld [vmem:[#allocation50_spill] sm:$0xff]  ;;  %v5866_v35 = vld [vmem:[#allocation49_spill] sm:$0xff] }
 0x5fe   : > { %v1720_v1 = vpop.permute.xlu1 %1719 }
 0x5ff   : > { %v1829_v36 = vadd.f32 %v5854_v48, %v1777_v37  ;;  %v1724_v25 = vadd.f32 %v1720_v1, %v1644_v16  ;;  %v2474_v16 = vrot.slane %v2467_v20, 5  ;;  %v2435_v48 = vmul.f32 %v5450_v33, %v5402_v12 }
 0x600   : > { %v5868_v12 = vrot.slane %v5366_v31, 5 }
 0x601   : > { %v1887_v54 = vadd.f32 %v1883_v15, %v1829_v36  ;;  %v1790_v14 = vadd.f32 %v5857_v49, %v1724_v25  ;;  %2174 = vrot.lane.b32.xlu1 %v2171_v59, %s3225_s8  ;;  %v5867_v25 = vrot.slane %v5395_v58, 5  ;;  %v2627_v15 = vmul.f32 %v5450_v33, %v5444_v62 }
 0x602   : > { %v2499_v3 = vpop.permute.xlu1 %2498  ;;  %v2442_v59 = vrot.slane %v2435_v48, 5 }
 0x603   : > { %v1959_v28 = vadd.f32 %v5858_v45, %v1887_v54  ;;  %v1842_v46 = vadd.f32 %v5859_v56, %v1790_v14  ;;  %v2475_v30 = vsel %vm1491_vm12, %v5867_v25, %v2474_v16  ;;  %v2555_v54 = vsel %vm427_vm4, %v5869_v4, %v2554_v24 }
 0x604   : > { %v2634_v62 = vrot.slane %v2627_v15, 6 }
 0x605   : > { %v2039_v13 = vadd.f32 %v5862_v52, %v1959_v28  ;;  %v1903_v27 = vadd.f32 %v1899_v32, %v1842_v46  ;;  %2254 = vrot.lane.b32.xlu1 %v2251_v38, %s3227_s17  ;;  %v5871_v46 = vld [vmem:[#allocation54_spill] sm:$0xff] }
 0x606   : > { %v2519_v39 = vpop.permute.xlu1 %2518 }
 0x607   : > { %v1979_v7 = vadd.f32 %v5863_v8, %v1903_v27  ;;  %v2119_v0 = vadd.f32 %v5864_v51, %v2039_v13 }
 0x609   : > { %v2059_v37 = vadd.f32 %v5866_v35, %v1979_v7  ;;  %v2199_v1 = vadd.f32 %v5217_v29, %v2119_v0  ;;  %2334 = vrot.lane.b32.xlu1 %v2331_v21, %s5711_s16  ;;  %s2912_s16 = sld [smem:[#allocation7 + $0x54]] }
 0x60a   : > { %v2579_v36 = vpop.permute.xlu1 %2578 }
 0x60b   : > { %v2279_v26 = vadd.f32 %v5277_v57, %v2199_v1  ;;  %v2139_v5 = vadd.f32 %v5196_v6, %v2059_v37  ;;  %v2427_v57 = vsel %vm1491_vm12, %v5868_v12, %v2426_v60 }
 0x60d   : > { %v2359_v29 = vadd.f32 %v5338_v19, %v2279_v26  ;;  %v2219_v61 = vadd.f32 %v5246_v18, %v2139_v5  ;;  %2478 = vrot.lane.b32.xlu1 %v2475_v30, %s5713_s12  ;;  %v5870_v18 = vrot.slane %v5434_v41, 5  ;;  %v2602_v41 = vadd.f32 %v5466_v42, %v5496_v43 }
 0x60e   : > { %v2599_v6 = vpop.permute.xlu1 %2598 }
 0x60f   : > { %v2431_v55 = vadd.f32 %v2427_v57, %v2359_v29  ;;  %v2299_v58 = vadd.f32 %v5301_v10, %v2219_v61  ;;  %v2443_v31 = vsel %vm1491_vm12, %v5870_v18, %v2442_v59  ;;  %v2635_v10 = vsel %vm427_vm4, %v2632_v63, %v2634_v62 }
 0x610   : > { %v2400_v15 = vstv %s2912_s16 }
 0x611   : > { %v2503_v49 = vadd.f32 %v2499_v3, %v2431_v55  ;;  %v2379_v19 = vadd.f32 %v5368_v34, %v2299_v58  ;;  %2558 = vrot.lane.b32.xlu1 %v2555_v54, %s3223_s7  ;;  %v2402_v29 = vmul.f32 %v5208_v9, %v2400_v15  ;;  %v2401_v57 = vmul.f32 %v5219_v23, %v2400_v15 }
 0x612   : > { %v2659_v14 = vpop.permute.xlu1 %2658 }
 0x613   : > { %v2447_v45 = vadd.f32 %v2443_v31, %v2379_v19  ;;  %v2583_v28 = vadd.f32 %v2579_v36, %v2503_v49  ;;  %v2407_v4 = vrot.slane %v2401_v57, 5 }
 0x615   : > { %v2523_v53 = vadd.f32 %v2519_v39, %v2447_v45  ;;  %2638 = vrot.lane.b32.xlu1 %v2635_v10, %s3226_s15  ;;  %v2663_v3 = vadd.f32 %v2659_v14, %v2583_v28  ;;  %s2934_s15 = sshll.u32 %s3287_s25, 8  ;;  %s3228_s25 = smov [#allocation8]  }
 0x616   : > { %v1520_v56 = vpop.permute.xlu1 %1519  ;;  %s5608_s26 = scalar_lea.hbm %s5661_s6, %s2934_s15  ;;  %s3136_s19 = sshll.u32 %s3228_s25, 4  ;;  %s3137_s19 = int_to_ptr.vmem [resolvable:$false] %s3136_s19 }
 0x617   : > { %v1524_v34 = vadd.f32 %v1520_v56, %v5871_v46  ;;  %v2603_v44 = vadd.f32 %v2599_v6, %v2523_v53  ;;  %v2408_v6 = vrot.slane %v2402_v29, 5  ;;  %s3138_s18 = scalar_lea.vmem %s3137_s19, 512 }
 0x619   : > { %2668 = vrot.lane.b32.xlu1 %v2663_v3, %s3223_s7  ;;  %s2884_s7 = sld [smem:[#allocation7 + $0x38]]  ;;  %v2409_v62 = vsel %vm1491_vm12, %v2407_v4, %v2408_v6 }
 0x61f   : > { %v1856_v7 = vstv %s2884_s7 }
 0x620   : > { %v1858_v51 = vmul.f32 %v5208_v9, %v1856_v7  ;;  %v1857_v21 = vmul.f32 %v5219_v23, %v1856_v7  ;;  %v1859_v45 = vmul.f32 %v5450_v33, %v1856_v7 }
 0x622   : > { %v1864_v11 = vrot.slane %v1858_v51, 1  ;;  %v1863_v1 = vrot.slane %v1857_v21, 1  ;;  %v1866_v56 = vrot.slane %v1859_v45, 1 }
 0x624   : > { %v1865_v48 = vsel %vm943_vm11, %v1863_v1, %v1864_v11 }
 0x633   : > { %v2677_v40 = vpop.permute.xlu0 %2676 }
 0x634   : > { %v2682_v32 = vadd.f32 %v2677_v40, %v2602_v41 }
 0x636   : > { %2686 = vrot.lane.b32.xlu0 %v2682_v32, %s3225_s8 }
 0x637   : > { %v1598_v63 = vpop.permute.xlu0 %1597 }
 0x638   : > { %v1603_v43 = vadd.f32 %v1598_v63, %v5502_v2 }
 0x63b   : > { %v1678_v17 = vpop.permute.xlu0 %1677 }
 0x63c   : > { %v1683_v22 = vadd.f32 %v1678_v17, %v1603_v43 }
 0x63f   : > { %v1758_v20 = vpop.permute.xlu0 %1757 }
 0x640   : > { %v1763_v16 = vadd.f32 %v1758_v20, %v1683_v22 }
 0x643   : > { %v1810_v52 = vpop.permute.xlu0 %1809 }
 0x644   : > { %v1815_v37 = vadd.f32 %v1810_v52, %v1763_v16 }
 0x646   : > { %v1870_v36 = vadd.f32 %v1865_v48, %v1815_v37 }
 0x647   : > { %v1933_v13 = vpop.permute.xlu0 %1932 }
 0x648   : > { %v1938_v2 = vadd.f32 %v1933_v13, %v1870_v36  ;;  %v2403_v13 = vmul.f32 %v5450_v33, %v2400_v15 }
 0x64b   : > { %v2013_v27 = vpop.permute.xlu0 %2012 }
 0x64c   : > { %v2018_v25 = vadd.f32 %v2013_v27, %v1938_v2 }
 0x64f   : > { %v2093_v39 = vpop.permute.xlu0 %2092 }
 0x650   : > { %v2098_v24 = vadd.f32 %v2093_v39, %v2018_v25 }
 0x653   : > { %v2679_v50 = vpop.permute.xlu1 %2678  ;;  %v2173_v42 = vpop.permute.xlu0 %2172 }
 0x654   : > { %v2683_v38 = vadd.f32 %v2679_v50, %v2603_v44  ;;  %v2178_v12 = vadd.f32 %v2173_v42, %v2098_v24  ;;  %v1867_v44 = vsel %vm943_vm11, %v1864_v11, %v1866_v56 }
 0x656   : > { %2688 = vrot.lane.b32.xlu1 %v2683_v38, %s3225_s8  ;;  %s2818_s8 = sshll.u32 %s3393_s20, 4 }
 0x657   : > { %v1600_v47 = vpop.permute.xlu1 %1599  ;;  %v2253_v35 = vpop.permute.xlu0 %2252  ;;  %s283_s12 = scalar_lea.vmem [#allocation8], %s2818_s8 }
 0x658   : > { %v2258_v59 = vadd.f32 %v2253_v35, %v2178_v12  ;;  %v1604_v31 = vadd.f32 %v1600_v47, %v1524_v34  ;;  %s2723_s17 = sshll.u32 %s283_s12, 4  ;;  %s5610_s17 = int_to_ptr.vmem [resolvable:$true] %s2723_s17 }
 0x659   : > { %s3132_s28 = scalar_lea.vmem %s5610_s17, 256  ;;  %p3139_p10 = scmp.lt.s32.totalorder %s5610_s17, %s3137_s19 }
 0x65a   : > { %p3133_p13 = scmp.ne.s32.totalorder %s5610_s17, %s3132_s28  ;;  %p3140_p1 = scmp.lt.s32.totalorder %s3138_s18, %s3132_s28 }
 0x65b   : > { %v1680_v8 = vpop.permute.xlu1 %1679  ;;  %v2333_v26 = vpop.permute.xlu0 %2332 }
 0x65c   : > { %v2338_v58 = vadd.f32 %v2333_v26, %v2258_v59  ;;  %v1684_v9 = vadd.f32 %v1680_v8, %v1604_v31  ;;  %v2410_v8 = vrot.slane %v2403_v13, 5  ;;  %p3134_p8 = pnand %p3133_p13, %p5872_p12  ;;  %p3141_p4 = por %p3140_p1, %p3139_p10 }
 0x65e   : > { %v2414_v49 = vadd.f32 %v2409_v62, %v2338_v58  ;;  %v2411_v51 = vsel %vm1491_vm12, %v2408_v6, %v2410_v8  ;;  %p3135_p9 = pneg %p3134_p8 }
 0x65f   : > { %v1760_v0 = vpop.permute.xlu1 %1759  ;;  %v2477_v30 = vpop.permute.xlu0 %2476 }
 0x660   : > { %v2482_v14 = vadd.f32 %v2477_v30, %v2414_v49  ;;  %v1764_v53 = vadd.f32 %v1760_v0, %v1684_v9  ;;  %p3142_p11 = pnand %p3141_p4, %p3135_p9 }
 0x663   : > { %v1812_v60 = vpop.permute.xlu1 %1811  ;;  %v2557_v55 = vpop.permute.xlu0 %2556 }
 0x664   : > { %v2562_v28 = vadd.f32 %v2557_v55, %v2482_v14  ;;  %v1816_v46 = vadd.f32 %v1812_v60, %v1764_v53 }
 0x666   : > { %v1871_v50 = vadd.f32 %v1867_v44, %v1816_v46 }
 0x667   : > { %v1935_v5 = vpop.permute.xlu1 %1934  ;;  %v2637_v19 = vpop.permute.xlu0 %2636 }
 0x668   : > { %v2642_v23 = vadd.f32 %v2637_v19, %v2562_v28  ;;  %v1939_v34 = vadd.f32 %v1935_v5, %v1871_v50 }
 0x66b   : > { %v2015_v61 = vpop.permute.xlu1 %2014  ;;  %v2667_v10 = vpop.permute.xlu0 %2666 }
 0x66c   : > { %v2672_v41 = vadd.f32 %v2667_v10, %v2642_v23  ;;  %v2019_v17 = vadd.f32 %v2015_v61, %v1939_v34 }
 0x66f   : > { %v2095_v54 = vpop.permute.xlu1 %2094 }
 0x670   : > { %v2099_v52 = vadd.f32 %v2095_v54, %v2019_v17 }
 0x673   : > { %v2175_v18 = vpop.permute.xlu1 %2174 }
 0x674   : > { %v2179_v27 = vadd.f32 %v2175_v18, %v2099_v52 }
 0x677   : > { %v2255_v3 = vpop.permute.xlu1 %2254 }
 0x678   : > { %v2259_v39 = vadd.f32 %v2255_v3, %v2179_v27 }
 0x67b   : > { %v2335_v63 = vpop.permute.xlu1 %2334 }
 0x67c   : > { %v2339_v7 = vadd.f32 %v2335_v63, %v2259_v39 }
 0x67e   : > { %v2415_v0 = vadd.f32 %v2411_v51, %v2339_v7 }
 0x67f   : > { %v2479_v20 = vpop.permute.xlu1 %2478 }
 0x680   : > { %v2483_v21 = vadd.f32 %v2479_v20, %v2415_v0 }
 0x683   : > { %v2559_v42 = vpop.permute.xlu1 %2558 }
 0x684   : > { %v2563_v16 = vadd.f32 %v2559_v42, %v2483_v21 }
 0x687   : > { %v2639_v22 = vpop.permute.xlu1 %2638 }
 0x688   : > { %v2643_v33 = vadd.f32 %v2639_v22, %v2563_v16 }
 0x68b   : > { %v2669_v35 = vpop.permute.xlu1 %2668 }
 0x68c   : > { %v2673_v37 = vadd.f32 %v2669_v35, %v2643_v33 }
 0x6a8   : > { %v2687_v40 = vpop.permute.xlu0 %2686 }
 0x6a9   : > { %v2692_v32 = vadd.f32 %v2687_v40, %v2672_v41 }
 0x6ab   : > { %v2926_v38 = vmul.f32 -1.442695, %v2692_v32 }
 0x6ad   : > { %3069 = vpow2.f32 %v2926_v38 }
 0x6b7   : > { %v3070_v47 = vpop.eup %3069 }
 0x6b8   : > { %v2700_v43 = vadd.f32 1.0, %v3070_v47 }
 0x6ba   : > { %3071 = vrcp.f32 %v2700_v43 }
 0x6c4   : > { %v3072_v11 = vpop.eup %3071 }
 0x6c5   : > { %2707 = vst.msk [vmem:[%s283_s12] sm:$0xff] %vm2706_vm13, %v3072_v11 }
 0x6c8   : > { %v2689_v1 = vpop.permute.xlu1 %2688 }
 0x6c9   : > { %v2693_v60 = vadd.f32 %v2689_v1, %v2673_v37 }
 0x6cb   : > { %v2927_v48 = vmul.f32 -1.442695, %v2693_v60 }
 0x6cd   : > { %3073 = vpow2.f32 %v2927_v48 }
 0x6d7   : > { %v3074_v36 = vpop.eup %3073 }
 0x6d8   : > { %v2701_v26 = vadd.f32 1.0, %v3074_v36 }
 0x6da   : > { %3075 = vrcp.f32 %v2701_v26 }
 0x6e4   : > { %v3076_v5 = vpop.eup %3075 }
 0x6e5   : > { %2708 = vst.msk [vmem:[%s283_s12 + $0x8] sm:$0xff] %vm2706_vm13, %v3076_v5 }
 0x6e6   : > { %3145 = shalt.err (!%p3142_p11)
}
 0x6e7   : > { %s3146_s11 = scalar_lea.hbm %s5608_s26, 256  ;;  %s3150_s8 = scalar_lea.hbm %s5661_s6, 512 }
 0x6e8   : > { %p3147_p0 = scmp.ne.s32.totalorder %s5608_s26, %s3146_s11  ;;  %p3151_p6 = scmp.lt.u32.totalorder %s5608_s26, %s5661_s6 }
 0x6e9   : > { %p3152_p5 = scmp.lt.u32.totalorder %s3150_s8, %s3146_s11  ;;  %p3154_p13 = scmp.lt.u32.totalorder %s3146_s11, %s5608_s26 }
 0x6ea   : > { %p3148_p2 = pnand %p3147_p0, %p5872_p12 }
 0x6eb   : > { %p3153_p3 = por %p3152_p5, %p3151_p6 }
 0x6ec   : > { %p3149_p7 = pneg %p3148_p2 }
 0x6ed   : > { %p3155_p8 = por %p3154_p13, %p3153_p3 }
 0x6ef   : > { %p3156_p9 = pnand %p3155_p8, %p3149_p7 }
 0x6f1   : > { %3159 = shalt.err (!%p3156_p9)
}
 0x6f2   : > { %s3229_s29 = smov 128   ;;  %s3230_s13 = smov 8  }
 0x6f3   : > { %2976 = dma.vmem_to_hbm [thread:$0]  (%p5872_p12), %s5610_s17, 256, %s5608_s26, %s2710_s14, %s3229_s29, %s3229_s29, %s3230_s13  }
 0x6f4 PF: > { %s2738_s28 = sand.u32 1, %s3190_s21   ;;  %p5873_p10 = scmp.ne.s32.totalorder %s5704_s10, 0 }
 0x6f5   : > { %p5874_p1 = scmp.ge.s32.totalorder %s3202_s24, 2  ;;  %s2739_s25 = scalar_lea.sflag [#allocation5], %s2738_s28 }
 0x6f7   : > { %p2987_p4 = pnand %p5874_p1, %p5873_p10 }
 0x6f9   : > { %3185 = dma.done.wait (!%p2987_p4), %s2739_s25, 256  }
 0x6fa   : > { %3187 = vsyncadd (!%p2987_p4), %s2739_s25, 4294967040  ;;  %p20_p11 = scmp.ge.s32.totalorder %s3291_s27, 4   ;;  %s5875_s21 = smov %s3194_s22 }
 0x6fb   : > { %s5876_s22 = smov %s3198_s23  ;;  %s5877_s23 = smov %s3303_s30 }
 0x6fc   : > { %s5878_s24 = smov %s3291_s27  ;;  %22 = sbr.rel (!%p20_p11) target bundleno = 6 (0x6), region = 95 }
 0x703   :  { %2744 = vsyncpa [#allocation4], 1 }
 0x704   :  { %2746 = vsyncpa [#allocation4 + $0x1], 1 }
 0x705   :  { %2747 = vsyncpa [#allocation5], 1 }
 0x706   :  { %2749 = vsyncpa [#allocation5 + $0x1], 1 }
 0x707   :  { %2750 = vsyncpa [#allocation6], 1 }
 0x708   :  { %2752 = vsyncpa [#allocation6 + $0x1], 1 }

</bundles_post_ra>
